<compile_context>
chip_gen: v7x
topology: tpu7x:2x2x1
jax: 0.10.0
libtpu: 0.0.40
codegen_flags: <defaults>
</compile_context>

<pallas_src>
import functools

import numpy as np
import jax
import jax.numpy as jnp
from jax.experimental import pallas as pl
from jax.experimental.pallas import tpu as pltpu


# ----------------------------- config (synthetic) ---------------------------- #
STATE_NOISE_DIM = 32      # config.state_noise_dim
ACTION_NOISE_DIM = 32     # config.action_noise_dim (original forward requires == state_noise_dim)
CTX_CELL_SIZE = 64        # config.ctx_cell_size
ACTION_NUM = 16           # config.action_num
GUMBEL_TEMP = 0.8         # config.gumbel_temp
BATCH = 128               # demo batch: fills the MXU M dimension (perf feedback)

SUPER = 256               # fused lane width: state half = lanes [0,128), action half = [128,256)
HALF = SUPER // 2
OUT_LANES = 128           # single fused lane-dense output width
N_LAYERS = 8              # 2 trunk + 1 fused branch entry + 4 fused hidden + 1 fused head

# Rows each packed layer occupies in the bf16 weight slab (compact where possible).
# Trunk layers and the fused branch entry have fan_in 32 -> only 32 rows each.
_ROWS = (32, 32, 32, 256, 256, 256, 256, 256)
_ROW_OFF = tuple(int(x) for x in np.cumsum((0,) + _ROWS[:-1]))   # (0,32,64,96,352,608,864,1120)
TOTAL_ROWS = int(sum(_ROWS))                                      # 1376 -> slab = 688 KiB bf16

BATCH_TILE_MAX = 256      # one grid step handles up to 256 rows (v6e/v7x MXU M)


# --------------------------------- kernel ------------------------------------ #
def _generator_kernel(x_ref, u_ref, w_ref, b_ref, out_ref, *, gumbel_temp):
    inv_temp = 1.0 / gumbel_temp            # static python float

    def dense(x, i, relu):
        # Static, tile-aligned slices into the packed slabs (already VMEM resident).
        w = w_ref[pl.ds(_ROW_OFF[i], _ROWS[i]), :]        # (rows, 256) bf16, lane-dense
        b = b_ref[pl.ds(i, 1), :]                          # (1, 256)    f32
        y = jnp.dot(x.astype(jnp.bfloat16), w,
                    preferred_element_type=jnp.float32) + b
        return jnp.maximum(y, 0.0) if relu else y

    # ---- trunk (common_model): two 32->32 ReLU layers; keep only the 32 active lanes.
    h = x_ref[...]                                         # (BT, 32) f32
    h = dense(h, 0, True)[:, :STATE_NOISE_DIM]
    h = dense(h, 1, True)[:, :STATE_NOISE_DIM]

    # ---- fused branch entry: state_model[0] | action_model_2[0] in one (32,256) block.
    h = dense(h, 2, True)                                  # (BT, 256)

    # ---- fused block-diagonal hidden layers (state half | action half).
    # Layer 6's action block is a bf16 identity pass-through (the action branch is one
    # layer shorter).  This is EXACTLY equivalent because the pass-through value is
    # non-negative (already ReLU'd) and bf16 rounding is idempotent: casting it to bf16
    # here and again at layer 7 yields the same bits as the reference's single cast.
    for i in range(3, N_LAYERS - 1):
        h = dense(h, i, True)

    # ---- fused output head (no ReLU): state pre-sigmoid -> cols [0,64),
    #      action logits -> cols [64,80).
    pre = dense(h, N_LAYERS - 1, False)                    # (BT, 256)

    # Exact sigmoid (bounded in [0,1]); computed over the first 128 lanes, the
    # non-state lanes are discarded by the lane-select below.
    sig = 1.0 / (1.0 + jnp.exp(-pre[:, :OUT_LANES]))       # (BT, 128)

    # Straight-through gumbel-softmax forward value = one_hot(argmax((logits+g)/T)).
    logits = pre[:, CTX_CELL_SIZE:CTX_CELL_SIZE + ACTION_NUM]   # (BT, 16)
    eps = 1e-20
    g = -jnp.log(-jnp.log(u_ref[...] + eps) + eps)              # gumbel noise from uniforms
    z = (logits + g) * inv_temp
    idx16 = jax.lax.broadcasted_iota(jnp.int32, z.shape, 1)
    m = jnp.max(z, axis=-1, keepdims=True)
    arg = jnp.min(jnp.where(z == m, idx16, ACTION_NUM),          # first-max-wins (torch.max)
                  axis=-1, keepdims=True)                        # (BT, 1) int32

    # ONE lane-dense (BT,128) store: [0,64)=sigmoid state, [64,80)=one-hot, rest 0.
    # Built with pure VPU iota/compare/select ops (no lane shuffles, no masked stores).
    lane = jax.lax.broadcasted_iota(jnp.int32, (pre.shape[0], OUT_LANES), 1)
    onehot = jnp.logical_and(lane >= CTX_CELL_SIZE,
                             (lane - CTX_CELL_SIZE) == arg).astype(jnp.float32)
    out_ref[...] = jnp.where(lane < CTX_CELL_SIZE, sig, onehot)


# --------------------------------- params ------------------------------------ #
def init_params(key):
    """PyTorch nn.Linear default init: U(-1/sqrt(fan_in), 1/sqrt(fan_in))."""
    def linear(k, fan_in, fan_out):
        kw, kb = jax.random.split(k)
        bound = fan_in ** -0.5
        w = jax.random.uniform(kw, (fan_in, fan_out), jnp.float32, -bound, bound)
        b = jax.random.uniform(kb, (fan_out,), jnp.float32, -bound, bound)
        return w, b

    dims_common = [(STATE_NOISE_DIM, STATE_NOISE_DIM)] * 2
    dims_state = [(STATE_NOISE_DIM, 128), (128, 96), (96, 96),
                  (96, 96), (96, 128), (128, CTX_CELL_SIZE)]
    dims_action = [(ACTION_NOISE_DIM, 128), (128, 96), (96, 96),
                   (96, 128), (128, ACTION_NUM)]

    dims = dims_common + dims_state + dims_action
    keys = jax.random.split(key, len(dims))
    layers = [linear(k, fi, fo) for k, (fi, fo) in zip(keys, dims)]
    return layers[:2], layers[2:8], layers[8:]          # common, state, action


def pack_params(common, state, action):
    """Pack the 13 Linear layers into the compact 8-super-layer slab.

    Lane layout of every 256-wide activation / super-weight:
      lanes [0, 128)   : state branch
      lanes [128, 256) : action branch
    Unused rows/cols/bias entries are zero, so padded lanes stay exactly 0 through
    ReLU and the math is identical to the unfused network.
    Layer 7 maps the state head to output cols [0,64) and the action head to
    cols [64,80), producing the fused (B,128) output directly.
    """
    W = np.zeros((TOTAL_ROWS, SUPER), np.float32)
    Bv = np.zeros((N_LAYERS, SUPER), np.float32)

    def put(layer, r0, c0, w, b=None):
        w = np.asarray(w, np.float32)
        r = _ROW_OFF[layer] + r0
        W[r:r + w.shape[0], c0:c0 + w.shape[1]] = w
        if b is not None:
            b = np.asarray(b, np.float32)
            Bv[layer, c0:c0 + b.shape[0]] = b

    (cw0, cb0), (cw1, cb1) = common
    put(0, 0, 0, cw0, cb0)                                   # trunk 0 (32->32), ReLU
    put(1, 0, 0, cw1, cb1)                                   # trunk 1 (32->32), ReLU
    put(2, 0, 0, *state[0]); put(2, 0, HALF, *action[0])     # fused (32,256) branch entry, ReLU
    put(3, 0, 0, *state[1]); put(3, HALF, HALF, *action[1])  # block-diag, ReLU
    put(4, 0, 0, *state[2]); put(4, HALF, HALF, *action[2])  # block-diag, ReLU
    put(5, 0, 0, *state[3]); put(5, HALF, HALF, *action[3])  # block-diag, ReLU
    # state layer 4 + identity pass-through of the (already ReLU'd) action activation
    put(6, 0, 0, *state[4]); put(6, HALF, HALF, np.eye(HALF, dtype=np.float32))
    # output heads (no ReLU): state pre-sigmoid -> cols [0,64), action logits -> [64,80)
    put(7, 0, 0, *state[5]); put(7, HALF, CTX_CELL_SIZE, *action[4])

    return jnp.asarray(W).astype(jnp.bfloat16), jnp.asarray(Bv)


# --------------------------------- wrapper ------------------------------------ #
def _round_up(n, m):
    return ((n + m - 1) // m) * m


@functools.partial(jax.jit, static_argnames=("gumbel_temp",))
def generator_forward(s_z, a_z, uniform_noise, w_slab, b_slab, gumbel_temp=GUMBEL_TEMP):
    # a_z accepted for API parity but (as in the original forward()) unused:
    # action_model_2 consumes the common trunk output, not a_z.
    del a_z
    B = s_z.shape[0]
    bt = min(_round_up(B, 8), BATCH_TILE_MAX)          # batch tile (MXU M rows per step)
    nb = _round_up(B, bt) // bt
    Bp = nb * bt
    if Bp != B:
        s_z = jnp.pad(s_z, ((0, Bp - B), (0, 0)))
        uniform_noise = jnp.pad(uniform_noise, ((0, Bp - B), (0, 0)), constant_values=0.5)

    kernel = functools.partial(_generator_kernel, gumbel_temp=gumbel_temp)
    grid_spec = pltpu.PrefetchScalarGridSpec(
        num_scalar_prefetch=0,
        grid=(nb,),
        in_specs=[
            pl.BlockSpec((bt, STATE_NOISE_DIM), lambda i: (i, 0)),     # s_z batch tile
            pl.BlockSpec((bt, ACTION_NUM), lambda i: (i, 0)),          # uniform noise tile
            # Constant index_map -> slabs stay VMEM-resident (single DMA across all tiles).
            pl.BlockSpec((TOTAL_ROWS, SUPER), lambda i: (0, 0)),       # 688 KiB bf16 weights
            pl.BlockSpec((N_LAYERS, SUPER), lambda i: (0, 0)),         # 8 KiB f32 biases
        ],
        out_specs=pl.BlockSpec((bt, OUT_LANES), lambda i: (i, 0)),     # fused lane-dense output
    )
    # Total resident footprint (slab + activations + output) is ~1 MiB — far below the
    # scoped VMEM limit on v5e/v6e/v7x, so no vmem_limit_bytes / weight tiling needed.
    fused = pl.pallas_call(
        kernel,
        out_shape=jax.ShapeDtypeStruct((Bp, OUT_LANES), jnp.float32),
        grid_spec=grid_spec,
        compiler_params=pltpu.CompilerParams(dimension_semantics=("parallel",)),
    )(s_z, uniform_noise, w_slab, b_slab)

    state_rep = fused[:B, :CTX_CELL_SIZE]
    action_rep = fused[:B, CTX_CELL_SIZE:CTX_CELL_SIZE + ACTION_NUM]
    return state_rep, action_rep


# ------------------------------ pure-JAX reference ---------------------------- #
def reference_forward(s_z, u, common, state, action, gumbel_temp):
    """Plain per-layer JAX forward using the same bf16 weights (validates packing)."""
    def lin(x, w, b):
        return jnp.dot(x.astype(jnp.bfloat16), w.astype(jnp.bfloat16),
                       preferred_element_type=jnp.float32) + b

    def relu(x):
        return jnp.maximum(x, 0.0)

    h = s_z
    for w, b in common:
        h = relu(lin(h, w, b))
    s = h
    for w, b in state[:-1]:
        s = relu(lin(s, w, b))
    state_rep = jax.nn.sigmoid(lin(s, *state[-1]))

    a = h
    for w, b in action[:-1]:
        a = relu(lin(a, w, b))
    logits = lin(a, *action[-1])
    g = -jnp.log(-jnp.log(u + 1e-20) + 1e-20)
    z = (logits + g) / gumbel_temp
    action_rep = jax.nn.one_hot(jnp.argmax(z, axis=-1), ACTION_NUM, dtype=jnp.float32)
    return state_rep, action_rep


if __name__ == "__main__":
    key = jax.random.PRNGKey(0)
    k_params, k_sz, k_az, k_u = jax.random.split(key, 4)

    common, state, action = init_params(k_params)
    w_slab, b_slab = pack_params(common, state, action)

    s_z = jax.random.normal(k_sz, (BATCH, STATE_NOISE_DIM), jnp.float32)
    a_z = jax.random.normal(k_az, (BATCH, ACTION_NOISE_DIM), jnp.float32)
    # Uniform samples in (0,1) for gumbel noise (torch.rand equivalent); kept as a
    # kernel input so the result is deterministic and checkable against the reference.
    u = jax.random.uniform(k_u, (BATCH, ACTION_NUM), jnp.float32,
                           minval=1e-7, maxval=1.0 - 1e-7)

    state_rep, action_rep = generator_forward(s_z, a_z, u, w_slab, b_slab)
    jax.block_until_ready((state_rep, action_rep))

    # shape / range / one-hot sanity
    assert state_rep.shape == (BATCH, CTX_CELL_SIZE)
    assert action_rep.shape == (BATCH, ACTION_NUM)
    assert bool(jnp.all(jnp.sum(action_rep, axis=-1) == 1.0))
    assert bool(jnp.all((state_rep >= 0.0) & (state_rep <= 1.0)))

    # numerical check against the plain-JAX reference (same bf16 weights);
    # tolerance covers MXU accumulation-order differences.
    state_ref, action_ref = reference_forward(s_z, u, common, state, action, GUMBEL_TEMP)
    assert bool(jnp.all(jnp.abs(state_rep - state_ref) < 2e-2))
    assert bool(jnp.all(action_rep == action_ref))

    print("KERNEL_OK")
</pallas_src>

<mosaic_0001>
module attributes {stable_mosaic.version = 11 : i64} {
  func.func @_generator_kernel(%arg0: i32, %arg1: memref<128x32xf32, #tpu.memory_space<vmem>>, %arg2: memref<128x16xf32, #tpu.memory_space<vmem>>, %arg3: memref<1376x256xbf16, #tpu.memory_space<vmem>>, %arg4: memref<8x256xf32, #tpu.memory_space<vmem>>, %arg5: memref<128x128xf32, #tpu.memory_space<vmem>>) attributes {dimension_semantics = [#tpu.dimension_semantics<parallel>], iteration_bounds = array<i64: 1>, scalar_prefetch = 0 : i64, scratch_operands = 0 : i64, tpu.core_type = #tpu.core_type<tc>, window_params = [{transform_indices = @transform_0, window_bounds = array<i64: 128, 32>}, {transform_indices = @transform_1, window_bounds = array<i64: 128, 16>}, {pipeline_mode = #tpu.pipeline_mode<synchronous>, transform_indices = @transform_2, window_bounds = array<i64: 1376, 256>}, {pipeline_mode = #tpu.pipeline_mode<synchronous>, transform_indices = @transform_3, window_bounds = array<i64: 8, 256>}, {transform_indices = @transform_4, window_bounds = array<i64: 128, 128>}]} {
    %c0 = arith.constant 0 : index
    %c0_0 = arith.constant 0 : index
    %0 = vector.load %arg1[%c0, %c0_0] : memref<128x32xf32, #tpu.memory_space<vmem>>, vector<128x32xf32>
    %c0_1 = arith.constant 0 : index
    %c0_2 = arith.constant 0 : index
    %1 = vector.load %arg3[%c0_1, %c0_2] : memref<1376x256xbf16, #tpu.memory_space<vmem>>, vector<32x256xbf16>
    %c0_3 = arith.constant 0 : index
    %c0_4 = arith.constant 0 : index
    %2 = vector.load %arg4[%c0_3, %c0_4] : memref<8x256xf32, #tpu.memory_space<vmem>>, vector<1x256xf32>
    %3 = arith.truncf %0 : vector<128x32xf32> to vector<128x32xbf16>
    %cst = arith.constant dense<0.000000e+00> : vector<128x256xf32>
    %4 = tpu.matmul %3, %1, %cst {dimension_numbers = #tpu.dot_dimension_numbers<[1], [0], [0], [1], [0, 0, 1, 1], [], []>} : vector<128x32xbf16>, vector<32x256xbf16>, vector<128x256xf32> -> vector<128x256xf32>
    %5 = vector.broadcast %2 : vector<1x256xf32> to vector<128x256xf32>
    %6 = arith.addf %4, %5 : vector<128x256xf32>
    %cst_5 = arith.constant 0.000000e+00 : f32
    %7 = vector.broadcast %cst_5 : f32 to vector<128x256xf32>
    %8 = arith.maximumf %6, %7 : vector<128x256xf32>
    %9 = vector.extract_strided_slice %8 {offsets = [0, 0], sizes = [128, 32], strides = [1, 1]} : vector<128x256xf32> to vector<128x32xf32>
    %c32 = arith.constant 32 : index
    %c0_6 = arith.constant 0 : index
    %10 = vector.load %arg3[%c32, %c0_6] : memref<1376x256xbf16, #tpu.memory_space<vmem>>, vector<32x256xbf16>
    %c1 = arith.constant 1 : index
    %c0_7 = arith.constant 0 : index
    %11 = vector.load %arg4[%c1, %c0_7] : memref<8x256xf32, #tpu.memory_space<vmem>>, vector<1x256xf32>
    %12 = arith.truncf %9 : vector<128x32xf32> to vector<128x32xbf16>
    %cst_8 = arith.constant dense<0.000000e+00> : vector<128x256xf32>
    %13 = tpu.matmul %12, %10, %cst_8 {dimension_numbers = #tpu.dot_dimension_numbers<[1], [0], [0], [1], [0, 0, 1, 1], [], []>} : vector<128x32xbf16>, vector<32x256xbf16>, vector<128x256xf32> -> vector<128x256xf32>
    %14 = vector.broadcast %11 : vector<1x256xf32> to vector<128x256xf32>
    %15 = arith.addf %13, %14 : vector<128x256xf32>
    %cst_9 = arith.constant 0.000000e+00 : f32
    %16 = vector.broadcast %cst_9 : f32 to vector<128x256xf32>
    %17 = arith.maximumf %15, %16 : vector<128x256xf32>
    %18 = vector.extract_strided_slice %17 {offsets = [0, 0], sizes = [128, 32], strides = [1, 1]} : vector<128x256xf32> to vector<128x32xf32>
    %c64 = arith.constant 64 : index
    %c0_10 = arith.constant 0 : index
    %19 = vector.load %arg3[%c64, %c0_10] : memref<1376x256xbf16, #tpu.memory_space<vmem>>, vector<32x256xbf16>
    %c2 = arith.constant 2 : index
    %c0_11 = arith.constant 0 : index
    %20 = vector.load %arg4[%c2, %c0_11] : memref<8x256xf32, #tpu.memory_space<vmem>>, vector<1x256xf32>
    %21 = arith.truncf %18 : vector<128x32xf32> to vector<128x32xbf16>
    %cst_12 = arith.constant dense<0.000000e+00> : vector<128x256xf32>
    %22 = tpu.matmul %21, %19, %cst_12 {dimension_numbers = #tpu.dot_dimension_numbers<[1], [0], [0], [1], [0, 0, 1, 1], [], []>} : vector<128x32xbf16>, vector<32x256xbf16>, vector<128x256xf32> -> vector<128x256xf32>
    %23 = vector.broadcast %20 : vector<1x256xf32> to vector<128x256xf32>
    %24 = arith.addf %22, %23 : vector<128x256xf32>
    %cst_13 = arith.constant 0.000000e+00 : f32
    %25 = vector.broadcast %cst_13 : f32 to vector<128x256xf32>
    %26 = arith.maximumf %24, %25 : vector<128x256xf32>
    %c96 = arith.constant 96 : index
    %c0_14 = arith.constant 0 : index
    %27 = vector.load %arg3[%c96, %c0_14] : memref<1376x256xbf16, #tpu.memory_space<vmem>>, vector<256x256xbf16>
    %c3 = arith.constant 3 : index
    %c0_15 = arith.constant 0 : index
    %28 = vector.load %arg4[%c3, %c0_15] : memref<8x256xf32, #tpu.memory_space<vmem>>, vector<1x256xf32>
    %29 = arith.truncf %26 : vector<128x256xf32> to vector<128x256xbf16>
    %cst_16 = arith.constant dense<0.000000e+00> : vector<128x256xf32>
    %30 = tpu.matmul %29, %27, %cst_16 {dimension_numbers = #tpu.dot_dimension_numbers<[1], [0], [0], [1], [0, 0, 1, 1], [], []>} : vector<128x256xbf16>, vector<256x256xbf16>, vector<128x256xf32> -> vector<128x256xf32>
    %31 = vector.broadcast %28 : vector<1x256xf32> to vector<128x256xf32>
    %32 = arith.addf %30, %31 : vector<128x256xf32>
    %cst_17 = arith.constant 0.000000e+00 : f32
    %33 = vector.broadcast %cst_17 : f32 to vector<128x256xf32>
    %34 = arith.maximumf %32, %33 : vector<128x256xf32>
    %c352 = arith.constant 352 : index
    %c0_18 = arith.constant 0 : index
    %35 = vector.load %arg3[%c352, %c0_18] : memref<1376x256xbf16, #tpu.memory_space<vmem>>, vector<256x256xbf16>
    %c4 = arith.constant 4 : index
    %c0_19 = arith.constant 0 : index
    %36 = vector.load %arg4[%c4, %c0_19] : memref<8x256xf32, #tpu.memory_space<vmem>>, vector<1x256xf32>
    %37 = arith.truncf %34 : vector<128x256xf32> to vector<128x256xbf16>
    %cst_20 = arith.constant dense<0.000000e+00> : vector<128x256xf32>
    %38 = tpu.matmul %37, %35, %cst_20 {dimension_numbers = #tpu.dot_dimension_numbers<[1], [0], [0], [1], [0, 0, 1, 1], [], []>} : vector<128x256xbf16>, vector<256x256xbf16>, vector<128x256xf32> -> vector<128x256xf32>
    %39 = vector.broadcast %36 : vector<1x256xf32> to vector<128x256xf32>
    %40 = arith.addf %38, %39 : vector<128x256xf32>
    %cst_21 = arith.constant 0.000000e+00 : f32
    %41 = vector.broadcast %cst_21 : f32 to vector<128x256xf32>
    %42 = arith.maximumf %40, %41 : vector<128x256xf32>
    %c608 = arith.constant 608 : index
    %c0_22 = arith.constant 0 : index
    %43 = vector.load %arg3[%c608, %c0_22] : memref<1376x256xbf16, #tpu.memory_space<vmem>>, vector<256x256xbf16>
    %c5 = arith.constant 5 : index
    %c0_23 = arith.constant 0 : index
    %44 = vector.load %arg4[%c5, %c0_23] : memref<8x256xf32, #tpu.memory_space<vmem>>, vector<1x256xf32>
    %45 = arith.truncf %42 : vector<128x256xf32> to vector<128x256xbf16>
    %cst_24 = arith.constant dense<0.000000e+00> : vector<128x256xf32>
    %46 = tpu.matmul %45, %43, %cst_24 {dimension_numbers = #tpu.dot_dimension_numbers<[1], [0], [0], [1], [0, 0, 1, 1], [], []>} : vector<128x256xbf16>, vector<256x256xbf16>, vector<128x256xf32> -> vector<128x256xf32>
    %47 = vector.broadcast %44 : vector<1x256xf32> to vector<128x256xf32>
    %48 = arith.addf %46, %47 : vector<128x256xf32>
    %cst_25 = arith.constant 0.000000e+00 : f32
    %49 = vector.broadcast %cst_25 : f32 to vector<128x256xf32>
    %50 = arith.maximumf %48, %49 : vector<128x256xf32>
    %c864 = arith.constant 864 : index
    %c0_26 = arith.constant 0 : index
    %51 = vector.load %arg3[%c864, %c0_26] : memref<1376x256xbf16, #tpu.memory_space<vmem>>, vector<256x256xbf16>
    %c6 = arith.constant 6 : index
    %c0_27 = arith.constant 0 : index
    %52 = vector.load %arg4[%c6, %c0_27] : memref<8x256xf32, #tpu.memory_space<vmem>>, vector<1x256xf32>
    %53 = arith.truncf %50 : vector<128x256xf32> to vector<128x256xbf16>
    %cst_28 = arith.constant dense<0.000000e+00> : vector<128x256xf32>
    %54 = tpu.matmul %53, %51, %cst_28 {dimension_numbers = #tpu.dot_dimension_numbers<[1], [0], [0], [1], [0, 0, 1, 1], [], []>} : vector<128x256xbf16>, vector<256x256xbf16>, vector<128x256xf32> -> vector<128x256xf32>
    %55 = vector.broadcast %52 : vector<1x256xf32> to vector<128x256xf32>
    %56 = arith.addf %54, %55 : vector<128x256xf32>
    %cst_29 = arith.constant 0.000000e+00 : f32
    %57 = vector.broadcast %cst_29 : f32 to vector<128x256xf32>
    %58 = arith.maximumf %56, %57 : vector<128x256xf32>
    %c1120 = arith.constant 1120 : index
    %c0_30 = arith.constant 0 : index
    %59 = vector.load %arg3[%c1120, %c0_30] : memref<1376x256xbf16, #tpu.memory_space<vmem>>, vector<256x256xbf16>
    %c7 = arith.constant 7 : index
    %c0_31 = arith.constant 0 : index
    %60 = vector.load %arg4[%c7, %c0_31] : memref<8x256xf32, #tpu.memory_space<vmem>>, vector<1x256xf32>
    %61 = arith.truncf %58 : vector<128x256xf32> to vector<128x256xbf16>
    %cst_32 = arith.constant dense<0.000000e+00> : vector<128x256xf32>
    %62 = tpu.matmul %61, %59, %cst_32 {dimension_numbers = #tpu.dot_dimension_numbers<[1], [0], [0], [1], [0, 0, 1, 1], [], []>} : vector<128x256xbf16>, vector<256x256xbf16>, vector<128x256xf32> -> vector<128x256xf32>
    %63 = vector.broadcast %60 : vector<1x256xf32> to vector<128x256xf32>
    %64 = arith.addf %62, %63 : vector<128x256xf32>
    %65 = vector.extract_strided_slice %64 {offsets = [0, 0], sizes = [128, 128], strides = [1, 1]} : vector<128x256xf32> to vector<128x128xf32>
    %cst_33 = arith.constant 0.000000e+00 : f32
    %66 = vector.broadcast %cst_33 : f32 to vector<128x128xf32>
    %67 = arith.subf %66, %65 : vector<128x128xf32>
    %68 = math.exp %67 : vector<128x128xf32>
    %cst_34 = arith.constant 1.000000e+00 : f32
    %69 = vector.broadcast %cst_34 : f32 to vector<128x128xf32>
    %70 = arith.addf %69, %68 : vector<128x128xf32>
    %cst_35 = arith.constant 1.000000e+00 : f32
    %71 = vector.broadcast %cst_35 : f32 to vector<128x128xf32>
    %72 = arith.divf %71, %70 : vector<128x128xf32>
    %73 = vector.extract_strided_slice %64 {offsets = [0, 64], sizes = [128, 16], strides = [1, 1]} : vector<128x256xf32> to vector<128x16xf32>
    %c0_36 = arith.constant 0 : index
    %c0_37 = arith.constant 0 : index
    %74 = vector.load %arg2[%c0_36, %c0_37] : memref<128x16xf32, #tpu.memory_space<vmem>>, vector<128x16xf32>
    %cst_38 = arith.constant 9.99999968E-21 : f32
    %75 = vector.broadcast %cst_38 : f32 to vector<128x16xf32>
    %76 = arith.addf %74, %75 : vector<128x16xf32>
    %77 = math.log %76 : vector<128x16xf32>
    %cst_39 = arith.constant 0.000000e+00 : f32
    %78 = vector.broadcast %cst_39 : f32 to vector<128x16xf32>
    %79 = arith.subf %78, %77 : vector<128x16xf32>
    %cst_40 = arith.constant 9.99999968E-21 : f32
    %80 = vector.broadcast %cst_40 : f32 to vector<128x16xf32>
    %81 = arith.addf %79, %80 : vector<128x16xf32>
    %82 = math.log %81 : vector<128x16xf32>
    %cst_41 = arith.constant 0.000000e+00 : f32
    %83 = vector.broadcast %cst_41 : f32 to vector<128x16xf32>
    %84 = arith.subf %83, %82 : vector<128x16xf32>
    %85 = arith.addf %73, %84 : vector<128x16xf32>
    %cst_42 = arith.constant 1.250000e+00 : f32
    %86 = vector.broadcast %cst_42 : f32 to vector<128x16xf32>
    %87 = arith.mulf %85, %86 : vector<128x16xf32>
    %88 = tpu.iota {dimensions = array<i32: 1>} : vector<128x16xi32>
    %cst_43 = arith.constant dense<0xFF800000> : vector<128xf32>
    %89 = vector.multi_reduction <maximumf>, %87, %cst_43 [1] : vector<128x16xf32> to vector<128xf32>
    %90 = vector.shape_cast %89 : vector<128xf32> to vector<128x1xf32>
    %91 = vector.broadcast %90 : vector<128x1xf32> to vector<128x16xf32>
    %92 = arith.cmpf oeq, %87, %91 : vector<128x16xf32>
    %c16_i32 = arith.constant 16 : i32
    %93 = vector.broadcast %c16_i32 : i32 to vector<128x16xi32>
    %94 = arith.select %92, %88, %93 : vector<128x16xi1>, vector<128x16xi32>
    %cst_44 = arith.constant dense<2147483647> : vector<128xi32>
    %95 = vector.multi_reduction <minsi>, %94, %cst_44 [1] : vector<128x16xi32> to vector<128xi32>
    %96 = vector.shape_cast %95 : vector<128xi32> to vector<128x1xi32>
    %97 = tpu.iota {dimensions = array<i32: 1>} : vector<128x128xi32>
    %c64_i32 = arith.constant 64 : i32
    %98 = vector.broadcast %c64_i32 : i32 to vector<128x128xi32>
    %99 = arith.cmpi sge, %97, %98 : vector<128x128xi32>
    %c64_i32_45 = arith.constant 64 : i32
    %100 = vector.broadcast %c64_i32_45 : i32 to vector<128x128xi32>
    %101 = arith.subi %97, %100 : vector<128x128xi32>
    %102 = vector.broadcast %96 : vector<128x1xi32> to vector<128x128xi32>
    %103 = arith.cmpi eq, %101, %102 : vector<128x128xi32>
    %104 = arith.andi %99, %103 : vector<128x128xi1>
    %105 = arith.extui %104 : vector<128x128xi1> to vector<128x128xi32>
    %106 = arith.sitofp %105 : vector<128x128xi32> to vector<128x128xf32>
    %c64_i32_46 = arith.constant 64 : i32
    %107 = vector.broadcast %c64_i32_46 : i32 to vector<128x128xi32>
    %108 = arith.cmpi slt, %97, %107 : vector<128x128xi32>
    %109 = arith.select %108, %72, %106 : vector<128x128xi1>, vector<128x128xf32>
    %c0_47 = arith.constant 0 : index
    %c0_48 = arith.constant 0 : index
    %110 = vector.load %arg5[%c0_47, %c0_48] : memref<128x128xf32, #tpu.memory_space<vmem>>, vector<128x128xf32>
    tpu.vector_store %arg5[%c0_47, %c0_48], %109 {strides = array<i32>} : memref<128x128xf32, #tpu.memory_space<vmem>>, vector<128x128xf32>,
    return
  }
  func.func @transform_0(%arg0: i32) -> (i32, i32) {
    %c0_i32 = arith.constant 0 : i32
    %c0_i32_0 = arith.constant 0 : i32
    return %arg0, %c0_i32 : i32, i32
  }
  func.func @transform_1(%arg0: i32) -> (i32, i32) {
    %c0_i32 = arith.constant 0 : i32
    %c0_i32_0 = arith.constant 0 : i32
    return %arg0, %c0_i32 : i32, i32
  }
  func.func @transform_2(%arg0: i32) -> (i32, i32) {
    %c0_i32 = arith.constant 0 : i32
    %c0_i32_0 = arith.constant 0 : i32
    %c0_i32_1 = arith.constant 0 : i32
    return %c0_i32, %c0_i32_0 : i32, i32
  }
  func.func @transform_3(%arg0: i32) -> (i32, i32) {
    %c0_i32 = arith.constant 0 : i32
    %c0_i32_0 = arith.constant 0 : i32
    %c0_i32_1 = arith.constant 0 : i32
    return %c0_i32, %c0_i32_0 : i32, i32
  }
  func.func @transform_4(%arg0: i32) -> (i32, i32) {
    %c0_i32 = arith.constant 0 : i32
    %c0_i32_0 = arith.constant 0 : i32
    return %arg0, %c0_i32 : i32, i32
  }
}

</mosaic_0001>

<bundles_post_ra>
// kernel: generator_forward.1
= control target key start
LH: loop header
LB: loop body
LE: loop exit
PB: predicated region body
PF: predicated region fallthrough
CT: control target
= control target key end

     0   :  { %9 = vsyncpa [#allocation3], 0  ;;  %s3794_s15 = smov [#allocation2]   ;;  %s4803_s0 = inlined_call_operand.vmem [shape: f32[128,32], index: 0, kind: input, shape index: {}]   ;;  %s4804_s1 = inlined_call_operand.vmem [shape: f32[128,16], index: 1, kind: input, shape index: {}]   ;;  %s4805_s2 = inlined_call_operand.hbm [shape: bf16[1376,256], index: 2, kind: input, shape index: {}]   ;;  %s4806_s3 = inlined_call_operand.vmem [shape: f32[8,256], index: 3, kind: input, shape index: {}]   ;;  %s4807_s4 = inlined_call_operand.vmem [shape: f32[128,128], index: 4, kind: output, shape index: {}]  }
   0x1   :  { %s19_s16 = sshll.u32 %s3794_s15, 4  ;;  %s3770_s19 = scalar_lea.hbm %s4805_s2, 22016  ;;  %s20_s16 = int_to_ptr.vmem [resolvable:$true] %s19_s16 }
   0x2   :  { %p3771_p0 = scmp.ne.s32.totalorder %s4805_s2, %s3770_s19  ;;  %p3774_p1 = scmp.lt.u32.totalorder %s3770_s19, %s4805_s2 }
   0x4   :  { %p3776_p2 = pnand %p3774_p1, %p3771_p0 }
   0x6   :  { %3779 = shalt.err (!%p3776_p2)
}
   0x7   :  { %s3780_s24 = scalar_lea.vmem %s20_s16, 22016  ;;  %p3785_p4 = scmp.lt.s32.totalorder %s20_s16, %s20_s16 }
   0x8   :  { %p3781_p3 = scmp.ne.s32.totalorder %s20_s16, %s3780_s24  ;;  %p3786_p5 = scmp.lt.s32.totalorder %s3780_s24, %s3780_s24 }
   0xa   :  { %p3787_p6 = por %p3786_p5, %p3785_p4 }
   0xc   :  { %p3788_p7 = pnand %p3787_p6, %p3781_p3 }
   0xe   :  { %3791 = shalt.err (!%p3788_p7)
}
   0xf   :  { %s3795_s25 = smov 128   ;;  %s3796_s26 = smov 8  }
  0x10   :  { %25 = dma.hbm_to_vmem [thread:$0]  %s4805_s2, 22016, %s20_s16, [#allocation3], %s3795_s25, %s3795_s25, %s3796_s26  }
  0x11   :  { %3792 = dma.done.wait [#allocation3], 22016  }
  0x12   :  { %3793 = vsyncadd [#allocation3], 4294945280  ;;  %v3797_v0 = vmov 0   ;;  %v3384_v1 = vld [vmem:[#allocation2 + $0x4] ss:$8 sps:$4 sm:$0xff]   ;;  %vm87_vm0 = vcmask 261120   ;;  %v62_v37 = vlaneseq }
  0x13   :  { %144 = vmatprep.mubr.bf16.mxu0 %v3797_v0  ;;  %321 = vmatprep.mubr.bf16.mxu1 %v3797_v0  ;;  %v3386_v2 = vld [vmem:[#allocation2] ss:$8 sps:$4 sm:$0xff]   ;;  %v3387_v3 = vld [vmem:[#allocation2 + $0x14] ss:$8 sps:$4 sm:$0xff]   ;;  %v3389_v4 = vld [vmem:[#allocation2 + $0x10] ss:$8 sps:$4 sm:$0xff]  }
  0x14   :  { %112 = vmatprep.subr.bf16.mxu0 %v3384_v1  ;;  %v32_v5 = vld [vmem:[%s4803_s0] sm:$0xff]  ;;  %v33_v6 = vld [vmem:[%s4803_s0 + $0x8] sm:$0xff]  ;;  %v34_v8 = vld [vmem:[%s4803_s0 + $0x10] sm:$0xff]  ;;  %v3904_v38 = vshrl.u32 %v62_v37, 7  ;;  %vm2731_vm1 = vcmask 654848  }
  0x15   :  { %113 = vmatpush1.bf16.msra.mxu0 %v3386_v2  ;;  %v53_v7 = vpack.c.bf16 %v33_v6, %v32_v5  ;;  %v35_v9 = vld [vmem:[%s4803_s0 + $0x18] sm:$0xff]  ;;  %v36_v11 = vld [vmem:[%s4803_s0 + $0x20] sm:$0xff]  ;;  %v37_v12 = vld [vmem:[%s4803_s0 + $0x28] sm:$0xff] }
  0x16   :  { %114 = vmatprep.subr.bf16.mxu0 %v3387_v3  ;;  %v54_v10 = vpack.c.bf16 %v35_v9, %v34_v8  ;;  %v55_v13 = vpack.c.bf16 %v37_v12, %v36_v11  ;;  %v38_v14 = vld [vmem:[%s4803_s0 + $0x30] sm:$0xff]  ;;  %v39_v15 = vld [vmem:[%s4803_s0 + $0x38] sm:$0xff]  ;;  %v40_v17 = vld [vmem:[%s4803_s0 + $0x40] sm:$0xff]  ;;  %v3907_v39 = vsub.s32 0, %v3904_v38 }
  0x17   :  { %v56_v16 = vpack.c.bf16 %v39_v15, %v38_v14  ;;  %v41_v18 = vld [vmem:[%s4803_s0 + $0x48] sm:$0xff]  ;;  %v42_v20 = vld [vmem:[%s4803_s0 + $0x50] sm:$0xff]  ;;  %v43_v21 = vld [vmem:[%s4803_s0 + $0x58] sm:$0xff] }
  0x18   :  { %v57_v19 = vpack.c.bf16 %v41_v18, %v40_v17  ;;  %v58_v22 = vpack.c.bf16 %v43_v21, %v42_v20  ;;  %v44_v23 = vld [vmem:[%s4803_s0 + $0x60] sm:$0xff]  ;;  %v45_v24 = vld [vmem:[%s4803_s0 + $0x68] sm:$0xff]  ;;  %v46_v26 = vld [vmem:[%s4803_s0 + $0x70] sm:$0xff] }
  0x19   :  { %115 = vmatpush1.bf16.msra.mxu0 %v3389_v4  ;;  %v59_v25 = vpack.c.bf16 %v45_v24, %v44_v23  ;;  %v47_v27 = vld [vmem:[%s4803_s0 + $0x78] sm:$0xff]  ;;  %v3390_v29 = vld [vmem:[#allocation2 + $0x24] ss:$8 sps:$4 sm:$0xff]   ;;  %v3392_v30 = vld [vmem:[#allocation2 + $0x20] ss:$8 sps:$4 sm:$0xff]  }
  0x1a   :  { %v60_v28 = vpack.c.bf16 %v47_v27, %v46_v26  ;;  %289 = vmatprep.subr.bf16.mxu1 %v3390_v29  ;;  %v3393_v31 = vld [vmem:[#allocation2 + $0x34] ss:$8 sps:$4 sm:$0xff]   ;;  %v3395_v32 = vld [vmem:[#allocation2 + $0x30] ss:$8 sps:$4 sm:$0xff]   ;;  %v3396_v33 = vld [vmem:[#allocation2 + $0x40] ss:$8 sps:$4 sm:$0xff]  }
  0x1b   :  { %290 = vmatpush1.bf16.msra.mxu1 %v3392_v30  ;;  %v3398_v34 = vld [vmem:[#allocation2 + $0x44] ss:$8 sps:$4 sm:$0xff]   ;;  %v3401_v35 = vld [vmem:[#allocation2 + $0x54] ss:$8 sps:$4 sm:$0xff]   ;;  %v3399_v36 = vld [vmem:[#allocation2 + $0x50] ss:$8 sps:$4 sm:$0xff]  }
  0x1c   :  { %3162 = vmatmul.mubr.msk.bf16.vlgmr.msra.gmra.mrb[0].mxu0 %vm87_vm0, %v53_v7  ;;  %291 = vmatprep.subr.bf16.mxu1 %v3393_v31  ;;  %v52_v40 = vld [vmem:[%s4806_s3] ss:$8 sm:$0x3] }
  0x1d   :  { %152 = vmatprep.mubr.bf16.mxu0 %v3797_v0  ;;  %471 = vmatprep.subr.bf16.mxu0 %v3398_v34  ;;  %v3913_v41 = vrot.slane %v52_v40, %v3907_v39 }
  0x1e   :  { %472 = vmatpush1.bf16.msra.mxu0 %v3396_v33 }
  0x1f   :  { %292 = vmatpush1.bf16.msra.mxu1 %v3395_v32  ;;  %473 = vmatprep.subr.bf16.mxu0 %v3401_v35 }
  0x22   :  { %474 = vmatpush1.bf16.msra.mxu0 %v3399_v36 }
  0x24   :  { %3163 = vmatmul.mubr.msk.bf16.gmra.mrb[4].mxu0 %vm87_vm0, %v54_v10 }
  0x25   :  { %160 = vmatprep.mubr.bf16.mxu0 %v3797_v0 }
  0x2c   :  { %3164 = vmatmul.mubr.msk.bf16.gmra.mrb[8].mxu0 %vm87_vm0, %v55_v13 }
  0x2d   :  { %168 = vmatprep.mubr.bf16.mxu0 %v3797_v0 }
  0x34   :  { %3165 = vmatmul.mubr.msk.bf16.gmra.mrb[12].mxu0 %vm87_vm0, %v56_v16 }
  0x35   :  { %176 = vmatprep.mubr.bf16.mxu0 %v3797_v0 }
  0x3c   :  { %3166 = vmatmul.mubr.msk.bf16.gmra.mrb[16].mxu0 %vm87_vm0, %v57_v19 }
  0x3d   :  { %184 = vmatprep.mubr.bf16.mxu0 %v3797_v0 }
  0x44   :  { %3167 = vmatmul.mubr.msk.bf16.gmra.mrb[20].mxu0 %vm87_vm0, %v58_v22 }
  0x45   :  { %192 = vmatprep.mubr.bf16.mxu0 %v3797_v0 }
  0x4c   :  { %3168 = vmatmul.mubr.msk.bf16.gmra.mrb[24].mxu0 %vm87_vm0, %v59_v25 }
  0x4d   :  { %200 = vmatprep.mubr.bf16.mxu0 %v3797_v0 }
  0x54   :  { %3169 = vmatmul.mubr.msk.bf16.gmra.mrb[28].mxu0 %vm87_vm0, %v60_v28 }
  0x55   :  { %503 = vmatprep.mubr.bf16.mxu0 %v3797_v0 }
  0xef   :  { %v146_v42 = vpop.f32.mrb[0].mxu0 }
  0xf0   :  { %v147_v43 = vadd.f32 %v146_v42, %v3913_v41  ;;  %v148_v44 = vpop.f32.mrb[1].mxu0 }
  0xf1   :  { %v149_v45 = vpop.f32.mrb[2].mxu0 }
  0xf2   :  { %v150_v46 = vadd.f32 %v149_v45, %v3913_v41  ;;  %v151_v47 = vpop.f32.mrb[3].mxu0  ;;  %v209_v48 = vmax.f32 %v147_v43, 0.0 }
  0xf4   :  { %v210_v49 = vmax.f32 %v150_v46, 0.0 }
  0xf6   :  { %v231_v50 = vpack.c.bf16 %v210_v49, %v209_v48 }
  0xf7   :  { %v154_v51 = vpop.f32.mrb[4].mxu0 }
  0xf8   :  { %v155_v52 = vadd.f32 %v154_v51, %v3913_v41  ;;  %v156_v53 = vpop.f32.mrb[5].mxu0  ;;  %3175 = vmatmul.mubr.msk.bf16.vlgmr.msra.gmra.mrb[0].mxu1 %vm87_vm0, %v231_v50 }
  0xf9   :  { %v157_v54 = vpop.f32.mrb[6].mxu0  ;;  %329 = vmatprep.mubr.bf16.mxu1 %v3797_v0 }
  0xfa   :  { %v158_v55 = vadd.f32 %v157_v54, %v3913_v41  ;;  %v159_v56 = vpop.f32.mrb[7].mxu0  ;;  %v211_v57 = vmax.f32 %v155_v52, 0.0 }
  0xfb   :  { %v3404_v56 = vld [vmem:[#allocation2 + $0x64] ss:$8 sps:$4 sm:$0xff]  }
  0xfc   :  { %v212_v58 = vmax.f32 %v158_v55, 0.0  ;;  %v3402_v55 = vld [vmem:[#allocation2 + $0x60] ss:$8 sps:$4 sm:$0xff]   ;;  %837 = vmatprep.subr.bf16.mxu1 %v3404_v56 }
  0xfd   :  { %838 = vmatpush1.bf16.msra.mxu1 %v3402_v55 }
  0xfe   :  { %v232_v59 = vpack.c.bf16 %v212_v58, %v211_v57  ;;  %v3407_v57 = vld [vmem:[#allocation2 + $0x74] ss:$8 sps:$4 sm:$0xff]   ;;  %v3405_v58 = vld [vmem:[#allocation2 + $0x70] ss:$8 sps:$4 sm:$0xff]  }
  0xff   :  { %v162_v60 = vpop.f32.mrb[8].mxu0  ;;  %839 = vmatprep.subr.bf16.mxu1 %v3407_v57 }
 0x100   :  { %v163_v61 = vadd.f32 %v162_v60, %v3913_v41  ;;  %v164_v62 = vpop.f32.mrb[9].mxu0  ;;  %3176 = vmatmul.mubr.msk.bf16.gmra.mrb[4].mxu1 %vm87_vm0, %v232_v59  ;;  %v3410_v59 = vld [vmem:[#allocation2 + $0x84] ss:$8 sps:$4 sm:$0xff]   ;;  %v3408_v60 = vld [vmem:[#allocation2 + $0x80] ss:$8 sps:$4 sm:$0xff]  }
 0x101   :  { %v165_v63 = vpop.f32.mrb[10].mxu0  ;;  %337 = vmatprep.mubr.bf16.mxu1 %v3797_v0  ;;  %840 = vmatpush1.bf16.msra.mxu1 %v3405_v58  ;;  %v3416_v62 = vld [vmem:[#allocation2 + $0xa4] ss:$8 sps:$4 sm:$0xff]  }
 0x102   :  { %v166_v1 = vadd.f32 %v165_v63, %v3913_v41  ;;  %v167_v2 = vpop.f32.mrb[11].mxu0  ;;  %v213_v3 = vmax.f32 %v163_v61, 0.0  ;;  %841 = vmatprep.subr.bf16.mxu1 %v3410_v59  ;;  %v3413_v61 = vld [vmem:[#allocation2 + $0x94] ss:$8 sps:$4 sm:$0xff]   ;;  %v3414_v63 = vld [vmem:[#allocation2 + $0xa0] ss:$8 sps:$4 sm:$0xff]  }
 0x103   :  { %v3417_v2 = vld [vmem:[#allocation2 + $0xb0] ss:$8 sps:$4 sm:$0xff]  }
 0x104   :  { %v214_v4 = vmax.f32 %v166_v1, 0.0  ;;  %v3419_v1 = vld [vmem:[#allocation2 + $0xb4] ss:$8 sps:$4 sm:$0xff]  }
 0x105   :  { %842 = vmatpush1.bf16.msra.mxu1 %v3408_v60 }
 0x106   :  { %v233_v5 = vpack.c.bf16 %v214_v4, %v213_v3  ;;  %843 = vmatprep.subr.bf16.mxu1 %v3413_v61  ;;  %v3422_v3 = vld [vmem:[#allocation2 + $0xc4] ss:$8 sps:$4 sm:$0xff]   ;;  %v3420_v4 = vld [vmem:[#allocation2 + $0xc0] ss:$8 sps:$4 sm:$0xff]  }
 0x107   :  { %v170_v6 = vpop.f32.mrb[12].mxu0 }
 0x108   :  { %v171_v7 = vadd.f32 %v170_v6, %v3913_v41  ;;  %v172_v8 = vpop.f32.mrb[13].mxu0  ;;  %3177 = vmatmul.mubr.msk.bf16.gmra.mrb[8].mxu1 %vm87_vm0, %v233_v5  ;;  %v3425_v5 = vld [vmem:[#allocation2 + $0xd4] ss:$8 sps:$4 sm:$0xff]   ;;  %v3423_v6 = vld [vmem:[#allocation2 + $0xd0] ss:$8 sps:$4 sm:$0xff]  }
 0x109   :  { %v173_v9 = vpop.f32.mrb[14].mxu0  ;;  %345 = vmatprep.mubr.bf16.mxu1 %v3797_v0  ;;  %v3426_v8 = vld [vmem:[#allocation2 + $0xe0] ss:$8 sps:$4 sm:$0xff]  }
 0x10a   :  { %v174_v10 = vadd.f32 %v173_v9, %v3913_v41  ;;  %v175_v11 = vpop.f32.mrb[15].mxu0  ;;  %v215_v12 = vmax.f32 %v171_v7, 0.0  ;;  %v3428_v7 = vld [vmem:[#allocation2 + $0xe4] ss:$8 sps:$4 sm:$0xff]   ;;  %v3431_v9 = vld [vmem:[#allocation2 + $0xf4] ss:$8 sps:$4 sm:$0xff]  }
 0x10b   :  { %v3434_v11 = vld [vmem:[#allocation2 + $0x104] ss:$8 sps:$4 sm:$0xff]  }
 0x10c   :  { %v216_v13 = vmax.f32 %v174_v10, 0.0  ;;  %v3429_v10 = vld [vmem:[#allocation2 + $0xf0] ss:$8 sps:$4 sm:$0xff]  }
 0x10e   :  { %v234_v14 = vpack.c.bf16 %v216_v13, %v215_v12  ;;  %v3432_v12 = vld [vmem:[#allocation2 + $0x100] ss:$8 sps:$4 sm:$0xff]   ;;  %v3437_v13 = vld [vmem:[#allocation2 + $0x114] ss:$8 sps:$4 sm:$0xff]  }
 0x10f   :  { %v178_v15 = vpop.f32.mrb[16].mxu0 }
 0x110   :  { %v179_v16 = vadd.f32 %v178_v15, %v3913_v41  ;;  %v180_v17 = vpop.f32.mrb[17].mxu0  ;;  %3178 = vmatmul.mubr.msk.bf16.gmra.mrb[12].mxu1 %vm87_vm0, %v234_v14  ;;  %v3435_v14 = vld [vmem:[#allocation2 + $0x110] ss:$8 sps:$4 sm:$0xff]   ;;  %v3440_v15 = vld [vmem:[#allocation2 + $0x124] ss:$8 sps:$4 sm:$0xff]  }
 0x111   :  { %v181_v18 = vpop.f32.mrb[18].mxu0  ;;  %353 = vmatprep.mubr.bf16.mxu1 %v3797_v0  ;;  %v3443_v17 = vld [vmem:[#allocation2 + $0x134] ss:$8 sps:$4 sm:$0xff]  }
 0x112   :  { %v182_v19 = vadd.f32 %v181_v18, %v3913_v41  ;;  %v183_v20 = vpop.f32.mrb[19].mxu0  ;;  %v217_v21 = vmax.f32 %v179_v16, 0.0  ;;  %v3438_v16 = vld [vmem:[#allocation2 + $0x120] ss:$8 sps:$4 sm:$0xff]   ;;  %v3441_v18 = vld [vmem:[#allocation2 + $0x130] ss:$8 sps:$4 sm:$0xff]  }
 0x114   :  { %v218_v22 = vmax.f32 %v182_v19, 0.0  ;;  %v3170_v19 = vld [vmem:[%s4806_s3 + $0x1] ss:$8 sm:$0x3] }
 0x115   :  { %v3950_v20 = vrot.slane %v3170_v19, %v3907_v39 }
 0x116   :  { %v235_v23 = vpack.c.bf16 %v218_v22, %v217_v21 }
 0x117   :  { %v186_v24 = vpop.f32.mrb[20].mxu0 }
 0x118   :  { %v187_v25 = vadd.f32 %v186_v24, %v3913_v41  ;;  %v188_v26 = vpop.f32.mrb[21].mxu0  ;;  %3179 = vmatmul.mubr.msk.bf16.gmra.mrb[16].mxu1 %vm87_vm0, %v235_v23 }
 0x119   :  { %v189_v27 = vpop.f32.mrb[22].mxu0  ;;  %361 = vmatprep.mubr.bf16.mxu1 %v3797_v0 }
 0x11a   :  { %v190_v28 = vadd.f32 %v189_v27, %v3913_v41  ;;  %v191_v29 = vpop.f32.mrb[23].mxu0  ;;  %v219_v30 = vmax.f32 %v187_v25, 0.0 }
 0x11c   :  { %v220_v31 = vmax.f32 %v190_v28, 0.0 }
 0x11e   :  { %v236_v32 = vpack.c.bf16 %v220_v31, %v219_v30 }
 0x11f   :  { %v194_v33 = vpop.f32.mrb[24].mxu0 }
 0x120   :  { %v195_v34 = vadd.f32 %v194_v33, %v3913_v41  ;;  %v196_v35 = vpop.f32.mrb[25].mxu0  ;;  %3180 = vmatmul.mubr.msk.bf16.gmra.mrb[20].mxu1 %vm87_vm0, %v236_v32 }
 0x121   :  { %v197_v36 = vpop.f32.mrb[26].mxu0  ;;  %369 = vmatprep.mubr.bf16.mxu1 %v3797_v0 }
 0x122   :  { %v198_v40 = vadd.f32 %v197_v36, %v3913_v41  ;;  %v199_v42 = vpop.f32.mrb[27].mxu0  ;;  %v221_v43 = vmax.f32 %v195_v34, 0.0 }
 0x124   :  { %v222_v44 = vmax.f32 %v198_v40, 0.0 }
 0x126   :  { %v237_v45 = vpack.c.bf16 %v222_v44, %v221_v43 }
 0x127   :  { %v202_v46 = vpop.f32.mrb[28].mxu0 }
 0x128   :  { %v203_v47 = vadd.f32 %v202_v46, %v3913_v41  ;;  %v204_v48 = vpop.f32.mrb[29].mxu0  ;;  %3181 = vmatmul.mubr.msk.bf16.gmra.mrb[24].mxu1 %vm87_vm0, %v237_v45 }
 0x129   :  { %v205_v49 = vpop.f32.mrb[30].mxu0  ;;  %377 = vmatprep.mubr.bf16.mxu1 %v3797_v0 }
 0x12a   :  { %v206_v50 = vadd.f32 %v205_v49, %v3913_v41  ;;  %v207_v51 = vpop.f32.mrb[31].mxu0  ;;  %v223_v52 = vmax.f32 %v203_v47, 0.0  ;;  %v3411_v41 = vld [vmem:[#allocation2 + $0x90] ss:$8 sps:$4 sm:$0xff]  }
 0x12b   :  { %844 = vmatpush1.bf16.msra.mxu1 %v3411_v41 }
 0x12c   :  { %v224_v53 = vmax.f32 %v206_v50, 0.0  ;;  %845 = vmatprep.subr.bf16.mxu1 %v3416_v62 }
 0x12e   :  { %v238_v54 = vpack.c.bf16 %v224_v53, %v223_v52 }
 0x12f   :  { %846 = vmatpush1.bf16.msra.mxu1 %v3414_v63 }
 0x130   :  { %3182 = vmatmul.mubr.msk.bf16.gmra.mrb[28].mxu1 %vm87_vm0, %v238_v54  ;;  %847 = vmatprep.subr.bf16.mxu1 %v3419_v1 }
 0x133   :  { %848 = vmatpush1.bf16.msra.mxu1 %v3417_v2 }
 0x134   :  { %849 = vmatprep.subr.bf16.mxu1 %v3422_v3 }
 0x137   :  { %850 = vmatpush1.bf16.msra.mxu1 %v3420_v4 }
 0x138   :  { %851 = vmatprep.subr.bf16.mxu1 %v3425_v5 }
 0x13b   :  { %852 = vmatpush1.bf16.msra.mxu1 %v3423_v6 }
 0x13c   :  { %853 = vmatprep.subr.bf16.mxu1 %v3428_v7 }
 0x13f   :  { %854 = vmatpush1.bf16.msra.mxu1 %v3426_v8 }
 0x140   :  { %855 = vmatprep.subr.bf16.mxu1 %v3431_v9 }
 0x143   :  { %856 = vmatpush1.bf16.msra.mxu1 %v3429_v10 }
 0x144   :  { %857 = vmatprep.subr.bf16.mxu1 %v3434_v11 }
 0x147   :  { %858 = vmatpush1.bf16.msra.mxu1 %v3432_v12 }
 0x148   :  { %859 = vmatprep.subr.bf16.mxu1 %v3437_v13 }
 0x14b   :  { %860 = vmatpush1.bf16.msra.mxu1 %v3435_v14 }
 0x14c   :  { %861 = vmatprep.subr.bf16.mxu1 %v3440_v15 }
 0x14f   :  { %862 = vmatpush1.bf16.msra.mxu1 %v3438_v16 }
 0x150   :  { %863 = vmatprep.subr.bf16.mxu1 %v3443_v17 }
 0x153   :  { %864 = vmatpush1.bf16.msra.mxu1 %v3441_v18 }
 0x1cb   :  { %v323_v21 = vpop.f32.mrb[0].mxu1 }
 0x1cc   :  { %v324_v22 = vadd.f32 %v323_v21, %v3950_v20  ;;  %v325_v23 = vpop.f32.mrb[1].mxu1 }
 0x1cd   :  { %v326_v24 = vpop.f32.mrb[2].mxu1 }
 0x1ce   :  { %v327_v25 = vadd.f32 %v326_v24, %v3950_v20  ;;  %v328_v26 = vpop.f32.mrb[3].mxu1  ;;  %v386_v27 = vmax.f32 %v324_v22, 0.0 }
 0x1d0   :  { %v387_v28 = vmax.f32 %v327_v25, 0.0 }
 0x1d2   :  { %v408_v29 = vpack.c.bf16 %v387_v28, %v386_v27 }
 0x1d3   :  { %v331_v30 = vpop.f32.mrb[4].mxu1 }
 0x1d4   :  { %v332_v31 = vadd.f32 %v331_v30, %v3950_v20  ;;  %v333_v32 = vpop.f32.mrb[5].mxu1  ;;  %3188 = vmatmul.mubr.msk.bf16.vlgmr.msra.gmra.mrb[32].mxu0 %vm87_vm0, %v408_v29 }
 0x1d5   :  { %v334_v33 = vpop.f32.mrb[6].mxu1  ;;  %513 = vmatprep.mubr.bf16.mxu0 %v3797_v0 }
 0x1d6   :  { %v335_v34 = vadd.f32 %v334_v33, %v3950_v20  ;;  %v336_v35 = vpop.f32.mrb[7].mxu1  ;;  %v388_v36 = vmax.f32 %v332_v31, 0.0 }
 0x1d7   :  { %v3444_v35 = vld [vmem:[#allocation2 + $0x140] ss:$8 sps:$4 sm:$0xff]  }
 0x1d8   :  { %v389_v40 = vmax.f32 %v335_v34, 0.0  ;;  %v3446_v34 = vld [vmem:[#allocation2 + $0x144] ss:$8 sps:$4 sm:$0xff]  }
 0x1d9   :  { %865 = vmatprep.subr.bf16.mxu1 %v3446_v34 }
 0x1da   :  { %v409_v42 = vpack.c.bf16 %v389_v40, %v388_v36  ;;  %866 = vmatpush1.bf16.msra.mxu1 %v3444_v35  ;;  %v3449_v36 = vld [vmem:[#allocation2 + $0x154] ss:$8 sps:$4 sm:$0xff]   ;;  %v3447_v40 = vld [vmem:[#allocation2 + $0x150] ss:$8 sps:$4 sm:$0xff]  }
 0x1db   :  { %v339_v43 = vpop.f32.mrb[8].mxu1  ;;  %867 = vmatprep.subr.bf16.mxu1 %v3449_v36 }
 0x1dc   :  { %v340_v44 = vadd.f32 %v339_v43, %v3950_v20  ;;  %v341_v45 = vpop.f32.mrb[9].mxu1  ;;  %3189 = vmatmul.mubr.msk.bf16.gmra.mrb[36].mxu0 %vm87_vm0, %v409_v42  ;;  %v3450_v42 = vld [vmem:[#allocation2 + $0x160] ss:$8 sps:$4 sm:$0xff]   ;;  %v3452_v43 = vld [vmem:[#allocation2 + $0x164] ss:$8 sps:$4 sm:$0xff]  }
 0x1dd   :  { %v342_v46 = vpop.f32.mrb[10].mxu1  ;;  %523 = vmatprep.mubr.bf16.mxu0 %v3797_v0  ;;  %1203 = vmatprep.subr.bf16.mxu0 %v3452_v43  ;;  %v3456_v45 = vld [vmem:[#allocation2 + $0x180] ss:$8 sps:$4 sm:$0xff]  }
 0x1de   :  { %v343_v47 = vadd.f32 %v342_v46, %v3950_v20  ;;  %v344_v48 = vpop.f32.mrb[11].mxu1  ;;  %v390_v49 = vmax.f32 %v340_v44, 0.0  ;;  %868 = vmatpush1.bf16.msra.mxu1 %v3447_v40  ;;  %v3455_v44 = vld [vmem:[#allocation2 + $0x174] ss:$8 sps:$4 sm:$0xff]   ;;  %1204 = vmatpush1.bf16.msra.mxu0 %v3450_v42 }
 0x1df   :  { %1205 = vmatprep.subr.bf16.mxu0 %v3455_v44  ;;  %v3461_v46 = vld [vmem:[#allocation2 + $0x194] ss:$8 sps:$4 sm:$0xff]   ;;  %v3464_v48 = vld [vmem:[#allocation2 + $0x1a4] ss:$8 sps:$4 sm:$0xff]  }
 0x1e0   :  { %v391_v50 = vmax.f32 %v343_v47, 0.0  ;;  %v3459_v47 = vld [vmem:[#allocation2 + $0x190] ss:$8 sps:$4 sm:$0xff]  }
 0x1e2   :  { %v410_v51 = vpack.c.bf16 %v391_v50, %v390_v49  ;;  %v3462_v49 = vld [vmem:[#allocation2 + $0x1a0] ss:$8 sps:$4 sm:$0xff]   ;;  %v3467_v50 = vld [vmem:[#allocation2 + $0x1b4] ss:$8 sps:$4 sm:$0xff]  }
 0x1e3   :  { %v347_v52 = vpop.f32.mrb[12].mxu1 }
 0x1e4   :  { %v348_v53 = vadd.f32 %v347_v52, %v3950_v20  ;;  %v349_v54 = vpop.f32.mrb[13].mxu1  ;;  %3190 = vmatmul.mubr.msk.bf16.gmra.mrb[40].mxu0 %vm87_vm0, %v410_v51  ;;  %v3465_v51 = vld [vmem:[#allocation2 + $0x1b0] ss:$8 sps:$4 sm:$0xff]   ;;  %v3470_v52 = vld [vmem:[#allocation2 + $0x1c4] ss:$8 sps:$4 sm:$0xff]  }
 0x1e5   :  { %v350_v55 = vpop.f32.mrb[14].mxu1  ;;  %533 = vmatprep.mubr.bf16.mxu0 %v3797_v0  ;;  %v3473_v54 = vld [vmem:[#allocation2 + $0x1d4] ss:$8 sps:$4 sm:$0xff]  }
 0x1e6   :  { %v351_v56 = vadd.f32 %v350_v55, %v3950_v20  ;;  %v352_v57 = vpop.f32.mrb[15].mxu1  ;;  %v392_v58 = vmax.f32 %v348_v53, 0.0  ;;  %v3468_v53 = vld [vmem:[#allocation2 + $0x1c0] ss:$8 sps:$4 sm:$0xff]   ;;  %v3471_v55 = vld [vmem:[#allocation2 + $0x1d0] ss:$8 sps:$4 sm:$0xff]  }
 0x1e7   :  { %v3474_v57 = vld [vmem:[#allocation2 + $0x1e0] ss:$8 sps:$4 sm:$0xff]  }
 0x1e8   :  { %v393_v59 = vmax.f32 %v351_v56, 0.0  ;;  %v3476_v56 = vld [vmem:[#allocation2 + $0x1e4] ss:$8 sps:$4 sm:$0xff]  }
 0x1ea   :  { %v411_v60 = vpack.c.bf16 %v393_v59, %v392_v58  ;;  %v3479_v58 = vld [vmem:[#allocation2 + $0x1f4] ss:$8 sps:$4 sm:$0xff]   ;;  %v3477_v59 = vld [vmem:[#allocation2 + $0x1f0] ss:$8 sps:$4 sm:$0xff]  }
 0x1eb   :  { %v355_v61 = vpop.f32.mrb[16].mxu1 }
 0x1ec   :  { %v356_v41 = vadd.f32 %v355_v61, %v3950_v20  ;;  %v357_v62 = vpop.f32.mrb[17].mxu1  ;;  %3191 = vmatmul.mubr.msk.bf16.gmra.mrb[44].mxu0 %vm87_vm0, %v411_v60  ;;  %v3482_v60 = vld [vmem:[#allocation2 + $0x204] ss:$8 sps:$4 sm:$0xff]   ;;  %v3480_v61 = vld [vmem:[#allocation2 + $0x200] ss:$8 sps:$4 sm:$0xff]  }
 0x1ed   :  { %v358_v63 = vpop.f32.mrb[18].mxu1  ;;  %543 = vmatprep.mubr.bf16.mxu0 %v3797_v0  ;;  %v3483_v62 = vld [vmem:[#allocation2 + $0x210] ss:$8 sps:$4 sm:$0xff]  }
 0x1ee   :  { %v359_v1 = vadd.f32 %v358_v63, %v3950_v20  ;;  %v360_v2 = vpop.f32.mrb[19].mxu1  ;;  %v394_v3 = vmax.f32 %v356_v41, 0.0  ;;  %v3485_v41 = vld [vmem:[#allocation2 + $0x214] ss:$8 sps:$4 sm:$0xff]   ;;  %v3488_v63 = vld [vmem:[#allocation2 + $0x224] ss:$8 sps:$4 sm:$0xff]  }
 0x1ef   :  { %v3491_v2 = vld [vmem:[#allocation2 + $0x234] ss:$8 sps:$4 sm:$0xff]  }
 0x1f0   :  { %v395_v4 = vmax.f32 %v359_v1, 0.0  ;;  %v3486_v1 = vld [vmem:[#allocation2 + $0x220] ss:$8 sps:$4 sm:$0xff]  }
 0x1f2   :  { %v412_v5 = vpack.c.bf16 %v395_v4, %v394_v3  ;;  %v3489_v3 = vld [vmem:[#allocation2 + $0x230] ss:$8 sps:$4 sm:$0xff]   ;;  %v3183_v4 = vld [vmem:[%s4806_s3 + $0x2] ss:$8 sm:$0x3] }
 0x1f3   :  { %v363_v6 = vpop.f32.mrb[20].mxu1 }
 0x1f4   :  { %v364_v7 = vadd.f32 %v363_v6, %v3950_v20  ;;  %v365_v8 = vpop.f32.mrb[21].mxu1  ;;  %3192 = vmatmul.mubr.msk.bf16.gmra.mrb[48].mxu0 %vm87_vm0, %v412_v5  ;;  %v3987_v5 = vsub.s32 1, %v3904_v38  ;;  %v3990_v6 = vrot.slane %v3183_v4, %v3907_v39 }
 0x1f5   :  { %v366_v9 = vpop.f32.mrb[22].mxu1  ;;  %553 = vmatprep.mubr.bf16.mxu0 %v3797_v0 }
 0x1f6   :  { %v367_v10 = vadd.f32 %v366_v9, %v3950_v20  ;;  %v368_v11 = vpop.f32.mrb[23].mxu1  ;;  %v396_v12 = vmax.f32 %v364_v7, 0.0  ;;  %v3993_v7 = vrot.slane %v3183_v4, %v3987_v5 }
 0x1f8   :  { %v397_v13 = vmax.f32 %v367_v10, 0.0 }
 0x1fa   :  { %v413_v14 = vpack.c.bf16 %v397_v13, %v396_v12 }
 0x1fb   :  { %v371_v15 = vpop.f32.mrb[24].mxu1 }
 0x1fc   :  { %v372_v16 = vadd.f32 %v371_v15, %v3950_v20  ;;  %v373_v17 = vpop.f32.mrb[25].mxu1  ;;  %3193 = vmatmul.mubr.msk.bf16.gmra.mrb[52].mxu0 %vm87_vm0, %v413_v14 }
 0x1fd   :  { %v374_v18 = vpop.f32.mrb[26].mxu1  ;;  %563 = vmatprep.mubr.bf16.mxu0 %v3797_v0 }
 0x1fe   :  { %v375_v19 = vadd.f32 %v374_v18, %v3950_v20  ;;  %v376_v21 = vpop.f32.mrb[27].mxu1  ;;  %v398_v22 = vmax.f32 %v372_v16, 0.0 }
 0x200   :  { %v399_v23 = vmax.f32 %v375_v19, 0.0 }
 0x202   :  { %v414_v24 = vpack.c.bf16 %v399_v23, %v398_v22 }
 0x203   :  { %v379_v25 = vpop.f32.mrb[28].mxu1 }
 0x204   :  { %v380_v26 = vadd.f32 %v379_v25, %v3950_v20  ;;  %v381_v27 = vpop.f32.mrb[29].mxu1  ;;  %3194 = vmatmul.mubr.msk.bf16.gmra.mrb[56].mxu0 %vm87_vm0, %v414_v24 }
 0x205   :  { %v382_v28 = vpop.f32.mrb[30].mxu1  ;;  %573 = vmatprep.mubr.bf16.mxu0 %v3797_v0  ;;  %v3453_v0 = vld [vmem:[#allocation2 + $0x170] ss:$8 sps:$4 sm:$0xff]  }
 0x206   :  { %v383_v29 = vadd.f32 %v382_v28, %v3950_v20  ;;  %v384_v30 = vpop.f32.mrb[31].mxu1  ;;  %v400_v31 = vmax.f32 %v380_v26, 0.0  ;;  %v3458_v20 = vld [vmem:[#allocation2 + $0x184] ss:$8 sps:$4 sm:$0xff]   ;;  %1206 = vmatpush1.bf16.msra.mxu0 %v3453_v0 }
 0x207   :  { %1207 = vmatprep.subr.bf16.mxu0 %v3458_v20 }
 0x208   :  { %v401_v32 = vmax.f32 %v383_v29, 0.0 }
 0x20a   :  { %v415_v33 = vpack.c.bf16 %v401_v32, %v400_v31  ;;  %1208 = vmatpush1.bf16.msra.mxu0 %v3456_v45 }
 0x20b   :  { %1209 = vmatprep.subr.bf16.mxu0 %v3461_v46 }
 0x20c   :  { %3195 = vmatmul.mubr.msk.bf16.gmra.mrb[60].mxu0 %vm87_vm0, %v415_v33 }
 0x20e   :  { %1210 = vmatpush1.bf16.msra.mxu0 %v3459_v47 }
 0x20f   :  { %1211 = vmatprep.subr.bf16.mxu0 %v3464_v48 }
 0x212   :  { %1212 = vmatpush1.bf16.msra.mxu0 %v3462_v49 }
 0x213   :  { %1213 = vmatprep.subr.bf16.mxu0 %v3467_v50 }
 0x216   :  { %1214 = vmatpush1.bf16.msra.mxu0 %v3465_v51 }
 0x217   :  { %1215 = vmatprep.subr.bf16.mxu0 %v3470_v52 }
 0x21a   :  { %1216 = vmatpush1.bf16.msra.mxu0 %v3468_v53 }
 0x21b   :  { %1217 = vmatprep.subr.bf16.mxu0 %v3473_v54 }
 0x21e   :  { %1218 = vmatpush1.bf16.msra.mxu0 %v3471_v55 }
 0x21f   :  { %1219 = vmatprep.subr.bf16.mxu0 %v3476_v56 }
 0x222   :  { %1220 = vmatpush1.bf16.msra.mxu0 %v3474_v57 }
 0x223   :  { %1221 = vmatprep.subr.bf16.mxu0 %v3479_v58 }
 0x226   :  { %1222 = vmatpush1.bf16.msra.mxu0 %v3477_v59 }
 0x227   :  { %1223 = vmatprep.subr.bf16.mxu0 %v3482_v60 }
 0x22a   :  { %1224 = vmatpush1.bf16.msra.mxu0 %v3480_v61 }
 0x22b   :  { %1225 = vmatprep.subr.bf16.mxu0 %v3485_v41 }
 0x22e   :  { %1226 = vmatpush1.bf16.msra.mxu0 %v3483_v62 }
 0x22f   :  { %1227 = vmatprep.subr.bf16.mxu0 %v3488_v63 }
 0x232   :  { %1228 = vmatpush1.bf16.msra.mxu0 %v3486_v1 }
 0x233   :  { %1229 = vmatprep.subr.bf16.mxu0 %v3491_v2 }
 0x236   :  { %1230 = vmatpush1.bf16.msra.mxu0 %v3489_v3 }
 0x2a7   :  { %v505_v8 = vpop.f32.mrb[32].mxu0 }
 0x2a8   :  { %v506_v9 = vadd.f32 %v505_v8, %v3990_v6  ;;  %v507_v10 = vpop.f32.mrb[33].mxu0 }
 0x2a9   :  { %v508_v11 = vadd.f32 %v507_v10, %v3993_v7  ;;  %v509_v12 = vpop.f32.mrb[34].mxu0 }
 0x2aa   :  { %v510_v13 = vadd.f32 %v509_v12, %v3990_v6  ;;  %v511_v14 = vpop.f32.mrb[35].mxu0  ;;  %v584_v15 = vmax.f32 %v506_v9, 0.0 }
 0x2ab   :  { %v512_v38 = vadd.f32 %v511_v14, %v3993_v7  ;;  %v585_v17 = vmax.f32 %v508_v11, 0.0 }
 0x2ac   :  { %v586_v16 = vmax.f32 %v510_v13, 0.0 }
 0x2ad   :  { %v587_v18 = vmax.f32 %v512_v38, 0.0 }
 0x2ae   :  { %v650_v19 = vpack.c.bf16 %v586_v16, %v584_v15 }
 0x2af   :  { %v651_v21 = vpack.c.bf16 %v587_v18, %v585_v17  ;;  %v515_v22 = vpop.f32.mrb[36].mxu0 }
 0x2b0   :  { %v516_v23 = vadd.f32 %v515_v22, %v3990_v6  ;;  %v517_v24 = vpop.f32.mrb[37].mxu0 }
 0x2b1   :  { %v518_v25 = vadd.f32 %v517_v24, %v3993_v7  ;;  %v519_v26 = vpop.f32.mrb[38].mxu0  ;;  %869 = vmatprep.mubr.bf16.mxu1 %v651_v21 }
 0x2b2   :  { %v520_v27 = vadd.f32 %v519_v26, %v3990_v6  ;;  %v521_v28 = vpop.f32.mrb[39].mxu0  ;;  %870 = vmatmul.mubr.bf16.vlgmr.msra.gmra.mrb[32].mxu1 %v650_v19  ;;  %v588_v30 = vmax.f32 %v516_v23, 0.0 }
 0x2b3   :  { %v522_v29 = vadd.f32 %v521_v28, %v3993_v7  ;;  %v589_v32 = vmax.f32 %v518_v25, 0.0 }
 0x2b4   :  { %v590_v31 = vmax.f32 %v520_v27, 0.0 }
 0x2b5   :  { %v591_v33 = vmax.f32 %v522_v29, 0.0 }
 0x2b6   :  { %v652_v34 = vpack.c.bf16 %v590_v31, %v588_v30 }
 0x2b7   :  { %v653_v35 = vpack.c.bf16 %v591_v33, %v589_v32  ;;  %v525_v36 = vpop.f32.mrb[40].mxu0 }
 0x2b8   :  { %v526_v40 = vadd.f32 %v525_v36, %v3990_v6  ;;  %v527_v42 = vpop.f32.mrb[41].mxu0 }
 0x2b9   :  { %v528_v43 = vadd.f32 %v527_v42, %v3993_v7  ;;  %v529_v44 = vpop.f32.mrb[42].mxu0  ;;  %879 = vmatprep.mubr.bf16.mxu1 %v653_v35 }
 0x2ba   :  { %v530_v0 = vadd.f32 %v529_v44, %v3990_v6  ;;  %v531_v20 = vpop.f32.mrb[43].mxu0  ;;  %880 = vmatmul.mubr.bf16.gmra.mrb[36].mxu1 %v652_v34  ;;  %v592_v46 = vmax.f32 %v526_v40, 0.0 }
 0x2bb   :  { %v532_v45 = vadd.f32 %v531_v20, %v3993_v7  ;;  %v593_v48 = vmax.f32 %v528_v43, 0.0 }
 0x2bc   :  { %v594_v47 = vmax.f32 %v530_v0, 0.0 }
 0x2bd   :  { %v595_v49 = vmax.f32 %v532_v45, 0.0 }
 0x2be   :  { %v654_v50 = vpack.c.bf16 %v594_v47, %v592_v46 }
 0x2bf   :  { %v655_v51 = vpack.c.bf16 %v595_v49, %v593_v48  ;;  %v535_v52 = vpop.f32.mrb[44].mxu0 }
 0x2c0   :  { %v536_v53 = vadd.f32 %v535_v52, %v3990_v6  ;;  %v537_v54 = vpop.f32.mrb[45].mxu0 }
 0x2c1   :  { %v538_v55 = vadd.f32 %v537_v54, %v3993_v7  ;;  %v539_v56 = vpop.f32.mrb[46].mxu0  ;;  %889 = vmatprep.mubr.bf16.mxu1 %v655_v51 }
 0x2c2   :  { %v540_v57 = vadd.f32 %v539_v56, %v3990_v6  ;;  %v541_v58 = vpop.f32.mrb[47].mxu0  ;;  %890 = vmatmul.mubr.bf16.gmra.mrb[40].mxu1 %v654_v50  ;;  %v596_v60 = vmax.f32 %v536_v53, 0.0 }
 0x2c3   :  { %v542_v59 = vadd.f32 %v541_v58, %v3993_v7  ;;  %v597_v41 = vmax.f32 %v538_v55, 0.0 }
 0x2c4   :  { %v598_v61 = vmax.f32 %v540_v57, 0.0 }
 0x2c5   :  { %v599_v62 = vmax.f32 %v542_v59, 0.0 }
 0x2c6   :  { %v656_v63 = vpack.c.bf16 %v598_v61, %v596_v60 }
 0x2c7   :  { %v657_v1 = vpack.c.bf16 %v599_v62, %v597_v41  ;;  %v545_v2 = vpop.f32.mrb[48].mxu0  ;;  %v3494_v62 = vld [vmem:[#allocation2 + $0x244] ss:$8 sps:$4 sm:$0xff]  }
 0x2c8   :  { %v546_v3 = vadd.f32 %v545_v2, %v3990_v6  ;;  %v547_v4 = vpop.f32.mrb[49].mxu0  ;;  %1231 = vmatprep.subr.bf16.mxu0 %v3494_v62  ;;  %v3495_v2 = vld [vmem:[#allocation2 + $0x250] ss:$8 sps:$4 sm:$0xff]  }
 0x2c9   :  { %v548_v8 = vadd.f32 %v547_v4, %v3993_v7  ;;  %v549_v9 = vpop.f32.mrb[50].mxu0  ;;  %899 = vmatprep.mubr.bf16.mxu1 %v657_v1  ;;  %v3497_v1 = vld [vmem:[#allocation2 + $0x254] ss:$8 sps:$4 sm:$0xff]  }
 0x2ca   :  { %v550_v10 = vadd.f32 %v549_v9, %v3990_v6  ;;  %v551_v11 = vpop.f32.mrb[51].mxu0  ;;  %900 = vmatmul.mubr.bf16.gmra.mrb[44].mxu1 %v656_v63  ;;  %v600_v13 = vmax.f32 %v546_v3, 0.0  ;;  %v3492_v63 = vld [vmem:[#allocation2 + $0x240] ss:$8 sps:$4 sm:$0xff]   ;;  %v3500_v3 = vld [vmem:[#allocation2 + $0x264] ss:$8 sps:$4 sm:$0xff]  }
 0x2cb   :  { %v552_v12 = vadd.f32 %v551_v11, %v3993_v7  ;;  %v601_v38 = vmax.f32 %v548_v8, 0.0  ;;  %1232 = vmatpush1.bf16.msra.mxu0 %v3492_v63  ;;  %v3503_v4 = vld [vmem:[#allocation2 + $0x274] ss:$8 sps:$4 sm:$0xff]   ;;  %1569 = vmatprep.subr.bf16.mxu1 %v3500_v3  ;;  %v3506_v8 = vld [vmem:[#allocation2 + $0x284] ss:$8 sps:$4 sm:$0xff]  }
 0x2cc   :  { %v602_v14 = vmax.f32 %v550_v10, 0.0  ;;  %1233 = vmatprep.subr.bf16.mxu0 %v3497_v1  ;;  %v3504_v9 = vld [vmem:[#allocation2 + $0x280] ss:$8 sps:$4 sm:$0xff]   ;;  %v3509_v10 = vld [vmem:[#allocation2 + $0x294] ss:$8 sps:$4 sm:$0xff]  }
 0x2cd   :  { %v603_v15 = vmax.f32 %v552_v12, 0.0  ;;  %v3507_v11 = vld [vmem:[#allocation2 + $0x290] ss:$8 sps:$4 sm:$0xff]   ;;  %v3512_v12 = vld [vmem:[#allocation2 + $0x2a4] ss:$8 sps:$4 sm:$0xff]  }
 0x2ce   :  { %v658_v16 = vpack.c.bf16 %v602_v14, %v600_v13  ;;  %v3510_v13 = vld [vmem:[#allocation2 + $0x2a0] ss:$8 sps:$4 sm:$0xff]   ;;  %v3515_v14 = vld [vmem:[#allocation2 + $0x2b4] ss:$8 sps:$4 sm:$0xff]  }
 0x2cf   :  { %v659_v17 = vpack.c.bf16 %v603_v15, %v601_v38  ;;  %v555_v18 = vpop.f32.mrb[52].mxu0  ;;  %1234 = vmatpush1.bf16.msra.mxu0 %v3495_v2  ;;  %v3513_v38 = vld [vmem:[#allocation2 + $0x2b0] ss:$8 sps:$4 sm:$0xff]   ;;  %v3518_v15 = vld [vmem:[#allocation2 + $0x2c4] ss:$8 sps:$4 sm:$0xff]  }
 0x2d0   :  { %v556_v19 = vadd.f32 %v555_v18, %v3990_v6  ;;  %v557_v21 = vpop.f32.mrb[53].mxu0  ;;  %v3519_v18 = vld [vmem:[#allocation2 + $0x2d0] ss:$8 sps:$4 sm:$0xff]  }
 0x2d1   :  { %v558_v22 = vadd.f32 %v557_v21, %v3993_v7  ;;  %v559_v23 = vpop.f32.mrb[54].mxu0  ;;  %909 = vmatprep.mubr.bf16.mxu1 %v659_v17  ;;  %v3521_v17 = vld [vmem:[#allocation2 + $0x2d4] ss:$8 sps:$4 sm:$0xff]   ;;  %v3522_v21 = vld [vmem:[#allocation2 + $0x2e0] ss:$8 sps:$4 sm:$0xff]  }
 0x2d2   :  { %v560_v24 = vadd.f32 %v559_v23, %v3990_v6  ;;  %v561_v25 = vpop.f32.mrb[55].mxu0  ;;  %910 = vmatmul.mubr.bf16.gmra.mrb[48].mxu1 %v658_v16  ;;  %v604_v27 = vmax.f32 %v556_v19, 0.0  ;;  %v3516_v16 = vld [vmem:[#allocation2 + $0x2c0] ss:$8 sps:$4 sm:$0xff]   ;;  %v3524_v19 = vld [vmem:[#allocation2 + $0x2e4] ss:$8 sps:$4 sm:$0xff]  }
 0x2d3   :  { %v562_v26 = vadd.f32 %v561_v25, %v3993_v7  ;;  %v605_v29 = vmax.f32 %v558_v22, 0.0  ;;  %v3527_v22 = vld [vmem:[#allocation2 + $0x2f4] ss:$8 sps:$4 sm:$0xff]   ;;  %v3525_v23 = vld [vmem:[#allocation2 + $0x2f0] ss:$8 sps:$4 sm:$0xff]  }
 0x2d4   :  { %v606_v28 = vmax.f32 %v560_v24, 0.0  ;;  %v3530_v24 = vld [vmem:[#allocation2 + $0x304] ss:$8 sps:$4 sm:$0xff]   ;;  %v3528_v25 = vld [vmem:[#allocation2 + $0x300] ss:$8 sps:$4 sm:$0xff]  }
 0x2d5   :  { %v607_v30 = vmax.f32 %v562_v26, 0.0  ;;  %v3533_v26 = vld [vmem:[#allocation2 + $0x314] ss:$8 sps:$4 sm:$0xff]  }
 0x2d6   :  { %v660_v31 = vpack.c.bf16 %v606_v28, %v604_v27  ;;  %v3531_v27 = vld [vmem:[#allocation2 + $0x310] ss:$8 sps:$4 sm:$0xff]   ;;  %v3536_v28 = vld [vmem:[#allocation2 + $0x324] ss:$8 sps:$4 sm:$0xff]  }
 0x2d7   :  { %v661_v32 = vpack.c.bf16 %v607_v30, %v605_v29  ;;  %v565_v33 = vpop.f32.mrb[56].mxu0  ;;  %v3534_v29 = vld [vmem:[#allocation2 + $0x320] ss:$8 sps:$4 sm:$0xff]   ;;  %v3539_v30 = vld [vmem:[#allocation2 + $0x334] ss:$8 sps:$4 sm:$0xff]  }
 0x2d8   :  { %v566_v34 = vadd.f32 %v565_v33, %v3990_v6  ;;  %v567_v35 = vpop.f32.mrb[57].mxu0 }
 0x2d9   :  { %v568_v36 = vadd.f32 %v567_v35, %v3993_v7  ;;  %v569_v40 = vpop.f32.mrb[58].mxu0  ;;  %919 = vmatprep.mubr.bf16.mxu1 %v661_v32  ;;  %v3196_v32 = vld [vmem:[%s4806_s3 + $0x3] ss:$8 sm:$0x3] }
 0x2da   :  { %v570_v42 = vadd.f32 %v569_v40, %v3990_v6  ;;  %v571_v43 = vpop.f32.mrb[59].mxu0  ;;  %920 = vmatmul.mubr.bf16.gmra.mrb[52].mxu1 %v660_v31  ;;  %v608_v0 = vmax.f32 %v566_v34, 0.0  ;;  %v3537_v31 = vld [vmem:[#allocation2 + $0x330] ss:$8 sps:$4 sm:$0xff]   ;;  %v4031_v33 = vrot.slane %v3196_v32, %v3907_v39  ;;  %v4034_v34 = vrot.slane %v3196_v32, %v3987_v5 }
 0x2db   :  { %v572_v44 = vadd.f32 %v571_v43, %v3993_v7  ;;  %v609_v45 = vmax.f32 %v568_v36, 0.0 }
 0x2dc   :  { %v610_v20 = vmax.f32 %v570_v42, 0.0 }
 0x2dd   :  { %v611_v46 = vmax.f32 %v572_v44, 0.0 }
 0x2de   :  { %v662_v47 = vpack.c.bf16 %v610_v20, %v608_v0 }
 0x2df   :  { %v663_v48 = vpack.c.bf16 %v611_v46, %v609_v45  ;;  %v575_v49 = vpop.f32.mrb[60].mxu0 }
 0x2e0   :  { %v576_v50 = vadd.f32 %v575_v49, %v3990_v6  ;;  %v577_v51 = vpop.f32.mrb[61].mxu0 }
 0x2e1   :  { %v578_v52 = vadd.f32 %v577_v51, %v3993_v7  ;;  %v579_v53 = vpop.f32.mrb[62].mxu0  ;;  %929 = vmatprep.mubr.bf16.mxu1 %v663_v48 }
 0x2e2   :  { %v580_v54 = vadd.f32 %v579_v53, %v3990_v6  ;;  %v581_v55 = vpop.f32.mrb[63].mxu0  ;;  %930 = vmatmul.mubr.bf16.gmra.mrb[56].mxu1 %v662_v47  ;;  %v612_v57 = vmax.f32 %v576_v50, 0.0  ;;  %v3498_v6 = vld [vmem:[#allocation2 + $0x260] ss:$8 sps:$4 sm:$0xff]  }
 0x2e3   :  { %v582_v56 = vadd.f32 %v581_v55, %v3993_v7  ;;  %v613_v59 = vmax.f32 %v578_v52, 0.0  ;;  %1570 = vmatpush1.bf16.msra.mxu1 %v3498_v6  ;;  %v3501_v7 = vld [vmem:[#allocation2 + $0x270] ss:$8 sps:$4 sm:$0xff]  }
 0x2e4   :  { %v614_v58 = vmax.f32 %v580_v54, 0.0  ;;  %1571 = vmatprep.subr.bf16.mxu1 %v3503_v4 }
 0x2e5   :  { %v615_v60 = vmax.f32 %v582_v56, 0.0 }
 0x2e6   :  { %v664_v61 = vpack.c.bf16 %v614_v58, %v612_v57 }
 0x2e7   :  { %v665_v41 = vpack.c.bf16 %v615_v60, %v613_v59  ;;  %1572 = vmatpush1.bf16.msra.mxu1 %v3501_v7 }
 0x2e8   :  { %1573 = vmatprep.subr.bf16.mxu1 %v3506_v8 }
 0x2e9   :  { %939 = vmatprep.mubr.bf16.mxu1 %v665_v41 }
 0x2ea   :  { %940 = vmatmul.mubr.bf16.gmra.mrb[60].mxu1 %v664_v61 }
 0x2eb   :  { %1574 = vmatpush1.bf16.msra.mxu1 %v3504_v9 }
 0x2ec   :  { %1575 = vmatprep.subr.bf16.mxu1 %v3509_v10 }
 0x2ef   :  { %1576 = vmatpush1.bf16.msra.mxu1 %v3507_v11 }
 0x2f0   :  { %1577 = vmatprep.subr.bf16.mxu1 %v3512_v12 }
 0x2f3   :  { %1578 = vmatpush1.bf16.msra.mxu1 %v3510_v13 }
 0x2f4   :  { %1579 = vmatprep.subr.bf16.mxu1 %v3515_v14 }
 0x2f7   :  { %1580 = vmatpush1.bf16.msra.mxu1 %v3513_v38 }
 0x2f8   :  { %1581 = vmatprep.subr.bf16.mxu1 %v3518_v15 }
 0x2fb   :  { %1582 = vmatpush1.bf16.msra.mxu1 %v3516_v16 }
 0x2fc   :  { %1583 = vmatprep.subr.bf16.mxu1 %v3521_v17 }
 0x2ff   :  { %1584 = vmatpush1.bf16.msra.mxu1 %v3519_v18 }
 0x300   :  { %1585 = vmatprep.subr.bf16.mxu1 %v3524_v19 }
 0x303   :  { %1586 = vmatpush1.bf16.msra.mxu1 %v3522_v21 }
 0x304   :  { %1587 = vmatprep.subr.bf16.mxu1 %v3527_v22 }
 0x307   :  { %1588 = vmatpush1.bf16.msra.mxu1 %v3525_v23 }
 0x308   :  { %1589 = vmatprep.subr.bf16.mxu1 %v3530_v24 }
 0x30b   :  { %1590 = vmatpush1.bf16.msra.mxu1 %v3528_v25 }
 0x30c   :  { %1591 = vmatprep.subr.bf16.mxu1 %v3533_v26 }
 0x30f   :  { %1592 = vmatpush1.bf16.msra.mxu1 %v3531_v27 }
 0x310   :  { %1593 = vmatprep.subr.bf16.mxu1 %v3536_v28 }
 0x313   :  { %1594 = vmatpush1.bf16.msra.mxu1 %v3534_v29 }
 0x314   :  { %1595 = vmatprep.subr.bf16.mxu1 %v3539_v30 }
 0x317   :  { %1596 = vmatpush1.bf16.msra.mxu1 %v3537_v31 }
 0x385   :  { %v871_v35 = vpop.f32.mrb[32].mxu1 }
 0x386   :  { %v872_v36 = vadd.f32 %v871_v35, %v4031_v33  ;;  %v873_v40 = vpop.f32.mrb[33].mxu1 }
 0x387   :  { %v874_v42 = vadd.f32 %v873_v40, %v4034_v34  ;;  %v875_v43 = vpop.f32.mrb[34].mxu1 }
 0x388   :  { %v876_v44 = vadd.f32 %v875_v43, %v4031_v33  ;;  %v877_v0 = vpop.f32.mrb[35].mxu1  ;;  %v950_v45 = vmax.f32 %v872_v36, 0.0 }
 0x389   :  { %v878_v20 = vadd.f32 %v877_v0, %v4034_v34  ;;  %v951_v47 = vmax.f32 %v874_v42, 0.0 }
 0x38a   :  { %v952_v46 = vmax.f32 %v876_v44, 0.0 }
 0x38b   :  { %v953_v48 = vmax.f32 %v878_v20, 0.0 }
 0x38c   :  { %v1016_v49 = vpack.c.bf16 %v952_v46, %v950_v45 }
 0x38d   :  { %v1017_v50 = vpack.c.bf16 %v953_v48, %v951_v47  ;;  %v881_v51 = vpop.f32.mrb[36].mxu1 }
 0x38e   :  { %v882_v52 = vadd.f32 %v881_v51, %v4031_v33  ;;  %v883_v53 = vpop.f32.mrb[37].mxu1 }
 0x38f   :  { %v884_v54 = vadd.f32 %v883_v53, %v4034_v34  ;;  %v885_v55 = vpop.f32.mrb[38].mxu1  ;;  %1235 = vmatprep.mubr.bf16.mxu0 %v1017_v50 }
 0x390   :  { %v886_v56 = vadd.f32 %v885_v55, %v4031_v33  ;;  %v887_v57 = vpop.f32.mrb[39].mxu1  ;;  %1236 = vmatmul.mubr.bf16.vlgmr.msra.gmra.mrb[64].mxu0 %v1016_v49  ;;  %v954_v59 = vmax.f32 %v882_v52, 0.0 }
 0x391   :  { %v888_v58 = vadd.f32 %v887_v57, %v4034_v34  ;;  %v955_v61 = vmax.f32 %v884_v54, 0.0 }
 0x392   :  { %v956_v60 = vmax.f32 %v886_v56, 0.0 }
 0x393   :  { %v957_v41 = vmax.f32 %v888_v58, 0.0 }
 0x394   :  { %v1018_v62 = vpack.c.bf16 %v956_v60, %v954_v59 }
 0x395   :  { %v1019_v63 = vpack.c.bf16 %v957_v41, %v955_v61  ;;  %v891_v1 = vpop.f32.mrb[40].mxu1 }
 0x396   :  { %v892_v2 = vadd.f32 %v891_v1, %v4031_v33  ;;  %v893_v6 = vpop.f32.mrb[41].mxu1 }
 0x397   :  { %v894_v3 = vadd.f32 %v893_v6, %v4034_v34  ;;  %v895_v4 = vpop.f32.mrb[42].mxu1  ;;  %1245 = vmatprep.mubr.bf16.mxu0 %v1019_v63 }
 0x398   :  { %v896_v7 = vadd.f32 %v895_v4, %v4031_v33  ;;  %v897_v8 = vpop.f32.mrb[43].mxu1  ;;  %1246 = vmatmul.mubr.bf16.gmra.mrb[68].mxu0 %v1018_v62  ;;  %v958_v10 = vmax.f32 %v892_v2, 0.0 }
 0x399   :  { %v898_v9 = vadd.f32 %v897_v8, %v4034_v34  ;;  %v959_v12 = vmax.f32 %v894_v3, 0.0 }
 0x39a   :  { %v960_v11 = vmax.f32 %v896_v7, 0.0 }
 0x39b   :  { %v961_v13 = vmax.f32 %v898_v9, 0.0 }
 0x39c   :  { %v1020_v14 = vpack.c.bf16 %v960_v11, %v958_v10 }
 0x39d   :  { %v1021_v38 = vpack.c.bf16 %v961_v13, %v959_v12  ;;  %v901_v15 = vpop.f32.mrb[44].mxu1 }
 0x39e   :  { %v902_v16 = vadd.f32 %v901_v15, %v4031_v33  ;;  %v903_v17 = vpop.f32.mrb[45].mxu1 }
 0x39f   :  { %v904_v18 = vadd.f32 %v903_v17, %v4034_v34  ;;  %v905_v19 = vpop.f32.mrb[46].mxu1  ;;  %1255 = vmatprep.mubr.bf16.mxu0 %v1021_v38 }
 0x3a0   :  { %v906_v21 = vadd.f32 %v905_v19, %v4031_v33  ;;  %v907_v22 = vpop.f32.mrb[47].mxu1  ;;  %1256 = vmatmul.mubr.bf16.gmra.mrb[72].mxu0 %v1020_v14  ;;  %v962_v24 = vmax.f32 %v902_v16, 0.0 }
 0x3a1   :  { %v908_v23 = vadd.f32 %v907_v22, %v4034_v34  ;;  %v963_v26 = vmax.f32 %v904_v18, 0.0 }
 0x3a2   :  { %v964_v25 = vmax.f32 %v906_v21, 0.0 }
 0x3a3   :  { %v965_v27 = vmax.f32 %v908_v23, 0.0 }
 0x3a4   :  { %v1022_v28 = vpack.c.bf16 %v964_v25, %v962_v24 }
 0x3a5   :  { %v1023_v29 = vpack.c.bf16 %v965_v27, %v963_v26  ;;  %v911_v30 = vpop.f32.mrb[48].mxu1  ;;  %v3542_v27 = vld [vmem:[#allocation2 + $0x344] ss:$8 sps:$4 sm:$0xff]  }
 0x3a6   :  { %v912_v31 = vadd.f32 %v911_v30, %v4031_v33  ;;  %v913_v32 = vpop.f32.mrb[49].mxu1  ;;  %1597 = vmatprep.subr.bf16.mxu1 %v3542_v27  ;;  %v3543_v30 = vld [vmem:[#allocation2 + $0x350] ss:$8 sps:$4 sm:$0xff]  }
 0x3a7   :  { %v914_v35 = vadd.f32 %v913_v32, %v4034_v34  ;;  %v915_v36 = vpop.f32.mrb[50].mxu1  ;;  %1265 = vmatprep.mubr.bf16.mxu0 %v1023_v29  ;;  %v3545_v29 = vld [vmem:[#allocation2 + $0x354] ss:$8 sps:$4 sm:$0xff]  }
 0x3a8   :  { %v916_v40 = vadd.f32 %v915_v36, %v4031_v33  ;;  %v917_v42 = vpop.f32.mrb[51].mxu1  ;;  %1266 = vmatmul.mubr.bf16.gmra.mrb[76].mxu0 %v1022_v28  ;;  %v966_v44 = vmax.f32 %v912_v31, 0.0  ;;  %v3540_v28 = vld [vmem:[#allocation2 + $0x340] ss:$8 sps:$4 sm:$0xff]   ;;  %v3548_v31 = vld [vmem:[#allocation2 + $0x364] ss:$8 sps:$4 sm:$0xff]  }
 0x3a9   :  { %v918_v43 = vadd.f32 %v917_v42, %v4034_v34  ;;  %v967_v20 = vmax.f32 %v914_v35, 0.0  ;;  %1598 = vmatpush1.bf16.msra.mxu1 %v3540_v28  ;;  %v3551_v32 = vld [vmem:[#allocation2 + $0x374] ss:$8 sps:$4 sm:$0xff]   ;;  %1935 = vmatprep.subr.bf16.mxu0 %v3548_v31  ;;  %v3554_v35 = vld [vmem:[#allocation2 + $0x384] ss:$8 sps:$4 sm:$0xff]  }
 0x3aa   :  { %v968_v0 = vmax.f32 %v916_v40, 0.0  ;;  %1599 = vmatprep.subr.bf16.mxu1 %v3545_v29  ;;  %v3552_v36 = vld [vmem:[#allocation2 + $0x380] ss:$8 sps:$4 sm:$0xff]   ;;  %v3557_v40 = vld [vmem:[#allocation2 + $0x394] ss:$8 sps:$4 sm:$0xff]  }
 0x3ab   :  { %v969_v45 = vmax.f32 %v918_v43, 0.0  ;;  %v3555_v42 = vld [vmem:[#allocation2 + $0x390] ss:$8 sps:$4 sm:$0xff]   ;;  %v3560_v43 = vld [vmem:[#allocation2 + $0x3a4] ss:$8 sps:$4 sm:$0xff]  }
 0x3ac   :  { %v1024_v46 = vpack.c.bf16 %v968_v0, %v966_v44  ;;  %v3558_v44 = vld [vmem:[#allocation2 + $0x3a0] ss:$8 sps:$4 sm:$0xff]   ;;  %v3563_v0 = vld [vmem:[#allocation2 + $0x3b4] ss:$8 sps:$4 sm:$0xff]  }
 0x3ad   :  { %v1025_v47 = vpack.c.bf16 %v969_v45, %v967_v20  ;;  %v921_v48 = vpop.f32.mrb[52].mxu1  ;;  %1600 = vmatpush1.bf16.msra.mxu1 %v3543_v30  ;;  %v3561_v20 = vld [vmem:[#allocation2 + $0x3b0] ss:$8 sps:$4 sm:$0xff]   ;;  %v3566_v45 = vld [vmem:[#allocation2 + $0x3c4] ss:$8 sps:$4 sm:$0xff]  }
 0x3ae   :  { %v922_v49 = vadd.f32 %v921_v48, %v4031_v33  ;;  %v923_v50 = vpop.f32.mrb[53].mxu1  ;;  %v3567_v48 = vld [vmem:[#allocation2 + $0x3d0] ss:$8 sps:$4 sm:$0xff]  }
 0x3af   :  { %v924_v51 = vadd.f32 %v923_v50, %v4034_v34  ;;  %v925_v52 = vpop.f32.mrb[54].mxu1  ;;  %1275 = vmatprep.mubr.bf16.mxu0 %v1025_v47  ;;  %v3569_v47 = vld [vmem:[#allocation2 + $0x3d4] ss:$8 sps:$4 sm:$0xff]   ;;  %v3570_v50 = vld [vmem:[#allocation2 + $0x3e0] ss:$8 sps:$4 sm:$0xff]  }
 0x3b0   :  { %v926_v53 = vadd.f32 %v925_v52, %v4031_v33  ;;  %v927_v54 = vpop.f32.mrb[55].mxu1  ;;  %1276 = vmatmul.mubr.bf16.gmra.mrb[80].mxu0 %v1024_v46  ;;  %v970_v56 = vmax.f32 %v922_v49, 0.0  ;;  %v3564_v46 = vld [vmem:[#allocation2 + $0x3c0] ss:$8 sps:$4 sm:$0xff]   ;;  %v3572_v49 = vld [vmem:[#allocation2 + $0x3e4] ss:$8 sps:$4 sm:$0xff]  }
 0x3b1   :  { %v928_v55 = vadd.f32 %v927_v54, %v4034_v34  ;;  %v971_v58 = vmax.f32 %v924_v51, 0.0  ;;  %v3575_v51 = vld [vmem:[#allocation2 + $0x3f4] ss:$8 sps:$4 sm:$0xff]   ;;  %v3573_v52 = vld [vmem:[#allocation2 + $0x3f0] ss:$8 sps:$4 sm:$0xff]  }
 0x3b2   :  { %v972_v57 = vmax.f32 %v926_v53, 0.0  ;;  %v3578_v53 = vld [vmem:[#allocation2 + $0x404] ss:$8 sps:$4 sm:$0xff]   ;;  %v3576_v54 = vld [vmem:[#allocation2 + $0x400] ss:$8 sps:$4 sm:$0xff]  }
 0x3b3   :  { %v973_v59 = vmax.f32 %v928_v55, 0.0  ;;  %v3581_v55 = vld [vmem:[#allocation2 + $0x414] ss:$8 sps:$4 sm:$0xff]  }
 0x3b4   :  { %v1026_v60 = vpack.c.bf16 %v972_v57, %v970_v56  ;;  %v3579_v56 = vld [vmem:[#allocation2 + $0x410] ss:$8 sps:$4 sm:$0xff]   ;;  %v3584_v57 = vld [vmem:[#allocation2 + $0x424] ss:$8 sps:$4 sm:$0xff]  }
 0x3b5   :  { %v1027_v61 = vpack.c.bf16 %v973_v59, %v971_v58  ;;  %v931_v41 = vpop.f32.mrb[56].mxu1  ;;  %v3582_v58 = vld [vmem:[#allocation2 + $0x420] ss:$8 sps:$4 sm:$0xff]   ;;  %v3587_v59 = vld [vmem:[#allocation2 + $0x434] ss:$8 sps:$4 sm:$0xff]  }
 0x3b6   :  { %v932_v62 = vadd.f32 %v931_v41, %v4031_v33  ;;  %v933_v63 = vpop.f32.mrb[57].mxu1 }
 0x3b7   :  { %v934_v1 = vadd.f32 %v933_v63, %v4034_v34  ;;  %v935_v2 = vpop.f32.mrb[58].mxu1  ;;  %1285 = vmatprep.mubr.bf16.mxu0 %v1027_v61  ;;  %v3229_v61 = vld [vmem:[%s4806_s3 + $0x4] ss:$8 sm:$0x3] }
 0x3b8   :  { %v936_v6 = vadd.f32 %v935_v2, %v4031_v33  ;;  %v937_v3 = vpop.f32.mrb[59].mxu1  ;;  %1286 = vmatmul.mubr.bf16.gmra.mrb[84].mxu0 %v1026_v60  ;;  %v974_v7 = vmax.f32 %v932_v62, 0.0  ;;  %v3585_v60 = vld [vmem:[#allocation2 + $0x430] ss:$8 sps:$4 sm:$0xff]   ;;  %v4072_v41 = vrot.slane %v3229_v61, %v3907_v39  ;;  %v4075_v62 = vrot.slane %v3229_v61, %v3987_v5 }
 0x3b9   :  { %v938_v4 = vadd.f32 %v937_v3, %v4034_v34  ;;  %v975_v9 = vmax.f32 %v934_v1, 0.0 }
 0x3ba   :  { %v976_v8 = vmax.f32 %v936_v6, 0.0 }
 0x3bb   :  { %v977_v10 = vmax.f32 %v938_v4, 0.0 }
 0x3bc   :  { %v1028_v11 = vpack.c.bf16 %v976_v8, %v974_v7 }
 0x3bd   :  { %v1029_v12 = vpack.c.bf16 %v977_v10, %v975_v9  ;;  %v941_v13 = vpop.f32.mrb[60].mxu1 }
 0x3be   :  { %v942_v14 = vadd.f32 %v941_v13, %v4031_v33  ;;  %v943_v38 = vpop.f32.mrb[61].mxu1 }
 0x3bf   :  { %v944_v15 = vadd.f32 %v943_v38, %v4034_v34  ;;  %v945_v16 = vpop.f32.mrb[62].mxu1  ;;  %1295 = vmatprep.mubr.bf16.mxu0 %v1029_v12 }
 0x3c0   :  { %v946_v17 = vadd.f32 %v945_v16, %v4031_v33  ;;  %v947_v18 = vpop.f32.mrb[63].mxu1  ;;  %1296 = vmatmul.mubr.bf16.gmra.mrb[88].mxu0 %v1028_v11  ;;  %v978_v21 = vmax.f32 %v942_v14, 0.0  ;;  %v3546_v33 = vld [vmem:[#allocation2 + $0x360] ss:$8 sps:$4 sm:$0xff]  }
 0x3c1   :  { %v948_v19 = vadd.f32 %v947_v18, %v4034_v34  ;;  %v979_v23 = vmax.f32 %v944_v15, 0.0  ;;  %1936 = vmatpush1.bf16.msra.mxu0 %v3546_v33  ;;  %v3549_v34 = vld [vmem:[#allocation2 + $0x370] ss:$8 sps:$4 sm:$0xff]  }
 0x3c2   :  { %v980_v22 = vmax.f32 %v946_v17, 0.0  ;;  %1937 = vmatprep.subr.bf16.mxu0 %v3551_v32 }
 0x3c3   :  { %v981_v24 = vmax.f32 %v948_v19, 0.0 }
 0x3c4   :  { %v1030_v25 = vpack.c.bf16 %v980_v22, %v978_v21 }
 0x3c5   :  { %v1031_v26 = vpack.c.bf16 %v981_v24, %v979_v23  ;;  %1938 = vmatpush1.bf16.msra.mxu0 %v3549_v34 }
 0x3c6   :  { %1939 = vmatprep.subr.bf16.mxu0 %v3554_v35 }
 0x3c7   :  { %1305 = vmatprep.mubr.bf16.mxu0 %v1031_v26 }
 0x3c8   :  { %1306 = vmatmul.mubr.bf16.gmra.mrb[92].mxu0 %v1030_v25 }
 0x3c9   :  { %1940 = vmatpush1.bf16.msra.mxu0 %v3552_v36 }
 0x3ca   :  { %1941 = vmatprep.subr.bf16.mxu0 %v3557_v40 }
 0x3cd   :  { %1942 = vmatpush1.bf16.msra.mxu0 %v3555_v42 }
 0x3ce   :  { %1943 = vmatprep.subr.bf16.mxu0 %v3560_v43 }
 0x3d1   :  { %1944 = vmatpush1.bf16.msra.mxu0 %v3558_v44 }
 0x3d2   :  { %1945 = vmatprep.subr.bf16.mxu0 %v3563_v0 }
 0x3d5   :  { %1946 = vmatpush1.bf16.msra.mxu0 %v3561_v20 }
 0x3d6   :  { %1947 = vmatprep.subr.bf16.mxu0 %v3566_v45 }
 0x3d9   :  { %1948 = vmatpush1.bf16.msra.mxu0 %v3564_v46 }
 0x3da   :  { %1949 = vmatprep.subr.bf16.mxu0 %v3569_v47 }
 0x3dd   :  { %1950 = vmatpush1.bf16.msra.mxu0 %v3567_v48 }
 0x3de   :  { %1951 = vmatprep.subr.bf16.mxu0 %v3572_v49 }
 0x3e1   :  { %1952 = vmatpush1.bf16.msra.mxu0 %v3570_v50 }
 0x3e2   :  { %1953 = vmatprep.subr.bf16.mxu0 %v3575_v51 }
 0x3e5   :  { %1954 = vmatpush1.bf16.msra.mxu0 %v3573_v52 }
 0x3e6   :  { %1955 = vmatprep.subr.bf16.mxu0 %v3578_v53 }
 0x3e9   :  { %1956 = vmatpush1.bf16.msra.mxu0 %v3576_v54 }
 0x3ea   :  { %1957 = vmatprep.subr.bf16.mxu0 %v3581_v55 }
 0x3ed   :  { %1958 = vmatpush1.bf16.msra.mxu0 %v3579_v56 }
 0x3ee   :  { %1959 = vmatprep.subr.bf16.mxu0 %v3584_v57 }
 0x3f1   :  { %1960 = vmatpush1.bf16.msra.mxu0 %v3582_v58 }
 0x3f2   :  { %1961 = vmatprep.subr.bf16.mxu0 %v3587_v59 }
 0x3f5   :  { %1962 = vmatpush1.bf16.msra.mxu0 %v3585_v60 }
 0x463   :  { %v1237_v63 = vpop.f32.mrb[64].mxu0 }
 0x464   :  { %v1238_v1 = vadd.f32 %v1237_v63, %v4072_v41  ;;  %v1239_v2 = vpop.f32.mrb[65].mxu0 }
 0x465   :  { %v1240_v6 = vadd.f32 %v1239_v2, %v4075_v62  ;;  %v1241_v3 = vpop.f32.mrb[66].mxu0 }
 0x466   :  { %v1242_v4 = vadd.f32 %v1241_v3, %v4072_v41  ;;  %v1243_v7 = vpop.f32.mrb[67].mxu0  ;;  %v1316_v9 = vmax.f32 %v1238_v1, 0.0 }
 0x467   :  { %v1244_v8 = vadd.f32 %v1243_v7, %v4075_v62  ;;  %v1317_v11 = vmax.f32 %v1240_v6, 0.0 }
 0x468   :  { %v1318_v10 = vmax.f32 %v1242_v4, 0.0 }
 0x469   :  { %v1319_v12 = vmax.f32 %v1244_v8, 0.0 }
 0x46a   :  { %v1382_v13 = vpack.c.bf16 %v1318_v10, %v1316_v9 }
 0x46b   :  { %v1383_v14 = vpack.c.bf16 %v1319_v12, %v1317_v11  ;;  %v1247_v38 = vpop.f32.mrb[68].mxu0 }
 0x46c   :  { %v1248_v15 = vadd.f32 %v1247_v38, %v4072_v41  ;;  %v1249_v16 = vpop.f32.mrb[69].mxu0 }
 0x46d   :  { %v1250_v17 = vadd.f32 %v1249_v16, %v4075_v62  ;;  %v1251_v18 = vpop.f32.mrb[70].mxu0  ;;  %1601 = vmatprep.mubr.bf16.mxu1 %v1383_v14 }
 0x46e   :  { %v1252_v19 = vadd.f32 %v1251_v18, %v4072_v41  ;;  %v1253_v21 = vpop.f32.mrb[71].mxu0  ;;  %1602 = vmatmul.mubr.bf16.vlgmr.msra.gmra.mrb[64].mxu1 %v1382_v13  ;;  %v1320_v23 = vmax.f32 %v1248_v15, 0.0 }
 0x46f   :  { %v1254_v22 = vadd.f32 %v1253_v21, %v4075_v62  ;;  %v1321_v25 = vmax.f32 %v1250_v17, 0.0 }
 0x470   :  { %v1322_v24 = vmax.f32 %v1252_v19, 0.0 }
 0x471   :  { %v1323_v26 = vmax.f32 %v1254_v22, 0.0 }
 0x472   :  { %v1384_v27 = vpack.c.bf16 %v1322_v24, %v1320_v23 }
 0x473   :  { %v1385_v28 = vpack.c.bf16 %v1323_v26, %v1321_v25  ;;  %v1257_v29 = vpop.f32.mrb[72].mxu0 }
 0x474   :  { %v1258_v30 = vadd.f32 %v1257_v29, %v4072_v41  ;;  %v1259_v33 = vpop.f32.mrb[73].mxu0 }
 0x475   :  { %v1260_v31 = vadd.f32 %v1259_v33, %v4075_v62  ;;  %v1261_v32 = vpop.f32.mrb[74].mxu0  ;;  %1611 = vmatprep.mubr.bf16.mxu1 %v1385_v28 }
 0x476   :  { %v1262_v34 = vadd.f32 %v1261_v32, %v4072_v41  ;;  %v1263_v35 = vpop.f32.mrb[75].mxu0  ;;  %1612 = vmatmul.mubr.bf16.gmra.mrb[68].mxu1 %v1384_v27  ;;  %v1324_v40 = vmax.f32 %v1258_v30, 0.0 }
 0x477   :  { %v1264_v36 = vadd.f32 %v1263_v35, %v4075_v62  ;;  %v1325_v43 = vmax.f32 %v1260_v31, 0.0 }
 0x478   :  { %v1326_v42 = vmax.f32 %v1262_v34, 0.0 }
 0x479   :  { %v1327_v44 = vmax.f32 %v1264_v36, 0.0 }
 0x47a   :  { %v1386_v0 = vpack.c.bf16 %v1326_v42, %v1324_v40 }
 0x47b   :  { %v1387_v20 = vpack.c.bf16 %v1327_v44, %v1325_v43  ;;  %v1267_v45 = vpop.f32.mrb[76].mxu0 }
 0x47c   :  { %v1268_v46 = vadd.f32 %v1267_v45, %v4072_v41  ;;  %v1269_v47 = vpop.f32.mrb[77].mxu0 }
 0x47d   :  { %v1270_v48 = vadd.f32 %v1269_v47, %v4075_v62  ;;  %v1271_v49 = vpop.f32.mrb[78].mxu0  ;;  %1621 = vmatprep.mubr.bf16.mxu1 %v1387_v20 }
 0x47e   :  { %v1272_v50 = vadd.f32 %v1271_v49, %v4072_v41  ;;  %v1273_v51 = vpop.f32.mrb[79].mxu0  ;;  %1622 = vmatmul.mubr.bf16.gmra.mrb[72].mxu1 %v1386_v0  ;;  %v1328_v53 = vmax.f32 %v1268_v46, 0.0 }
 0x47f   :  { %v1274_v52 = vadd.f32 %v1273_v51, %v4075_v62  ;;  %v1329_v55 = vmax.f32 %v1270_v48, 0.0 }
 0x480   :  { %v1330_v54 = vmax.f32 %v1272_v50, 0.0 }
 0x481   :  { %v1331_v56 = vmax.f32 %v1274_v52, 0.0 }
 0x482   :  { %v1388_v57 = vpack.c.bf16 %v1330_v54, %v1328_v53 }
 0x483   :  { %v1389_v58 = vpack.c.bf16 %v1331_v56, %v1329_v55  ;;  %v1277_v59 = vpop.f32.mrb[80].mxu0  ;;  %v3590_v56 = vld [vmem:[#allocation2 + $0x444] ss:$8 sps:$4 sm:$0xff]  }
 0x484   :  { %v1278_v60 = vadd.f32 %v1277_v59, %v4072_v41  ;;  %v1279_v61 = vpop.f32.mrb[81].mxu0  ;;  %1963 = vmatprep.subr.bf16.mxu0 %v3590_v56  ;;  %v3591_v59 = vld [vmem:[#allocation2 + $0x450] ss:$8 sps:$4 sm:$0xff]  }
 0x485   :  { %v1280_v63 = vadd.f32 %v1279_v61, %v4075_v62  ;;  %v1281_v1 = vpop.f32.mrb[82].mxu0  ;;  %1631 = vmatprep.mubr.bf16.mxu1 %v1389_v58  ;;  %v3593_v58 = vld [vmem:[#allocation2 + $0x454] ss:$8 sps:$4 sm:$0xff]  }
 0x486   :  { %v1282_v2 = vadd.f32 %v1281_v1, %v4072_v41  ;;  %v1283_v6 = vpop.f32.mrb[83].mxu0  ;;  %1632 = vmatmul.mubr.bf16.gmra.mrb[76].mxu1 %v1388_v57  ;;  %v1332_v4 = vmax.f32 %v1278_v60, 0.0  ;;  %v3588_v57 = vld [vmem:[#allocation2 + $0x440] ss:$8 sps:$4 sm:$0xff]   ;;  %v3596_v60 = vld [vmem:[#allocation2 + $0x464] ss:$8 sps:$4 sm:$0xff]  }
 0x487   :  { %v1284_v3 = vadd.f32 %v1283_v6, %v4075_v62  ;;  %v1333_v8 = vmax.f32 %v1280_v63, 0.0  ;;  %1964 = vmatpush1.bf16.msra.mxu0 %v3588_v57  ;;  %v3599_v61 = vld [vmem:[#allocation2 + $0x474] ss:$8 sps:$4 sm:$0xff]   ;;  %2296 = vmatprep.subr.bf16.mxu1 %v3596_v60  ;;  %v3602_v63 = vld [vmem:[#allocation2 + $0x484] ss:$8 sps:$4 sm:$0xff]  }
 0x488   :  { %v1334_v7 = vmax.f32 %v1282_v2, 0.0  ;;  %1965 = vmatprep.subr.bf16.mxu0 %v3593_v58  ;;  %v3600_v1 = vld [vmem:[#allocation2 + $0x480] ss:$8 sps:$4 sm:$0xff]   ;;  %v3605_v2 = vld [vmem:[#allocation2 + $0x494] ss:$8 sps:$4 sm:$0xff]  }
 0x489   :  { %v1335_v9 = vmax.f32 %v1284_v3, 0.0  ;;  %v3603_v6 = vld [vmem:[#allocation2 + $0x490] ss:$8 sps:$4 sm:$0xff]   ;;  %v3608_v3 = vld [vmem:[#allocation2 + $0x4a4] ss:$8 sps:$4 sm:$0xff]  }
 0x48a   :  { %v1390_v10 = vpack.c.bf16 %v1334_v7, %v1332_v4  ;;  %v3606_v4 = vld [vmem:[#allocation2 + $0x4a0] ss:$8 sps:$4 sm:$0xff]   ;;  %v3611_v7 = vld [vmem:[#allocation2 + $0x4b4] ss:$8 sps:$4 sm:$0xff]  }
 0x48b   :  { %v1391_v11 = vpack.c.bf16 %v1335_v9, %v1333_v8  ;;  %v1287_v12 = vpop.f32.mrb[84].mxu0  ;;  %1966 = vmatpush1.bf16.msra.mxu0 %v3591_v59  ;;  %v3609_v8 = vld [vmem:[#allocation2 + $0x4b0] ss:$8 sps:$4 sm:$0xff]   ;;  %v3614_v9 = vld [vmem:[#allocation2 + $0x4c4] ss:$8 sps:$4 sm:$0xff]  }
 0x48c   :  { %v1288_v13 = vadd.f32 %v1287_v12, %v4072_v41  ;;  %v1289_v14 = vpop.f32.mrb[85].mxu0  ;;  %v3615_v12 = vld [vmem:[#allocation2 + $0x4d0] ss:$8 sps:$4 sm:$0xff]  }
 0x48d   :  { %v1290_v38 = vadd.f32 %v1289_v14, %v4075_v62  ;;  %v1291_v15 = vpop.f32.mrb[86].mxu0  ;;  %1641 = vmatprep.mubr.bf16.mxu1 %v1391_v11  ;;  %v3617_v11 = vld [vmem:[#allocation2 + $0x4d4] ss:$8 sps:$4 sm:$0xff]   ;;  %v3618_v14 = vld [vmem:[#allocation2 + $0x4e0] ss:$8 sps:$4 sm:$0xff]  }
 0x48e   :  { %v1292_v16 = vadd.f32 %v1291_v15, %v4072_v41  ;;  %v1293_v17 = vpop.f32.mrb[87].mxu0  ;;  %1642 = vmatmul.mubr.bf16.gmra.mrb[80].mxu1 %v1390_v10  ;;  %v1336_v19 = vmax.f32 %v1288_v13, 0.0  ;;  %v3612_v10 = vld [vmem:[#allocation2 + $0x4c0] ss:$8 sps:$4 sm:$0xff]   ;;  %v3620_v13 = vld [vmem:[#allocation2 + $0x4e4] ss:$8 sps:$4 sm:$0xff]  }
 0x48f   :  { %v1294_v18 = vadd.f32 %v1293_v17, %v4075_v62  ;;  %v1337_v22 = vmax.f32 %v1290_v38, 0.0  ;;  %v3623_v38 = vld [vmem:[#allocation2 + $0x4f4] ss:$8 sps:$4 sm:$0xff]   ;;  %v3621_v15 = vld [vmem:[#allocation2 + $0x4f0] ss:$8 sps:$4 sm:$0xff]  }
 0x490   :  { %v1338_v21 = vmax.f32 %v1292_v16, 0.0  ;;  %v3626_v16 = vld [vmem:[#allocation2 + $0x504] ss:$8 sps:$4 sm:$0xff]   ;;  %v3624_v17 = vld [vmem:[#allocation2 + $0x500] ss:$8 sps:$4 sm:$0xff]  }
 0x491   :  { %v1339_v23 = vmax.f32 %v1294_v18, 0.0  ;;  %v3629_v18 = vld [vmem:[#allocation2 + $0x514] ss:$8 sps:$4 sm:$0xff]  }
 0x492   :  { %v1392_v24 = vpack.c.bf16 %v1338_v21, %v1336_v19  ;;  %v3627_v19 = vld [vmem:[#allocation2 + $0x510] ss:$8 sps:$4 sm:$0xff]   ;;  %v3632_v21 = vld [vmem:[#allocation2 + $0x524] ss:$8 sps:$4 sm:$0xff]  }
 0x493   :  { %v1393_v25 = vpack.c.bf16 %v1339_v23, %v1337_v22  ;;  %v1297_v26 = vpop.f32.mrb[88].mxu0  ;;  %v3630_v22 = vld [vmem:[#allocation2 + $0x520] ss:$8 sps:$4 sm:$0xff]   ;;  %v3635_v23 = vld [vmem:[#allocation2 + $0x534] ss:$8 sps:$4 sm:$0xff]  }
 0x494   :  { %v1298_v27 = vadd.f32 %v1297_v26, %v4072_v41  ;;  %v1299_v28 = vpop.f32.mrb[89].mxu0 }
 0x495   :  { %v1300_v29 = vadd.f32 %v1299_v28, %v4075_v62  ;;  %v1301_v30 = vpop.f32.mrb[90].mxu0  ;;  %1651 = vmatprep.mubr.bf16.mxu1 %v1393_v25  ;;  %v3262_v25 = vld [vmem:[%s4806_s3 + $0x5] ss:$8 sm:$0x3] }
 0x496   :  { %v1302_v33 = vadd.f32 %v1301_v30, %v4072_v41  ;;  %v1303_v31 = vpop.f32.mrb[91].mxu0  ;;  %1652 = vmatmul.mubr.bf16.gmra.mrb[84].mxu1 %v1392_v24  ;;  %v1340_v34 = vmax.f32 %v1298_v27, 0.0  ;;  %v3633_v24 = vld [vmem:[#allocation2 + $0x530] ss:$8 sps:$4 sm:$0xff]   ;;  %v4113_v26 = vrot.slane %v3262_v25, %v3907_v39  ;;  %v4116_v27 = vrot.slane %v3262_v25, %v3987_v5 }
 0x497   :  { %v1304_v32 = vadd.f32 %v1303_v31, %v4075_v62  ;;  %v1341_v36 = vmax.f32 %v1300_v29, 0.0 }
 0x498   :  { %v1342_v35 = vmax.f32 %v1302_v33, 0.0 }
 0x499   :  { %v1343_v40 = vmax.f32 %v1304_v32, 0.0 }
 0x49a   :  { %v1394_v42 = vpack.c.bf16 %v1342_v35, %v1340_v34 }
 0x49b   :  { %v1395_v43 = vpack.c.bf16 %v1343_v40, %v1341_v36  ;;  %v1307_v44 = vpop.f32.mrb[92].mxu0 }
 0x49c   :  { %v1308_v0 = vadd.f32 %v1307_v44, %v4072_v41  ;;  %v1309_v20 = vpop.f32.mrb[93].mxu0 }
 0x49d   :  { %v1310_v45 = vadd.f32 %v1309_v20, %v4075_v62  ;;  %v1311_v46 = vpop.f32.mrb[94].mxu0  ;;  %1661 = vmatprep.mubr.bf16.mxu1 %v1395_v43 }
 0x49e   :  { %v1312_v47 = vadd.f32 %v1311_v46, %v4072_v41  ;;  %v1313_v48 = vpop.f32.mrb[95].mxu0  ;;  %1662 = vmatmul.mubr.bf16.gmra.mrb[88].mxu1 %v1394_v42  ;;  %v1344_v50 = vmax.f32 %v1308_v0, 0.0  ;;  %v3594_v41 = vld [vmem:[#allocation2 + $0x460] ss:$8 sps:$4 sm:$0xff]  }
 0x49f   :  { %v1314_v49 = vadd.f32 %v1313_v48, %v4075_v62  ;;  %v1345_v52 = vmax.f32 %v1310_v45, 0.0  ;;  %2297 = vmatpush1.bf16.msra.mxu1 %v3594_v41  ;;  %v3597_v62 = vld [vmem:[#allocation2 + $0x470] ss:$8 sps:$4 sm:$0xff]  }
 0x4a0   :  { %v1346_v51 = vmax.f32 %v1312_v47, 0.0  ;;  %2298 = vmatprep.subr.bf16.mxu1 %v3599_v61 }
 0x4a1   :  { %v1347_v53 = vmax.f32 %v1314_v49, 0.0 }
 0x4a2   :  { %v1396_v54 = vpack.c.bf16 %v1346_v51, %v1344_v50 }
 0x4a3   :  { %v1397_v55 = vpack.c.bf16 %v1347_v53, %v1345_v52  ;;  %2299 = vmatpush1.bf16.msra.mxu1 %v3597_v62 }
 0x4a4   :  { %2300 = vmatprep.subr.bf16.mxu1 %v3602_v63 }
 0x4a5   :  { %1671 = vmatprep.mubr.bf16.mxu1 %v1397_v55 }
 0x4a6   :  { %1672 = vmatmul.mubr.bf16.gmra.mrb[92].mxu1 %v1396_v54 }
 0x4a7   :  { %2301 = vmatpush1.bf16.msra.mxu1 %v3600_v1 }
 0x4a8   :  { %2302 = vmatprep.subr.bf16.mxu1 %v3605_v2 }
 0x4ab   :  { %2303 = vmatpush1.bf16.msra.mxu1 %v3603_v6 }
 0x4ac   :  { %2304 = vmatprep.subr.bf16.mxu1 %v3608_v3 }
 0x4af   :  { %2305 = vmatpush1.bf16.msra.mxu1 %v3606_v4 }
 0x4b0   :  { %2306 = vmatprep.subr.bf16.mxu1 %v3611_v7 }
 0x4b3   :  { %2307 = vmatpush1.bf16.msra.mxu1 %v3609_v8 }
 0x4b4   :  { %2308 = vmatprep.subr.bf16.mxu1 %v3614_v9 }
 0x4b7   :  { %2309 = vmatpush1.bf16.msra.mxu1 %v3612_v10 }
 0x4b8   :  { %2310 = vmatprep.subr.bf16.mxu1 %v3617_v11 }
 0x4bb   :  { %2311 = vmatpush1.bf16.msra.mxu1 %v3615_v12 }
 0x4bc   :  { %2312 = vmatprep.subr.bf16.mxu1 %v3620_v13 }
 0x4bf   :  { %2313 = vmatpush1.bf16.msra.mxu1 %v3618_v14 }
 0x4c0   :  { %2314 = vmatprep.subr.bf16.mxu1 %v3623_v38 }
 0x4c3   :  { %2315 = vmatpush1.bf16.msra.mxu1 %v3621_v15 }
 0x4c4   :  { %2316 = vmatprep.subr.bf16.mxu1 %v3626_v16 }
 0x4c7   :  { %2317 = vmatpush1.bf16.msra.mxu1 %v3624_v17 }
 0x4c8   :  { %2318 = vmatprep.subr.bf16.mxu1 %v3629_v18 }
 0x4cb   :  { %2319 = vmatpush1.bf16.msra.mxu1 %v3627_v19 }
 0x4cc   :  { %2320 = vmatprep.subr.bf16.mxu1 %v3632_v21 }
 0x4cf   :  { %2321 = vmatpush1.bf16.msra.mxu1 %v3630_v22 }
 0x4d0   :  { %2322 = vmatprep.subr.bf16.mxu1 %v3635_v23 }
 0x4d3   :  { %2323 = vmatpush1.bf16.msra.mxu1 %v3633_v24 }
 0x541   :  { %v1603_v28 = vpop.f32.mrb[64].mxu1 }
 0x542   :  { %v1604_v29 = vadd.f32 %v1603_v28, %v4113_v26  ;;  %v1605_v30 = vpop.f32.mrb[65].mxu1 }
 0x543   :  { %v1606_v33 = vadd.f32 %v1605_v30, %v4116_v27  ;;  %v1607_v31 = vpop.f32.mrb[66].mxu1 }
 0x544   :  { %v1608_v32 = vadd.f32 %v1607_v31, %v4113_v26  ;;  %v1609_v34 = vpop.f32.mrb[67].mxu1  ;;  %v1682_v36 = vmax.f32 %v1604_v29, 0.0 }
 0x545   :  { %v1610_v35 = vadd.f32 %v1609_v34, %v4116_v27  ;;  %v1683_v42 = vmax.f32 %v1606_v33, 0.0 }
 0x546   :  { %v1684_v40 = vmax.f32 %v1608_v32, 0.0 }
 0x547   :  { %v1685_v43 = vmax.f32 %v1610_v35, 0.0 }
 0x548   :  { %v1748_v44 = vpack.c.bf16 %v1684_v40, %v1682_v36 }
 0x549   :  { %v1749_v0 = vpack.c.bf16 %v1685_v43, %v1683_v42  ;;  %v1613_v20 = vpop.f32.mrb[68].mxu1 }
 0x54a   :  { %v1614_v45 = vadd.f32 %v1613_v20, %v4113_v26  ;;  %v1615_v46 = vpop.f32.mrb[69].mxu1 }
 0x54b   :  { %v1616_v47 = vadd.f32 %v1615_v46, %v4116_v27  ;;  %v1617_v48 = vpop.f32.mrb[70].mxu1  ;;  %1967 = vmatprep.mubr.bf16.mxu0 %v1749_v0 }
 0x54c   :  { %v1618_v49 = vadd.f32 %v1617_v48, %v4113_v26  ;;  %v1619_v50 = vpop.f32.mrb[71].mxu1  ;;  %1968 = vmatmul.mubr.bf16.vlgmr.msra.gmra.mrb[96].mxu0 %v1748_v44  ;;  %v1686_v52 = vmax.f32 %v1614_v45, 0.0 }
 0x54d   :  { %v1620_v51 = vadd.f32 %v1619_v50, %v4116_v27  ;;  %v1687_v54 = vmax.f32 %v1616_v47, 0.0 }
 0x54e   :  { %v1688_v53 = vmax.f32 %v1618_v49, 0.0 }
 0x54f   :  { %v1689_v55 = vmax.f32 %v1620_v51, 0.0 }
 0x550   :  { %v1750_v56 = vpack.c.bf16 %v1688_v53, %v1686_v52 }
 0x551   :  { %v1751_v57 = vpack.c.bf16 %v1689_v55, %v1687_v54  ;;  %v1623_v58 = vpop.f32.mrb[72].mxu1 }
 0x552   :  { %v1624_v59 = vadd.f32 %v1623_v58, %v4113_v26  ;;  %v1625_v41 = vpop.f32.mrb[73].mxu1 }
 0x553   :  { %v1626_v60 = vadd.f32 %v1625_v41, %v4116_v27  ;;  %v1627_v61 = vpop.f32.mrb[74].mxu1  ;;  %1977 = vmatprep.mubr.bf16.mxu0 %v1751_v57 }
 0x554   :  { %v1628_v62 = vadd.f32 %v1627_v61, %v4113_v26  ;;  %v1629_v63 = vpop.f32.mrb[75].mxu1  ;;  %1978 = vmatmul.mubr.bf16.gmra.mrb[100].mxu0 %v1750_v56  ;;  %v1690_v2 = vmax.f32 %v1624_v59, 0.0 }
 0x555   :  { %v1630_v1 = vadd.f32 %v1629_v63, %v4116_v27  ;;  %v1691_v3 = vmax.f32 %v1626_v60, 0.0 }
 0x556   :  { %v1692_v6 = vmax.f32 %v1628_v62, 0.0 }
 0x557   :  { %v1693_v4 = vmax.f32 %v1630_v1, 0.0 }
 0x558   :  { %v1752_v7 = vpack.c.bf16 %v1692_v6, %v1690_v2 }
 0x559   :  { %v1753_v8 = vpack.c.bf16 %v1693_v4, %v1691_v3  ;;  %v1633_v9 = vpop.f32.mrb[76].mxu1 }
 0x55a   :  { %v1634_v10 = vadd.f32 %v1633_v9, %v4113_v26  ;;  %v1635_v11 = vpop.f32.mrb[77].mxu1 }
 0x55b   :  { %v1636_v12 = vadd.f32 %v1635_v11, %v4116_v27  ;;  %v1637_v13 = vpop.f32.mrb[78].mxu1  ;;  %1987 = vmatprep.mubr.bf16.mxu0 %v1753_v8 }
 0x55c   :  { %v1638_v14 = vadd.f32 %v1637_v13, %v4113_v26  ;;  %v1639_v38 = vpop.f32.mrb[79].mxu1  ;;  %1988 = vmatmul.mubr.bf16.gmra.mrb[104].mxu0 %v1752_v7  ;;  %v1694_v16 = vmax.f32 %v1634_v10, 0.0 }
 0x55d   :  { %v1640_v15 = vadd.f32 %v1639_v38, %v4116_v27  ;;  %v1695_v18 = vmax.f32 %v1636_v12, 0.0 }
 0x55e   :  { %v1696_v17 = vmax.f32 %v1638_v14, 0.0 }
 0x55f   :  { %v1697_v19 = vmax.f32 %v1640_v15, 0.0 }
 0x560   :  { %v1754_v21 = vpack.c.bf16 %v1696_v17, %v1694_v16 }
 0x561   :  { %v1755_v22 = vpack.c.bf16 %v1697_v19, %v1695_v18  ;;  %v1643_v23 = vpop.f32.mrb[80].mxu1  ;;  %v3638_v19 = vld [vmem:[#allocation2 + $0x544] ss:$8 sps:$4 sm:$0xff]  }
 0x562   :  { %v1644_v24 = vadd.f32 %v1643_v23, %v4113_v26  ;;  %v1645_v25 = vpop.f32.mrb[81].mxu1  ;;  %2324 = vmatprep.subr.bf16.mxu1 %v3638_v19  ;;  %v3639_v23 = vld [vmem:[#allocation2 + $0x550] ss:$8 sps:$4 sm:$0xff]  }
 0x563   :  { %v1646_v28 = vadd.f32 %v1645_v25, %v4116_v27  ;;  %v1647_v29 = vpop.f32.mrb[82].mxu1  ;;  %1997 = vmatprep.mubr.bf16.mxu0 %v1755_v22  ;;  %v3641_v22 = vld [vmem:[#allocation2 + $0x554] ss:$8 sps:$4 sm:$0xff]  }
 0x564   :  { %v1648_v30 = vadd.f32 %v1647_v29, %v4113_v26  ;;  %v1649_v33 = vpop.f32.mrb[83].mxu1  ;;  %1998 = vmatmul.mubr.bf16.gmra.mrb[108].mxu0 %v1754_v21  ;;  %v1698_v32 = vmax.f32 %v1644_v24, 0.0  ;;  %v3636_v21 = vld [vmem:[#allocation2 + $0x540] ss:$8 sps:$4 sm:$0xff]   ;;  %v2491_v24 = vld [vmem:[%s4804_s1 + $0x10] sm:$0xff] }
 0x565   :  { %v1650_v31 = vadd.f32 %v1649_v33, %v4116_v27  ;;  %v1699_v35 = vmax.f32 %v1646_v28, 0.0  ;;  %2325 = vmatpush1.bf16.msra.mxu1 %v3636_v21  ;;  %v2507_v29 = vadd.f32 1e-20, %v2491_v24  ;;  %v2493_v33 = vld [vmem:[%s4804_s1 + $0x20] sm:$0xff] }
 0x566   :  { %v1700_v34 = vmax.f32 %v1648_v30, 0.0  ;;  %2326 = vmatprep.subr.bf16.mxu1 %v3641_v22  ;;  %v2492_v30 = vld [vmem:[%s4804_s1 + $0x18] sm:$0xff] }
 0x567   :  { %v1701_v36 = vmax.f32 %v1650_v31, 0.0  ;;  %v2494_v31 = vld [vmem:[%s4804_s1 + $0x28] sm:$0xff] }
 0x568   :  { %v1756_v40 = vpack.c.bf16 %v1700_v34, %v1698_v32  ;;  %v2508_v32 = vadd.f32 1e-20, %v2492_v30  ;;  %v2509_v34 = vadd.f32 1e-20, %v2493_v33 }
 0x569   :  { %v1757_v42 = vpack.c.bf16 %v1701_v36, %v1699_v35  ;;  %v1653_v43 = vpop.f32.mrb[84].mxu1  ;;  %2327 = vmatpush1.bf16.msra.mxu1 %v3639_v23  ;;  %v2510_v35 = vadd.f32 1e-20, %v2494_v31  ;;  %v2495_v36 = vld [vmem:[%s4804_s1 + $0x30] sm:$0xff] }
 0x56a   :  { %v1654_v44 = vadd.f32 %v1653_v43, %v4113_v26  ;;  %v1655_v0 = vpop.f32.mrb[85].mxu1  ;;  %v2511_v43 = vadd.f32 1e-20, %v2495_v36 }
 0x56b   :  { %v1656_v20 = vadd.f32 %v1655_v0, %v4116_v27  ;;  %v1657_v45 = vpop.f32.mrb[86].mxu1  ;;  %2007 = vmatprep.mubr.bf16.mxu0 %v1757_v42  ;;  %v2497_v42 = vld [vmem:[%s4804_s1 + $0x40] sm:$0xff]  ;;  %v2498_v0 = vld [vmem:[%s4804_s1 + $0x48] sm:$0xff] }
 0x56c   :  { %v1658_v46 = vadd.f32 %v1657_v45, %v4113_v26  ;;  %v1659_v47 = vpop.f32.mrb[87].mxu1  ;;  %2008 = vmatmul.mubr.bf16.gmra.mrb[112].mxu0 %v1756_v40  ;;  %v1702_v49 = vmax.f32 %v1654_v44, 0.0  ;;  %v2496_v40 = vld [vmem:[%s4804_s1 + $0x38] sm:$0xff]  ;;  %v2513_v45 = vadd.f32 1e-20, %v2497_v42 }
 0x56d   :  { %v1660_v48 = vadd.f32 %v1659_v47, %v4116_v27  ;;  %v1703_v51 = vmax.f32 %v1656_v20, 0.0  ;;  %v2512_v44 = vadd.f32 1e-20, %v2496_v40  ;;  %v2499_v20 = vld [vmem:[%s4804_s1 + $0x50] sm:$0xff]  ;;  %v2514_v47 = vadd.f32 1e-20, %v2498_v0 }
 0x56e   :  { %v1704_v50 = vmax.f32 %v1658_v46, 0.0  ;;  %v2500_v46 = vld [vmem:[%s4804_s1 + $0x58] sm:$0xff] }
 0x56f   :  { %v1705_v52 = vmax.f32 %v1660_v48, 0.0  ;;  %v2501_v48 = vld [vmem:[%s4804_s1 + $0x60] sm:$0xff] }
 0x570   :  { %v1758_v53 = vpack.c.bf16 %v1704_v50, %v1702_v49  ;;  %v2515_v49 = vadd.f32 1e-20, %v2499_v20  ;;  %v2502_v50 = vld [vmem:[%s4804_s1 + $0x68] sm:$0xff] }
 0x571   :  { %v1759_v54 = vpack.c.bf16 %v1705_v52, %v1703_v51  ;;  %v1663_v55 = vpop.f32.mrb[88].mxu1  ;;  %v2516_v51 = vadd.f32 1e-20, %v2500_v46  ;;  %v2503_v52 = vld [vmem:[%s4804_s1 + $0x70] sm:$0xff] }
 0x572   :  { %v1664_v56 = vadd.f32 %v1663_v55, %v4113_v26  ;;  %v1665_v57 = vpop.f32.mrb[89].mxu1  ;;  %v2504_v55 = vld [vmem:[%s4804_s1 + $0x78] sm:$0xff] }
 0x573   :  { %v1666_v58 = vadd.f32 %v1665_v57, %v4116_v27  ;;  %v1667_v59 = vpop.f32.mrb[90].mxu1  ;;  %2017 = vmatprep.mubr.bf16.mxu0 %v1759_v54  ;;  %v2518_v54 = vadd.f32 1e-20, %v2502_v50  ;;  %v2519_v57 = vadd.f32 1e-20, %v2503_v52 }
 0x574   :  { %v1668_v41 = vadd.f32 %v1667_v59, %v4113_v26  ;;  %v1669_v60 = vpop.f32.mrb[91].mxu1  ;;  %2018 = vmatmul.mubr.bf16.gmra.mrb[116].mxu0 %v1758_v53  ;;  %v1706_v62 = vmax.f32 %v1664_v56, 0.0  ;;  %v2517_v53 = vadd.f32 1e-20, %v2501_v48 }
 0x575   :  { %v1670_v61 = vadd.f32 %v1669_v60, %v4116_v27  ;;  %v1707_v1 = vmax.f32 %v1666_v58, 0.0 }
 0x576   :  { %v1708_v63 = vmax.f32 %v1668_v41, 0.0 }
 0x577   :  { %v1709_v2 = vmax.f32 %v1670_v61, 0.0  ;;  %v2520_v61 = vadd.f32 1e-20, %v2504_v55 }
 0x578   :  { %v1760_v6 = vpack.c.bf16 %v1708_v63, %v1706_v62 }
 0x579   :  { %v1761_v3 = vpack.c.bf16 %v1709_v2, %v1707_v1  ;;  %v1673_v4 = vpop.f32.mrb[92].mxu1 }
 0x57a   :  { %v1674_v7 = vadd.f32 %v1673_v4, %v4113_v26  ;;  %v1675_v8 = vpop.f32.mrb[93].mxu1 }
 0x57b   :  { %v1676_v9 = vadd.f32 %v1675_v8, %v4116_v27  ;;  %v1677_v10 = vpop.f32.mrb[94].mxu1  ;;  %2027 = vmatprep.mubr.bf16.mxu0 %v1761_v3 }
 0x57c   :  { %v1678_v11 = vadd.f32 %v1677_v10, %v4113_v26  ;;  %v1679_v12 = vpop.f32.mrb[95].mxu1  ;;  %2028 = vmatmul.mubr.bf16.gmra.mrb[120].mxu0 %v1760_v6  ;;  %v1710_v14 = vmax.f32 %v1674_v7, 0.0  ;;  %v2489_v26 = vld [vmem:[%s4804_s1] sm:$0xff] }
 0x57d   :  { %v1680_v13 = vadd.f32 %v1679_v12, %v4116_v27  ;;  %v1711_v15 = vmax.f32 %v1676_v9, 0.0  ;;  %v2490_v27 = vld [vmem:[%s4804_s1 + $0x8] sm:$0xff]  ;;  %v2505_v25 = vadd.f32 1e-20, %v2489_v26  ;;  %s3798_s1 = smov 64  }
 0x57e   :  { %v1712_v38 = vmax.f32 %v1678_v11, 0.0  ;;  %v2506_v28 = vadd.f32 1e-20, %v2490_v27 }
 0x57f   :  { %v1713_v16 = vmax.f32 %v1680_v13, 0.0  ;;  %3642 = vlog2.f32 %v2505_v25 }
 0x580   :  { %v1762_v17 = vpack.c.bf16 %v1712_v38, %v1710_v14  ;;  %3644 = vlog2.f32 %v2506_v28 }
 0x581   :  { %v1763_v18 = vpack.c.bf16 %v1713_v16, %v1711_v15  ;;  %3646 = vlog2.f32 %v2507_v29 }
 0x582   :  { %3648 = vlog2.f32 %v2508_v32 }
 0x583   :  { %2037 = vmatprep.mubr.bf16.mxu0 %v1763_v18  ;;  %3650 = vlog2.f32 %v2509_v34 }
 0x584   :  { %2038 = vmatmul.mubr.bf16.gmra.mrb[124].mxu0 %v1762_v17  ;;  %3652 = vlog2.f32 %v2510_v35 }
 0x585   :  { %3654 = vlog2.f32 %v2511_v43 }
 0x586   :  { %3656 = vlog2.f32 %v2512_v44 }
 0x587   :  { %3658 = vlog2.f32 %v2513_v45 }
 0x588   :  { %3660 = vlog2.f32 %v2514_v47 }
 0x589   :  { %v3643_v56 = vpop.eup %3642  ;;  %3662 = vlog2.f32 %v2515_v49 }
 0x58a   :  { %v3645_v58 = vpop.eup %3644  ;;  %v2522_v59 = vmul.f32 0.6931472, %v3643_v56  ;;  %3664 = vlog2.f32 %v2516_v51 }
 0x58b   :  { %v3647_v41 = vpop.eup %3646  ;;  %v2524_v60 = vmul.f32 0.6931472, %v3645_v58  ;;  %3666 = vlog2.f32 %v2517_v53 }
 0x58c   :  { %v3649_v62 = vpop.eup %3648  ;;  %v2553_v63 = vsub.f32 0.0, %v2522_v59  ;;  %v2526_v1 = vmul.f32 0.6931472, %v3647_v41  ;;  %3668 = vlog2.f32 %v2518_v54 }
 0x58d   :  { %v3651_v2 = vpop.eup %3650  ;;  %v2554_v6 = vsub.f32 0.0, %v2524_v60  ;;  %v2528_v3 = vmul.f32 0.6931472, %v3649_v62  ;;  %3670 = vlog2.f32 %v2519_v57 }
 0x58e   :  { %v3653_v4 = vpop.eup %3652  ;;  %v2569_v7 = vadd.f32 1e-20, %v2553_v63  ;;  %v2555_v8 = vsub.f32 0.0, %v2526_v1  ;;  %v2530_v9 = vmul.f32 0.6931472, %v3651_v2  ;;  %3672 = vlog2.f32 %v2520_v61 }
 0x58f   :  { %v3655_v10 = vpop.eup %3654  ;;  %v2570_v11 = vadd.f32 1e-20, %v2554_v6  ;;  %v2556_v12 = vsub.f32 0.0, %v2528_v3  ;;  %v2532_v13 = vmul.f32 0.6931472, %v3653_v4 }
 0x590   :  { %v3657_v14 = vpop.eup %3656  ;;  %3674 = vlog2.f32 %v2569_v7  ;;  %v2571_v38 = vadd.f32 1e-20, %v2555_v8  ;;  %v2557_v15 = vsub.f32 0.0, %v2530_v9  ;;  %v2534_v16 = vmul.f32 0.6931472, %v3655_v10 }
 0x591   :  { %v3659_v17 = vpop.eup %3658  ;;  %3676 = vlog2.f32 %v2570_v11  ;;  %v2572_v18 = vadd.f32 1e-20, %v2556_v12  ;;  %v2558_v19 = vsub.f32 0.0, %v2532_v13  ;;  %v2536_v21 = vmul.f32 0.6931472, %v3657_v14 }
 0x592   :  { %v3661_v22 = vpop.eup %3660  ;;  %3678 = vlog2.f32 %v2571_v38  ;;  %v2573_v23 = vadd.f32 1e-20, %v2557_v15  ;;  %v2559_v26 = vsub.f32 0.0, %v2534_v16  ;;  %v2538_v27 = vmul.f32 0.6931472, %v3659_v17 }
 0x593   :  { %v3663_v24 = vpop.eup %3662  ;;  %3680 = vlog2.f32 %v2572_v18  ;;  %v2574_v25 = vadd.f32 1e-20, %v2558_v19  ;;  %v2560_v28 = vsub.f32 0.0, %v2536_v21  ;;  %v2540_v29 = vmul.f32 0.6931472, %v3661_v22 }
 0x594   :  { %v3665_v30 = vpop.eup %3664  ;;  %3682 = vlog2.f32 %v2573_v23  ;;  %v2575_v33 = vadd.f32 1e-20, %v2559_v26  ;;  %v2561_v31 = vsub.f32 0.0, %v2538_v27  ;;  %v2542_v32 = vmul.f32 0.6931472, %v3663_v24 }
 0x595   :  { %v3667_v34 = vpop.eup %3666  ;;  %3684 = vlog2.f32 %v2574_v25  ;;  %v2576_v35 = vadd.f32 1e-20, %v2560_v28  ;;  %v2562_v36 = vsub.f32 0.0, %v2540_v29  ;;  %v2544_v40 = vmul.f32 0.6931472, %v3665_v30 }
 0x596   :  { %v3669_v42 = vpop.eup %3668  ;;  %3686 = vlog2.f32 %v2575_v33  ;;  %v2577_v43 = vadd.f32 1e-20, %v2561_v31  ;;  %v2563_v44 = vsub.f32 0.0, %v2542_v32  ;;  %v2546_v0 = vmul.f32 0.6931472, %v3667_v34 }
 0x597   :  { %v3671_v20 = vpop.eup %3670  ;;  %v2564_v45 = vsub.f32 0.0, %v2544_v40  ;;  %3688 = vlog2.f32 %v2576_v35  ;;  %v2578_v46 = vadd.f32 1e-20, %v2562_v36  ;;  %v2548_v47 = vmul.f32 0.6931472, %v3669_v42 }
 0x598   :  { %v3673_v48 = vpop.eup %3672  ;;  %3690 = vlog2.f32 %v2577_v43  ;;  %v2579_v50 = vadd.f32 1e-20, %v2563_v44  ;;  %v2565_v51 = vsub.f32 0.0, %v2546_v0  ;;  %v2550_v52 = vmul.f32 0.6931472, %v3671_v20 }
 0x599   :  { %v2580_v55 = vadd.f32 1e-20, %v2564_v45  ;;  %3692 = vlog2.f32 %v2578_v46  ;;  %v2566_v58 = vsub.f32 0.0, %v2548_v47  ;;  %v2552_v59 = vmul.f32 0.6931472, %v3673_v48 }
 0x59a   :  { %v3675_v49 = vpop.eup %3674  ;;  %3694 = vlog2.f32 %v2579_v50  ;;  %v2581_v1 = vadd.f32 1e-20, %v2565_v51  ;;  %v2567_v2 = vsub.f32 0.0, %v2550_v52  ;;  %v3295_v44 = vld [vmem:[%s4806_s3 + $0x6] ss:$8 sm:$0x3] }
 0x59b   :  { %v3677_v53 = vpop.eup %3676  ;;  %v2586_v54 = vmul.f32 0.6931472, %v3675_v49  ;;  %3696 = vlog2.f32 %v2580_v55  ;;  %v2582_v9 = vadd.f32 1e-20, %v2566_v58  ;;  %v2568_v10 = vsub.f32 0.0, %v2552_v59 }
 0x59c   :  { %v3679_v56 = vpop.eup %3678  ;;  %v2588_v57 = vmul.f32 0.6931472, %v3677_v53  ;;  %3698 = vlog2.f32 %v2581_v1  ;;  %v2583_v14 = vadd.f32 1e-20, %v2567_v2  ;;  %v4214_v47 = vrot.slane %v3295_v44, %v3907_v39 }
 0x59d   :  { %v3681_v41 = vpop.eup %3680  ;;  %v2617_v60 = vsub.f32 0.0, %v2586_v54  ;;  %v2590_v61 = vmul.f32 0.6931472, %v3679_v56  ;;  %3700 = vlog2.f32 %v2582_v9  ;;  %v2584_v17 = vadd.f32 1e-20, %v2568_v10 }
 0x59e   :  { %v3683_v62 = vpop.eup %3682  ;;  %v2592_v63 = vmul.f32 0.6931472, %v3681_v41  ;;  %v2618_v3 = vsub.f32 0.0, %v2588_v57  ;;  %3702 = vlog2.f32 %v2583_v14  ;;  %v4217_v48 = vrot.slane %v3295_v44, %v3987_v5 }
 0x59f   :  { %v3685_v6 = vpop.eup %3684  ;;  %2649 = vrot.lane.b32.xlu0 %v2617_v60, %s3798_s1  ;;  %v2619_v4 = vsub.f32 0.0, %v2590_v61  ;;  %v2594_v7 = vmul.f32 0.6931472, %v3683_v62  ;;  %3704 = vlog2.f32 %v2584_v17 }
 0x5a0   :  { %v3687_v8 = vpop.eup %3686  ;;  %v2620_v11 = vsub.f32 0.0, %v2592_v63  ;;  %v2596_v12 = vmul.f32 0.6931472, %v3685_v6 }
 0x5a1   :  { %2653 = vrot.lane.b32.xlu1 %v2619_v4, %s3798_s1  ;;  %v3689_v13 = vpop.eup %3688  ;;  %v2621_v38 = vsub.f32 0.0, %v2594_v7  ;;  %v2598_v15 = vmul.f32 0.6931472, %v3687_v8 }
 0x5a2   :  { %v3691_v16 = vpop.eup %3690  ;;  %v2622_v18 = vsub.f32 0.0, %v2596_v12  ;;  %v2600_v19 = vmul.f32 0.6931472, %v3689_v13 }
 0x5a3   :  { %2651 = vrot.lane.b32.xlu0 %v2618_v3, %s3798_s1  ;;  %v3693_v21 = vpop.eup %3692  ;;  %v2623_v22 = vsub.f32 0.0, %v2598_v15  ;;  %v2602_v23 = vmul.f32 0.6931472, %v3691_v16 }
 0x5a4   :  { %v3695_v26 = vpop.eup %3694  ;;  %v2624_v27 = vsub.f32 0.0, %v2600_v19  ;;  %v2604_v24 = vmul.f32 0.6931472, %v3693_v21 }
 0x5a5   :  { %2655 = vrot.lane.b32.xlu1 %v2620_v11, %s3798_s1  ;;  %v3697_v25 = vpop.eup %3696  ;;  %v2625_v28 = vsub.f32 0.0, %v2602_v23  ;;  %v2606_v29 = vmul.f32 0.6931472, %v3695_v26 }
 0x5a6   :  { %v3699_v30 = vpop.eup %3698  ;;  %v2626_v33 = vsub.f32 0.0, %v2604_v24  ;;  %v2608_v31 = vmul.f32 0.6931472, %v3697_v25 }
 0x5a7   :  { %2657 = vrot.lane.b32.xlu0 %v2621_v38, %s3798_s1  ;;  %v3701_v32 = vpop.eup %3700  ;;  %v2627_v34 = vsub.f32 0.0, %v2606_v29  ;;  %v2610_v35 = vmul.f32 0.6931472, %v3699_v30 }
 0x5a8   :  { %v3703_v36 = vpop.eup %3702  ;;  %v2628_v40 = vsub.f32 0.0, %v2608_v31  ;;  %v2612_v42 = vmul.f32 0.6931472, %v3701_v32 }
 0x5a9   :  { %2659 = vrot.lane.b32.xlu1 %v2622_v18, %s3798_s1  ;;  %v3705_v43 = vpop.eup %3704  ;;  %v2629_v0 = vsub.f32 0.0, %v2610_v35  ;;  %v2614_v20 = vmul.f32 0.6931472, %v3703_v36 }
 0x5aa   :  { %v2630_v45 = vsub.f32 0.0, %v2612_v42  ;;  %v2616_v46 = vmul.f32 0.6931472, %v3705_v43 }
 0x5ab   :  { %2661 = vrot.lane.b32.xlu0 %v2623_v22, %s3798_s1  ;;  %v2631_v49 = vsub.f32 0.0, %v2614_v20 }
 0x5ac   :  { %v2632_v51 = vsub.f32 0.0, %v2616_v46 }
 0x5ad   :  { %2663 = vrot.lane.b32.xlu1 %v2624_v27, %s3798_s1 }
 0x5af   :  { %2665 = vrot.lane.b32.xlu0 %v2625_v28, %s3798_s1 }
 0x5b1   :  { %2667 = vrot.lane.b32.xlu1 %v2626_v33, %s3798_s1 }
 0x5b3   :  { %2669 = vrot.lane.b32.xlu0 %v2627_v34, %s3798_s1 }
 0x5b5   :  { %2671 = vrot.lane.b32.xlu1 %v2628_v40, %s3798_s1 }
 0x5b7   :  { %2673 = vrot.lane.b32.xlu0 %v2629_v0, %s3798_s1 }
 0x5b9   :  { %2675 = vrot.lane.b32.xlu1 %v2630_v45, %s3798_s1 }
 0x5bb   :  { %2677 = vrot.lane.b32.xlu0 %v2631_v49, %s3798_s1 }
 0x5bd   :  { %2679 = vrot.lane.b32.xlu1 %v2632_v51, %s3798_s1 }
 0x61f   :  { %v1969_v50 = vpop.f32.mrb[96].mxu0 }
 0x620   :  { %v1970_v52 = vadd.f32 %v1969_v50, %v4214_v47  ;;  %v1971_v53 = vpop.f32.mrb[97].mxu0 }
 0x621   :  { %v1972_v54 = vadd.f32 %v1971_v53, %v4217_v48  ;;  %v1973_v55 = vpop.f32.mrb[98].mxu0 }
 0x622   :  { %v1974_v56 = vadd.f32 %v1973_v55, %v4214_v47  ;;  %v1975_v57 = vpop.f32.mrb[99].mxu0  ;;  %v2048_v58 = vmax.f32 %v1970_v52, 0.0 }
 0x623   :  { %v1976_v5 = vadd.f32 %v1975_v57, %v4217_v48  ;;  %v2049_v41 = vmax.f32 %v1972_v54, 0.0 }
 0x624   :  { %v2050_v59 = vmax.f32 %v1974_v56, 0.0 }
 0x625   :  { %v2051_v60 = vmax.f32 %v1976_v5, 0.0 }
 0x626   :  { %v2114_v61 = vpack.c.bf16 %v2050_v59, %v2048_v58 }
 0x627   :  { %v2115_v62 = vpack.c.bf16 %v2051_v60, %v2049_v41  ;;  %v1979_v63 = vpop.f32.mrb[100].mxu0 }
 0x628   :  { %v1980_v1 = vadd.f32 %v1979_v63, %v4214_v47  ;;  %v1981_v2 = vpop.f32.mrb[101].mxu0 }
 0x629   :  { %v1982_v6 = vadd.f32 %v1981_v2, %v4217_v48  ;;  %v1983_v3 = vpop.f32.mrb[102].mxu0  ;;  %2328 = vmatprep.mubr.bf16.mxu1 %v2115_v62 }
 0x62a   :  { %v1984_v4 = vadd.f32 %v1983_v3, %v4214_v47  ;;  %v1985_v7 = vpop.f32.mrb[103].mxu0  ;;  %2329 = vmatmul.mubr.bf16.vlgmr.msra.gmra.mrb[96].mxu1 %v2114_v61  ;;  %v2052_v9 = vmax.f32 %v1980_v1, 0.0 }
 0x62b   :  { %v1986_v8 = vadd.f32 %v1985_v7, %v4217_v48  ;;  %v2053_v11 = vmax.f32 %v1982_v6, 0.0 }
 0x62c   :  { %v2054_v10 = vmax.f32 %v1984_v4, 0.0 }
 0x62d   :  { %v2055_v12 = vmax.f32 %v1986_v8, 0.0 }
 0x62e   :  { %v2116_v13 = vpack.c.bf16 %v2054_v10, %v2052_v9 }
 0x62f   :  { %v2117_v14 = vpack.c.bf16 %v2055_v12, %v2053_v11  ;;  %v1989_v38 = vpop.f32.mrb[104].mxu0 }
 0x630   :  { %v1990_v15 = vadd.f32 %v1989_v38, %v4214_v47  ;;  %v1991_v16 = vpop.f32.mrb[105].mxu0 }
 0x631   :  { %v1992_v17 = vadd.f32 %v1991_v16, %v4217_v48  ;;  %v1993_v18 = vpop.f32.mrb[106].mxu0  ;;  %2336 = vmatprep.mubr.bf16.mxu1 %v2117_v14 }
 0x632   :  { %v1994_v19 = vadd.f32 %v1993_v18, %v4214_v47  ;;  %v1995_v21 = vpop.f32.mrb[107].mxu0  ;;  %2337 = vmatmul.mubr.bf16.gmra.mrb[100].mxu1 %v2116_v13  ;;  %v2056_v23 = vmax.f32 %v1990_v15, 0.0 }
 0x633   :  { %v1996_v22 = vadd.f32 %v1995_v21, %v4217_v48  ;;  %v2057_v27 = vmax.f32 %v1992_v17, 0.0 }
 0x634   :  { %v2058_v26 = vmax.f32 %v1994_v19, 0.0 }
 0x635   :  { %v2059_v24 = vmax.f32 %v1996_v22, 0.0 }
 0x636   :  { %v2118_v25 = vpack.c.bf16 %v2058_v26, %v2056_v23 }
 0x637   :  { %v2119_v28 = vpack.c.bf16 %v2059_v24, %v2057_v27  ;;  %v1999_v29 = vpop.f32.mrb[108].mxu0 }
 0x638   :  { %v2000_v30 = vadd.f32 %v1999_v29, %v4214_v47  ;;  %v2001_v33 = vpop.f32.mrb[109].mxu0 }
 0x639   :  { %v2002_v31 = vadd.f32 %v2001_v33, %v4217_v48  ;;  %v2003_v32 = vpop.f32.mrb[110].mxu0  ;;  %2344 = vmatprep.mubr.bf16.mxu1 %v2119_v28 }
 0x63a   :  { %v2004_v34 = vadd.f32 %v2003_v32, %v4214_v47  ;;  %v2005_v35 = vpop.f32.mrb[111].mxu0  ;;  %2345 = vmatmul.mubr.bf16.gmra.mrb[104].mxu1 %v2118_v25  ;;  %v2060_v40 = vmax.f32 %v2000_v30, 0.0 }
 0x63b   :  { %v2006_v36 = vadd.f32 %v2005_v35, %v4217_v48  ;;  %v2061_v43 = vmax.f32 %v2002_v31, 0.0 }
 0x63c   :  { %v2062_v42 = vmax.f32 %v2004_v34, 0.0 }
 0x63d   :  { %v2063_v44 = vmax.f32 %v2006_v36, 0.0 }
 0x63e   :  { %v2120_v0 = vpack.c.bf16 %v2062_v42, %v2060_v40 }
 0x63f   :  { %v2121_v20 = vpack.c.bf16 %v2063_v44, %v2061_v43  ;;  %v2009_v45 = vpop.f32.mrb[112].mxu0  ;;  %v3328_v43 = vld [vmem:[%s4806_s3 + $0x7] ss:$8 sm:$0x3]  ;;  %v2650_v44 = vpop.permute.xlu0 %2649 }
 0x640   :  { %v2010_v46 = vadd.f32 %v2009_v45, %v4214_v47  ;;  %v2011_v49 = vpop.f32.mrb[113].mxu0 }
 0x641   :  { %v2012_v50 = vadd.f32 %v2011_v49, %v4217_v48  ;;  %v2013_v51 = vpop.f32.mrb[114].mxu0  ;;  %2352 = vmatprep.mubr.bf16.mxu1 %v2121_v20 }
 0x642   :  { %v2014_v52 = vadd.f32 %v2013_v51, %v4214_v47  ;;  %v2015_v53 = vpop.f32.mrb[115].mxu0  ;;  %2353 = vmatmul.mubr.bf16.gmra.mrb[108].mxu1 %v2120_v0  ;;  %v2064_v55 = vmax.f32 %v2010_v46, 0.0  ;;  %v4259_v0 = vrot.slane %v3328_v43, %v3907_v39 }
 0x643   :  { %v2016_v54 = vadd.f32 %v2015_v53, %v4217_v48  ;;  %v2065_v57 = vmax.f32 %v2012_v50, 0.0  ;;  %v2652_v46 = vpop.permute.xlu0 %2651 }
 0x644   :  { %v2066_v56 = vmax.f32 %v2014_v52, 0.0  ;;  %v2654_v52 = vpop.permute.xlu1 %2653 }
 0x645   :  { %v2067_v5 = vmax.f32 %v2016_v54, 0.0 }
 0x646   :  { %v2122_v58 = vpack.c.bf16 %v2066_v56, %v2064_v55 }
 0x647   :  { %v2123_v59 = vpack.c.bf16 %v2067_v5, %v2065_v57  ;;  %v2019_v41 = vpop.f32.mrb[116].mxu0 }
 0x648   :  { %v2020_v60 = vadd.f32 %v2019_v41, %v4214_v47  ;;  %v2021_v61 = vpop.f32.mrb[117].mxu0  ;;  %v2656_v41 = vpop.permute.xlu1 %2655 }
 0x649   :  { %v2022_v62 = vadd.f32 %v2021_v61, %v4217_v48  ;;  %v2023_v63 = vpop.f32.mrb[118].mxu0  ;;  %2360 = vmatprep.mubr.bf16.mxu1 %v2123_v59 }
 0x64a   :  { %v2024_v1 = vadd.f32 %v2023_v63, %v4214_v47  ;;  %v2025_v2 = vpop.f32.mrb[119].mxu0  ;;  %2361 = vmatmul.mubr.bf16.gmra.mrb[112].mxu1 %v2122_v58  ;;  %v2068_v3 = vmax.f32 %v2020_v60, 0.0 }
 0x64b   :  { %v2026_v6 = vadd.f32 %v2025_v2, %v4217_v48  ;;  %v2069_v7 = vmax.f32 %v2022_v62, 0.0 }
 0x64c   :  { %v2070_v4 = vmax.f32 %v2024_v1, 0.0 }
 0x64d   :  { %v2071_v8 = vmax.f32 %v2026_v6, 0.0 }
 0x64e   :  { %v2124_v9 = vpack.c.bf16 %v2070_v4, %v2068_v3  ;;  %v2658_v4 = vpop.permute.xlu0 %2657 }
 0x64f   :  { %v2125_v10 = vpack.c.bf16 %v2071_v8, %v2069_v7  ;;  %v2029_v11 = vpop.f32.mrb[120].mxu0 }
 0x650   :  { %v2030_v12 = vadd.f32 %v2029_v11, %v4214_v47  ;;  %v2031_v13 = vpop.f32.mrb[121].mxu0 }
 0x651   :  { %v2032_v14 = vadd.f32 %v2031_v13, %v4217_v48  ;;  %v2033_v38 = vpop.f32.mrb[122].mxu0  ;;  %2368 = vmatprep.mubr.bf16.mxu1 %v2125_v10  ;;  %v2660_v10 = vpop.permute.xlu1 %2659 }
 0x652   :  { %v2034_v15 = vadd.f32 %v2033_v38, %v4214_v47  ;;  %v2035_v16 = vpop.f32.mrb[123].mxu0  ;;  %2369 = vmatmul.mubr.bf16.gmra.mrb[116].mxu1 %v2124_v9  ;;  %v2072_v18 = vmax.f32 %v2030_v12, 0.0 }
 0x653   :  { %v2036_v17 = vadd.f32 %v2035_v16, %v4217_v48  ;;  %v2073_v21 = vmax.f32 %v2032_v14, 0.0 }
 0x654   :  { %v2074_v19 = vmax.f32 %v2034_v15, 0.0 }
 0x655   :  { %v2075_v22 = vmax.f32 %v2036_v17, 0.0 }
 0x656   :  { %v2126_v23 = vpack.c.bf16 %v2074_v19, %v2072_v18  ;;  %v2662_v19 = vpop.permute.xlu0 %2661 }
 0x657   :  { %v2127_v26 = vpack.c.bf16 %v2075_v22, %v2073_v21  ;;  %v2039_v27 = vpop.f32.mrb[124].mxu0 }
 0x658   :  { %v2040_v24 = vadd.f32 %v2039_v27, %v4214_v47  ;;  %v2041_v25 = vpop.f32.mrb[125].mxu0  ;;  %v2664_v27 = vpop.permute.xlu1 %2663 }
 0x659   :  { %v2042_v28 = vadd.f32 %v2041_v25, %v4217_v48  ;;  %v2043_v29 = vpop.f32.mrb[126].mxu0  ;;  %2376 = vmatprep.mubr.bf16.mxu1 %v2127_v26 }
 0x65a   :  { %v2044_v30 = vadd.f32 %v2043_v29, %v4214_v47  ;;  %v2045_v33 = vpop.f32.mrb[127].mxu0  ;;  %2377 = vmatmul.mubr.bf16.gmra.mrb[120].mxu1 %v2126_v23  ;;  %v2076_v32 = vmax.f32 %v2040_v24, 0.0 }
 0x65b   :  { %v2046_v31 = vadd.f32 %v2045_v33, %v4217_v48  ;;  %v2077_v35 = vmax.f32 %v2042_v28, 0.0 }
 0x65c   :  { %v2078_v34 = vmax.f32 %v2044_v30, 0.0  ;;  %v2668_v43 = vpop.permute.xlu1 %2667 }
 0x65d   :  { %v2079_v36 = vmax.f32 %v2046_v31, 0.0 }
 0x65e   :  { %v2128_v40 = vpack.c.bf16 %v2078_v34, %v2076_v32  ;;  %v2666_v34 = vpop.permute.xlu0 %2665 }
 0x65f   :  { %v2129_v42 = vpack.c.bf16 %v2079_v36, %v2077_v35 }
 0x661   :  { %2384 = vmatprep.mubr.bf16.mxu1 %v2129_v42 }
 0x662   :  { %2385 = vmatmul.mubr.bf16.gmra.mrb[124].mxu1 %v2128_v40 }
 0x6fd   :  { %v2330_v47 = vpop.f32.mrb[96].mxu1 }
 0x6fe   :  { %v4262_v20 = vadd.f32 %v2330_v47, %v4259_v0  ;;  %v2332_v48 = vpop.f32.mrb[97].mxu1 }
 0x6ff   :  { %v2333_v45 = vpop.f32.mrb[98].mxu1 }
 0x700   :  { %v2697_v49 = vadd.f32 %v2650_v44, %v4262_v20  ;;  %v4266_v50 = vadd.f32 %v2333_v45, %v4259_v0  ;;  %v2335_v51 = vpop.f32.mrb[99].mxu1 }
 0x702   :  { %v2698_v53 = vadd.f32 %v2652_v46, %v4266_v50  ;;  %v4269_v54 = vmul.f32 1.25, %v2697_v49 }
 0x704   :  { %v4271_v39 = vmul.f32 1.25, %v2698_v53  ;;  %v2732_v55 = vsel %vm2731_vm1, %v4269_v54, -inf  ;;  %v2670_v53 = vpop.permute.xlu0 %2669 }
 0x705   :  { %v2338_v56 = vpop.f32.mrb[100].mxu1  ;;  %2733 = vmax.xlane.f32.xlu0 %v2732_v55 }
 0x706   :  { %v4276_v57 = vadd.f32 %v2338_v56, %v4259_v0  ;;  %v2340_v5 = vpop.f32.mrb[101].mxu1  ;;  %v2735_v58 = vsel %vm2731_vm1, %v4271_v39, -inf }
 0x707   :  { %v2341_v59 = vpop.f32.mrb[102].mxu1  ;;  %2736 = vmax.xlane.f32.xlu1 %v2735_v58 }
 0x708   :  { %v2699_v60 = vadd.f32 %v2654_v52, %v4276_v57  ;;  %v4282_v61 = vadd.f32 %v2341_v59, %v4259_v0  ;;  %v2343_v62 = vpop.f32.mrb[103].mxu1  ;;  %v2672_v59 = vpop.permute.xlu1 %2671 }
 0x70a   :  { %v2700_v63 = vadd.f32 %v2656_v41, %v4282_v61  ;;  %v4285_v1 = vmul.f32 1.25, %v2699_v60 }
 0x70c   :  { %v4287_v2 = vmul.f32 1.25, %v2700_v63  ;;  %v2738_v6 = vsel %vm2731_vm1, %v4285_v1, -inf }
 0x70d   :  { %v2346_v3 = vpop.f32.mrb[104].mxu1  ;;  %2739 = vmax.xlane.f32.xlu0 %v2738_v6 }
 0x70e   :  { %v4292_v7 = vadd.f32 %v2346_v3, %v4259_v0  ;;  %v2348_v8 = vpop.f32.mrb[105].mxu1  ;;  %v2741_v14 = vsel %vm2731_vm1, %v4287_v2, -inf }
 0x70f   :  { %v2349_v9 = vpop.f32.mrb[106].mxu1 }
 0x710   :  { %v2701_v11 = vadd.f32 %v2658_v4, %v4292_v7  ;;  %v4296_v12 = vadd.f32 %v2349_v9, %v4259_v0  ;;  %v2351_v13 = vpop.f32.mrb[107].mxu1  ;;  %v2674_v9 = vpop.permute.xlu0 %2673 }
 0x711   :  { %2742 = vmax.xlane.f32.xlu0 %v2741_v14 }
 0x712   :  { %v4300_v38 = vmul.f32 1.25, %v2701_v11  ;;  %v2702_v15 = vadd.f32 %v2660_v10, %v4296_v12 }
 0x714   :  { %v4303_v16 = vmul.f32 1.25, %v2702_v15  ;;  %v2744_v17 = vsel %vm2731_vm1, %v4300_v38, -inf  ;;  %v2676_v15 = vpop.permute.xlu1 %2675 }
 0x715   :  { %v2354_v18 = vpop.f32.mrb[108].mxu1  ;;  %2745 = vmax.xlane.f32.xlu1 %v2744_v17 }
 0x716   :  { %v4308_v21 = vadd.f32 %v2354_v18, %v4259_v0  ;;  %v2356_v22 = vpop.f32.mrb[109].mxu1  ;;  %v2747_v23 = vsel %vm2731_vm1, %v4303_v16, -inf }
 0x717   :  { %v2357_v26 = vpop.f32.mrb[110].mxu1  ;;  %2748 = vmax.xlane.f32.xlu0 %v2747_v23 }
 0x718   :  { %v2703_v24 = vadd.f32 %v2662_v19, %v4308_v21  ;;  %v4314_v25 = vadd.f32 %v2357_v26, %v4259_v0  ;;  %v2359_v28 = vpop.f32.mrb[111].mxu1 }
 0x719   :  { %v2678_v28 = vpop.permute.xlu0 %2677 }
 0x71a   :  { %v4316_v29 = vmul.f32 1.25, %v2703_v24  ;;  %v2704_v30 = vadd.f32 %v2664_v27, %v4314_v25 }
 0x71c   :  { %v4319_v33 = vmul.f32 1.25, %v2704_v30  ;;  %v2750_v31 = vsel %vm2731_vm1, %v4316_v29, -inf }
 0x71d   :  { %v2362_v32 = vpop.f32.mrb[112].mxu1  ;;  %2751 = vmax.xlane.f32.xlu1 %v2750_v31 }
 0x71e   :  { %v4324_v35 = vadd.f32 %v2362_v32, %v4259_v0  ;;  %v2364_v36 = vpop.f32.mrb[113].mxu1  ;;  %v2753_v40 = vsel %vm2731_vm1, %v4319_v33, -inf }
 0x71f   :  { %v2365_v42 = vpop.f32.mrb[114].mxu1  ;;  %2754 = vmax.xlane.f32.xlu0 %v2753_v40  ;;  %v2680_v36 = vpop.permute.xlu1 %2679 }
 0x720   :  { %v2705_v44 = vadd.f32 %v2666_v34, %v4324_v35  ;;  %v4330_v47 = vadd.f32 %v2365_v42, %v4259_v0  ;;  %v2367_v48 = vpop.f32.mrb[115].mxu1 }
 0x722   :  { %v4332_v45 = vmul.f32 1.25, %v2705_v44  ;;  %v2706_v46 = vadd.f32 %v2668_v43, %v4330_v47 }
 0x724   :  { %v4335_v49 = vmul.f32 1.25, %v2706_v46  ;;  %v2756_v51 = vsel %vm2731_vm1, %v4332_v45, -inf }
 0x725   :  { %v2370_v52 = vpop.f32.mrb[116].mxu1  ;;  %2757 = vmax.xlane.f32.xlu1 %v2756_v51 }
 0x726   :  { %v4340_v55 = vadd.f32 %v2370_v52, %v4259_v0  ;;  %v2372_v56 = vpop.f32.mrb[117].mxu1  ;;  %v2759_v5 = vsel %vm2731_vm1, %v4335_v49, -inf }
 0x727   :  { %v2373_v58 = vpop.f32.mrb[118].mxu1  ;;  %2760 = vmax.xlane.f32.xlu0 %v2759_v5 }
 0x728   :  { %v2707_v41 = vadd.f32 %v2670_v53, %v4340_v55  ;;  %v4346_v60 = vadd.f32 %v2373_v58, %v4259_v0  ;;  %v2375_v62 = vpop.f32.mrb[119].mxu1  ;;  %v4387_v53 = vand.u32 127, %v62_v37 }
 0x72a   :  { %v4348_v63 = vmul.f32 1.25, %v2707_v41  ;;  %v2708_v6 = vadd.f32 %v2672_v59, %v4346_v60 }
 0x72c   :  { %v4351_v3 = vmul.f32 1.25, %v2708_v6  ;;  %v2762_v4 = vsel %vm2731_vm1, %v4348_v63, -inf }
 0x72d   :  { %v2378_v8 = vpop.f32.mrb[120].mxu1  ;;  %2763 = vmax.xlane.f32.xlu1 %v2762_v4 }
 0x72e   :  { %v4356_v10 = vadd.f32 %v2378_v8, %v4259_v0  ;;  %v2380_v11 = vpop.f32.mrb[121].mxu1  ;;  %v2765_v13 = vsel %vm2731_vm1, %v4351_v3, -inf }
 0x72f   :  { %v2381_v14 = vpop.f32.mrb[122].mxu1  ;;  %2766 = vmax.xlane.f32.xlu0 %v2765_v13 }
 0x730   :  { %v2709_v17 = vadd.f32 %v2674_v9, %v4356_v10  ;;  %v4362_v18 = vadd.f32 %v2381_v14, %v4259_v0  ;;  %v2383_v19 = vpop.f32.mrb[123].mxu1 }
 0x732   :  { %v4364_v22 = vmul.f32 1.25, %v2709_v17  ;;  %v2710_v23 = vadd.f32 %v2676_v15, %v4362_v18 }
 0x734   :  { %v4367_v26 = vmul.f32 1.25, %v2710_v23  ;;  %v2768_v27 = vsel %vm2731_vm1, %v4364_v22, -inf }
 0x735   :  { %v2386_v24 = vpop.f32.mrb[124].mxu1  ;;  %2769 = vmax.xlane.f32.xlu1 %v2768_v27 }
 0x736   :  { %v4372_v30 = vadd.f32 %v2386_v24, %v4259_v0  ;;  %v2388_v31 = vpop.f32.mrb[125].mxu1  ;;  %v2771_v32 = vsel %vm2731_vm1, %v4367_v26, -inf }
 0x737   :  { %v2389_v34 = vpop.f32.mrb[126].mxu1  ;;  %2772 = vmax.xlane.f32.xlu0 %v2771_v32 }
 0x738   :  { %v2711_v40 = vadd.f32 %v2678_v28, %v4372_v30  ;;  %v4378_v42 = vadd.f32 %v2389_v34, %v4259_v0  ;;  %v2391_v43 = vpop.f32.mrb[127].mxu1 }
 0x73a   :  { %v2727_v44 = vmul.f32 1.25, %v2711_v40  ;;  %v2712_v48 = vadd.f32 %v2680_v36, %v4378_v42 }
 0x73c   :  { %v4381_v46 = vmul.f32 1.25, %v2712_v48  ;;  %v2774_v51 = vsel %vm2731_vm1, %v2727_v44, -inf }
 0x73d   :  { %2775 = vmax.xlane.f32.xlu1 %v2774_v51 }
 0x73e   :  { %v2777_v52 = vsel %vm2731_vm1, %v4381_v46, -inf }
 0x73f   :  { %2778 = vmax.xlane.f32.xlu0 %v2777_v52 }
 0x74e   :  { %2796 = vrot.lane.b32.xlu1 %v4387_v53, %s3798_s1 }
 0x792   :  { %v2734_v62 = vpop.xlane.xlu0 %2733 }
 0x793   :  { %vm2780_vm2 = vcmp.eq.f32.partialorder %v4269_v54, %v2734_v62 }
 0x794   :  { %v2737_v0 = vpop.xlane.xlu1 %2736 }
 0x795   :  { %vm2781_vm3 = vcmp.eq.f32.partialorder %v4271_v39, %v2737_v0 }
 0x79a   :  { %v2740_v4 = vpop.xlane.xlu0 %2739 }
 0x79b   :  { %vm2782_vm6 = vcmp.eq.f32.partialorder %v4285_v1, %v2740_v4 }
 0x7a2   :  { %v2746_v56 = vpop.xlane.xlu1 %2745 }
 0x7a3   :  { %vm2784_vm4 = vcmp.eq.f32.partialorder %v4300_v38, %v2746_v56  ;;  %v2743_v38 = vpop.xlane.xlu0 %2742 }
 0x7a4   :  { %vm2783_vm7 = vcmp.eq.f32.partialorder %v4287_v2, %v2743_v38 }
 0x7a7   :  { %v2749_v32 = vpop.xlane.xlu0 %2748 }
 0x7a8   :  { %vm2785_vm8 = vcmp.eq.f32.partialorder %v4303_v16, %v2749_v32 }
 0x7aa   :  { %v2752_v5 = vpop.xlane.xlu1 %2751 }
 0x7ab   :  { %vm2786_vm9 = vcmp.eq.f32.partialorder %v4316_v29, %v2752_v5 }
 0x7ac   :  { %v2755_v0 = vpop.xlane.xlu0 %2754 }
 0x7ad   :  { %vm2787_vm10 = vcmp.eq.f32.partialorder %v4319_v33, %v2755_v0 }
 0x7b2   :  { %v2758_v58 = vpop.xlane.xlu1 %2757 }
 0x7b3   :  { %vm2788_vm11 = vcmp.eq.f32.partialorder %v4332_v45, %v2758_v58 }
 0x7ba   :  { %v4391_v59 = vpop.xlane.xlu1 %2763 }
 0x7bb   :  { %vm2790_vm13 = vcmp.eq.f32.partialorder %v4348_v63, %v4391_v59 }
 0x7c2   :  { %v4393_v41 = vpop.xlane.xlu1 %2769 }
 0x7c3   :  { %vm2792_vm15 = vcmp.eq.f32.partialorder %v4364_v22, %v4393_v41 }
 0x7ca   :  { %v2776_v6 = vpop.xlane.xlu1 %2775 }
 0x7cb   :  { %vm2794_vm5 = vcmp.eq.f32.partialorder %v2727_v44, %v2776_v6 }
 0x7ce   :  { %v4398_v37 = vpop.permute.xlu1 %2796 }
 0x7cf   :  { %v2802_v8 = vsel %vm2784_vm4, %v4398_v37, 16  ;;  %v2798_v9 = vsel %vm2780_vm2, %v4398_v37, 16  ;;  %v2812_v11 = vsel %vm2794_vm5, %v4398_v37, 16  ;;  %v2799_v13 = vsel %vm2781_vm3, %v4398_v37, 16 }
 0x7d0   :  { %v4405_v14 = vsel %vm2731_vm1, %v2802_v8, 2147483647  ;;  %v4408_v54 = vsel %vm2731_vm1, %v2798_v9, 2147483647  ;;  %v4411_v39 = vsel %vm2731_vm1, %v2812_v11, 2147483647  ;;  %v2761_v9 = vpop.xlane.xlu0 %2760 }
 0x7d1   :  { %v2876_v15 = vshra.s32 %v4405_v14, 16  ;;  %v2816_v17 = vshra.s32 %v4408_v54, 16  ;;  %v4417_v19 = vsel %vm2731_vm1, %v2799_v13, 2147483647  ;;  %v2800_v23 = vsel %vm2782_vm6, %v4398_v37, 16 }
 0x7d2   :  { %v3026_v28 = vshra.s32 %v4411_v39, 16  ;;  %v2831_v31 = vshra.s32 %v4417_v19, 16  ;;  %v4428_v1 = vsel %vm2731_vm1, %v2800_v23, 2147483647  ;;  %v2801_v34 = vsel %vm2783_vm7, %v4398_v37, 16 }
 0x7d3   :  { %v4420_v27 = vcvt.s32.f32 %v2876_v15  ;;  %v4422_v24 = vcvt.s32.f32 %v2816_v17  ;;  %v2846_v43 = vshra.s32 %v4428_v1, 16  ;;  %v4440_v2 = vsel %vm2731_vm1, %v2801_v34, 2147483647 }
 0x7d4   :  { %v4433_v36 = vcvt.s32.f32 %v3026_v28  ;;  %v4435_v40 = vcvt.s32.f32 %v2831_v31  ;;  %v2803_v44 = vsel %vm2785_vm8, %v4398_v37, 16  ;;  %v2861_v51 = vshra.s32 %v4440_v2, 16  ;;  %v2767_v23 = vpop.xlane.xlu0 %2766 }
 0x7d5   :  { %2879 = vmin.xlane.f32.xlu1 %v4420_v27  ;;  %2819 = vmin.xlane.f32.xlu0 %v4422_v24  ;;  %v4445_v48 = vcvt.s32.f32 %v2846_v43  ;;  %v4450_v52 = vsel %vm2731_vm1, %v2803_v44, 2147483647  ;;  %v2804_v16 = vsel %vm2786_vm9, %v4398_v37, 16  ;;  %v2805_v29 = vsel %vm2787_vm10, %v4398_v37, 16 }
 0x7d6   :  { %v4454_v56 = vcvt.s32.f32 %v2861_v51  ;;  %v2891_v62 = vshra.s32 %v4450_v52, 16  ;;  %v4459_v6 = vsel %vm2731_vm1, %v2804_v16, 2147483647  ;;  %v4468_v8 = vsel %vm2731_vm1, %v2805_v29, 2147483647 }
 0x7d7   :  { %v2906_v4 = vshra.s32 %v4459_v6, 16  ;;  %v2806_v33 = vsel %vm2788_vm11, %v4398_v37, 16  ;;  %v2921_v13 = vshra.s32 %v4468_v8, 16  ;;  %vm2789_vm12 = vcmp.eq.f32.partialorder %v4335_v49, %v2761_v9 }
 0x7d8   :  { %v4463_v5 = vcvt.s32.f32 %v2891_v62  ;;  %v4477_v38 = vsel %vm2731_vm1, %v2806_v33, 2147483647  ;;  %v2807_v45 = vsel %vm2789_vm12, %v4398_v37, 16  ;;  %v2808_v49 = vsel %vm2790_vm13, %v4398_v37, 16  ;;  %v2773_v59 = vpop.xlane.xlu0 %2772 }
 0x7d9   :  { %3029 = vmin.xlane.f32.xlu1 %v4433_v36  ;;  %2834 = vmin.xlane.f32.xlu0 %v4435_v40  ;;  %v4472_v11 = vcvt.s32.f32 %v2906_v4  ;;  %v4481_v58 = vcvt.s32.f32 %v2921_v13  ;;  %v2936_v15 = vshra.s32 %v4477_v38, 16  ;;  %v4487_v17 = vsel %vm2731_vm1, %v2807_v45, 2147483647 }
 0x7da   :  { %v2951_v31 = vshra.s32 %v4487_v17, 16  ;;  %vm2791_vm14 = vcmp.eq.f32.partialorder %v4351_v3, %v2767_v23  ;;  %v4496_v32 = vsel %vm2731_vm1, %v2808_v49, 2147483647  ;;  %v2810_v3 = vsel %vm2792_vm15, %v4398_v37, 16 }
 0x7db   :  { %v4491_v28 = vcvt.s32.f32 %v2936_v15  ;;  %v2809_v63 = vsel %vm2791_vm14, %v4398_v37, 16  ;;  %v2966_v43 = vshra.s32 %v4496_v32, 16  ;;  %vm2793_vm0 = vcmp.eq.f32.partialorder %v4367_v26, %v2773_v59 }
 0x7dc   :  { %v4500_v34 = vcvt.s32.f32 %v2951_v31  ;;  %v4506_v44 = vsel %vm2731_vm1, %v2809_v63, 2147483647  ;;  %v2779_v51 = vpop.xlane.xlu0 %2778  ;;  %v4515_v62 = vsel %vm2731_vm1, %v2810_v3, 2147483647  ;;  %v2811_v22 = vsel %vm2793_vm0, %v4398_v37, 16 }
 0x7dd   :  { %2849 = vmin.xlane.f32.xlu0 %v4445_v48  ;;  %v4510_v0 = vcvt.s32.f32 %v2966_v43  ;;  %v2981_v16 = vshra.s32 %v4506_v44, 16  ;;  %vm2795_vm2 = vcmp.eq.f32.partialorder %v4381_v46, %v2779_v51  ;;  %v2996_v29 = vshra.s32 %v4515_v62, 16 }
 0x7de   :  { %v4524_v4 = vsel %vm2731_vm1, %v2811_v22, 2147483647  ;;  %v2813_v26 = vsel %vm2795_vm2, %v4398_v37, 16  ;;  %v2815_v37 = vand.u32 65535, %v4408_v54  ;;  %v2830_v31 = vand.u32 65535, %v4417_v19 }
 0x7df   :  { %v4520_v41 = vcvt.s32.f32 %v2981_v16  ;;  %v4528_v9 = vcvt.s32.f32 %v2996_v29  ;;  %v3011_v33 = vshra.s32 %v4524_v4, 16  ;;  %v4532_v13 = vsel %vm2731_vm1, %v2813_v26, 2147483647 }
 0x7e0   :  { %v3041_v45 = vshra.s32 %v4532_v13, 16  ;;  %v2817_v49 = vcvt.s32.f32 %v2815_v37  ;;  %v2832_v43 = vcvt.s32.f32 %v2830_v31  ;;  %v2845_v3 = vand.u32 65535, %v4428_v1 }
 0x7e1   :  { %2864 = vmin.xlane.f32.xlu0 %v4454_v56  ;;  %v4535_v46 = vcvt.s32.f32 %v3011_v33  ;;  %v2875_v22 = vand.u32 65535, %v4405_v14  ;;  %v2890_v33 = vand.u32 65535, %v4450_v52  ;;  %v2905_v37 = vand.u32 65535, %v4459_v6 }
 0x7e2   :  { %v4539_v15 = vcvt.s32.f32 %v3041_v45  ;;  %v2847_v19 = vcvt.s32.f32 %v2845_v3  ;;  %v2920_v31 = vand.u32 65535, %v4468_v8  ;;  %v2935_v6 = vand.u32 65535, %v4477_v38 }
 0x7e3   :  { %v2907_v52 = vcvt.s32.f32 %v2905_v37  ;;  %v2950_v8 = vand.u32 65535, %v4487_v17  ;;  %v2965_v38 = vand.u32 65535, %v4496_v32  ;;  %v2980_v17 = vand.u32 65535, %v4506_v44 }
 0x7e4   :  { %v2995_v32 = vand.u32 65535, %v4515_v62 }
 0x7e5   :  { %2894 = vmin.xlane.f32.xlu0 %v4463_v5 }
 0x7e6   :  { %v2997_v44 = vcvt.s32.f32 %v2995_v32 }
 0x7e9   :  { %2909 = vmin.xlane.f32.xlu0 %v4472_v11 }
 0x7ed   :  { %2924 = vmin.xlane.f32.xlu0 %v4481_v58 }
 0x7f1   :  { %2939 = vmin.xlane.f32.xlu0 %v4491_v28 }
 0x7f5   :  { %2954 = vmin.xlane.f32.xlu0 %v4500_v34 }
 0x7f9   :  { %2969 = vmin.xlane.f32.xlu0 %v4510_v0 }
 0x7fd   :  { %2984 = vmin.xlane.f32.xlu0 %v4520_v41 }
 0x801   :  { %2999 = vmin.xlane.f32.xlu0 %v4528_v9 }
 0x805   :  { %3014 = vmin.xlane.f32.xlu0 %v4535_v46 }
 0x809   :  { %3044 = vmin.xlane.f32.xlu0 %v4539_v15 }
 0x862   :  { %v4543_v23 = vpop.xlane.xlu0 %2819  ;;  %v4553_v54 = vpop.xlane.xlu1 %2879 }
 0x863   :  { %vm2821_vm1 = vcmp.eq.f32.partialorder %v4422_v24, %v4543_v23  ;;  %v2860_v24 = vand.u32 65535, %v4440_v2  ;;  %vm2881_vm5 = vcmp.eq.f32.partialorder %v4420_v27, %v4553_v54 }
 0x864   :  { %v2822_v63 = vsel %vm2821_vm1, %v2817_v49, inf  ;;  %vm3054_vm1 = vcmp.ge.s32.totalorder %v4387_v53, 64 }
 0x865   :  { %2823 = vmin.xlane.f32.xlu1 %v2822_v63  ;;  %v2862_v26 = vcvt.s32.f32 %v2860_v24 }
 0x866   :  { %v4548_v59 = vpop.xlane.xlu0 %2834 }
 0x867   :  { %vm2836_vm3 = vcmp.eq.f32.partialorder %v4435_v40, %v4548_v59  ;;  %v2877_v40 = vcvt.s32.f32 %v2875_v22  ;;  %v2952_v22 = vcvt.s32.f32 %v2950_v8  ;;  %v2398_v8 = vsub.f32 0.0, %v4296_v12 }
 0x868   :  { %v2837_v51 = vsel %vm2836_vm3, %v2832_v43, inf  ;;  %v2922_v43 = vcvt.s32.f32 %v2920_v31  ;;  %v2393_v31 = vsub.f32 0.0, %v4262_v20  ;;  %v2399_v20 = vsub.f32 0.0, %v4308_v21 }
 0x869   :  { %2838 = vmin.xlane.f32.xlu0 %v2837_v51  ;;  %v2882_v14 = vsel %vm2881_vm5, %v2877_v40, inf  ;;  %v2937_v51 = vcvt.s32.f32 %v2935_v6  ;;  %v2826_v12 = vcvt.f32.s32 %v4543_v23  ;;  %vm3120_vm3 = vcmp.lt.s32.totalorder %v4387_v53, 64 }
 0x86a   :  { %v4555_v16 = vpop.xlane.xlu0 %2849 }
 0x86b   :  { %vm2851_vm4 = vcmp.eq.f32.partialorder %v4445_v48, %v4555_v16  ;;  %v2892_v48 = vcvt.s32.f32 %v2890_v33  ;;  %v4603_v33 = vpop.xlane.xlu1 %3029 }
 0x86c   :  { %v2852_v29 = vsel %vm2851_vm4, %v2847_v19, inf  ;;  %vm3031_vm15 = vcmp.eq.f32.partialorder %v4433_v36, %v4603_v33 }
 0x86d   :  { %2853 = vmin.xlane.f32.xlu1 %v2852_v29  ;;  %v2967_v29 = vcvt.s32.f32 %v2965_v38  ;;  %v2419_v38 = vmul.f32 1.442695, %v2398_v8 }
 0x86e   :  { %v4563_v1 = vpop.xlane.xlu0 %2864 }
 0x86f   :  { %vm2866_vm6 = vcmp.eq.f32.partialorder %v4454_v56, %v4563_v1 }
 0x870   :  { %v2867_v45 = vsel %vm2866_vm6, %v2862_v26, inf  ;;  %v2982_v26 = vcvt.s32.f32 %v2980_v17 }
 0x871   :  { %2883 = vmin.xlane.f32.xlu1 %v2882_v14  ;;  %2868 = vmin.xlane.f32.xlu0 %v2867_v45  ;;  %v3025_v45 = vand.u32 65535, %v4411_v39 }
 0x872   :  { %v4568_v2 = vpop.xlane.xlu0 %2894 }
 0x873   :  { %vm2896_vm7 = vcmp.eq.f32.partialorder %v4463_v5, %v4568_v2 }
 0x874   :  { %v2897_v27 = vsel %vm2896_vm7, %v2892_v48, inf }
 0x875   :  { %2898 = vmin.xlane.f32.xlu0 %v2897_v27  ;;  %v3040_v27 = vand.u32 65535, %v4532_v13  ;;  %v2394_v13 = vsub.f32 0.0, %v4266_v50  ;;  %v2400_v50 = vsub.f32 0.0, %v4314_v25  ;;  %v4634_v25 = vadd.s32 4294967232, %v4387_v53 }
 0x876   :  { %v4573_v49 = vpop.xlane.xlu0 %2909 }
 0x877   :  { %vm2911_vm8 = vcmp.eq.f32.partialorder %v4472_v11, %v4573_v49 }
 0x878   :  { %v2912_v56 = vsel %vm2911_vm8, %v2907_v52, inf }
 0x879   :  { %2913 = vmin.xlane.f32.xlu1 %v2912_v56  ;;  %v2409_v56 = vmul.f32 1.442695, %v2393_v31 }
 0x87a   :  { %v4578_v63 = vpop.xlane.xlu0 %2924 }
 0x87b   :  { %vm2926_vm9 = vcmp.eq.f32.partialorder %v4481_v58, %v4578_v63  ;;  %3706 = vpow2.f32 %v2409_v56 }
 0x87c   :  { %v2927_v5 = vsel %vm2926_vm9, %v2922_v43, inf  ;;  %v2411_v43 = vmul.f32 1.442695, %v2394_v13  ;;  %v2403_v13 = vsub.f32 0.0, %v4340_v55 }
 0x87d   :  { %2928 = vmin.xlane.f32.xlu0 %v2927_v5  ;;  %v2397_v5 = vsub.f32 0.0, %v4292_v7  ;;  %v2423_v7 = vmul.f32 1.442695, %v2400_v50 }
 0x87e   :  { %v4583_v3 = vpop.xlane.xlu0 %2939  ;;  %3708 = vpow2.f32 %v2411_v43 }
 0x87f   :  { %vm2941_vm10 = vcmp.eq.f32.partialorder %v4491_v28, %v4583_v3 }
 0x880   :  { %v2942_v11 = vsel %vm2941_vm10, %v2937_v51, inf  ;;  %v2396_v51 = vsub.f32 0.0, %v4282_v61 }
 0x881   :  { %2943 = vmin.xlane.f32.xlu1 %v2942_v11 }
 0x882   :  { %v4588_v19 = vpop.xlane.xlu0 %2954 }
 0x883   :  { %vm2956_vm11 = vcmp.eq.f32.partialorder %v4500_v34, %v4588_v19 }
 0x884   :  { %v2957_v58 = vsel %vm2956_vm11, %v2952_v22, inf  ;;  %v2415_v22 = vmul.f32 1.442695, %v2396_v51 }
 0x885   :  { %2958 = vmin.xlane.f32.xlu0 %v2957_v58  ;;  %v3707_v11 = vpop.eup %3706  ;;  %v2421_v58 = vmul.f32 1.442695, %v2399_v20  ;;  %v2429_v20 = vmul.f32 1.442695, %v2403_v13 }
 0x886   :  { %v4593_v24 = vpop.xlane.xlu0 %2969 }
 0x887   :  { %vm2971_vm12 = vcmp.eq.f32.partialorder %v4510_v0, %v4593_v24  ;;  %v3010_v0 = vand.u32 65535, %v4524_v4 }
 0x888   :  { %v2972_v28 = vsel %vm2971_vm12, %v2967_v29, inf  ;;  %v3709_v29 = vpop.eup %3708 }
 0x889   :  { %2973 = vmin.xlane.f32.xlu1 %v2972_v28  ;;  %v3012_v37 = vcvt.s32.f32 %v3010_v0  ;;  %v2442_v17 = vadd.f32 1.0, %v3709_v29  ;;  %v2401_v28 = vsub.f32 0.0, %v4324_v35 }
 0x88a   :  { %v4598_v40 = vpop.xlane.xlu0 %2984 }
 0x88b   :  { %vm2986_vm13 = vcmp.eq.f32.partialorder %v4520_v41, %v4598_v40  ;;  %v3027_v41 = vcvt.s32.f32 %v3025_v45  ;;  %v2841_v45 = vcvt.f32.s32 %v4548_v59 }
 0x88c   :  { %v2987_v34 = vsel %vm2986_vm13, %v2982_v26, inf  ;;  %v2402_v26 = vsub.f32 0.0, %v4330_v47 }
 0x88d   :  { %2988 = vmin.xlane.f32.xlu0 %v2987_v34  ;;  %v3032_v39 = vsel %vm3031_vm15, %v3027_v41, inf }
 0x88e   :  { %v4605_v14 = vpop.xlane.xlu0 %2999 }
 0x88f   :  { %vm3001_vm14 = vcmp.eq.f32.partialorder %v4528_v9, %v4605_v14  ;;  %v3042_v9 = vcvt.s32.f32 %v3040_v27 }
 0x890   :  { %v3002_v48 = vsel %vm3001_vm14, %v2997_v44, inf  ;;  %v2827_v44 = vshll.u32 %v2826_v12, 16  ;;  %v2901_v12 = vcvt.f32.s32 %v4568_v2 }
 0x891   :  { %3003 = vmin.xlane.f32.xlu1 %v3002_v48  ;;  %v2425_v48 = vmul.f32 1.442695, %v2401_v28 }
 0x892   :  { %v4613_v62 = vpop.xlane.xlu0 %3014 }
 0x893   :  { %vm3016_vm0 = vcmp.eq.f32.partialorder %v4535_v46, %v4613_v62  ;;  %v2395_v46 = vsub.f32 0.0, %v4276_v57  ;;  %v2441_v57 = vadd.f32 1.0, %v3707_v11 }
 0x894   :  { %v3017_v52 = vsel %vm3016_vm0, %v3012_v37, inf  ;;  %v2427_v37 = vmul.f32 1.442695, %v2402_v26 }
 0x895   :  { %3033 = vmin.xlane.f32.xlu1 %v3032_v39  ;;  %3018 = vmin.xlane.f32.xlu0 %v3017_v52  ;;  %v2413_v6 = vmul.f32 1.442695, %v2395_v46  ;;  %v2842_v39 = vshll.u32 %v2841_v45, 16  ;;  %v2856_v52 = vcvt.f32.s32 %v4555_v16  ;;  %v3799_v46 = vmov 0.0  }
 0x896   :  { %v4618_v4 = vpop.xlane.xlu0 %3044  ;;  %v2886_v16 = vcvt.f32.s32 %v4553_v54  ;;  %v2404_v54 = vsub.f32 0.0, %v4346_v60 }
 0x897   :  { %vm3046_vm2 = vcmp.eq.f32.partialorder %v4539_v15, %v4618_v4  ;;  %3710 = vpow2.f32 %v2413_v6  ;;  %v2417_v15 = vmul.f32 1.442695, %v2397_v5  ;;  %v2871_v5 = vcvt.f32.s32 %v4563_v1 }
 0x898   :  { %v3047_v36 = vsel %vm3046_vm2, %v3042_v9, inf  ;;  %v2857_v11 = vshll.u32 %v2856_v52, 16  ;;  %v2431_v26 = vmul.f32 1.442695, %v2404_v54 }
 0x899   :  { %3048 = vmin.xlane.f32.xlu0 %v3047_v36  ;;  %3712 = vpow2.f32 %v2417_v15  ;;  %v2872_v29 = vshll.u32 %v2871_v5, 16  ;;  %v2408_v5 = vsub.f32 0.0, %v4378_v42 }
 0x89a   :  { %3714 = vpow2.f32 %v2415_v22 }
 0x89b   :  { %3716 = vpow2.f32 %v2419_v38 }
 0x89c   :  { %3718 = vrcp.f32 %v2441_v57 }
 0x89d   :  { %3720 = vpow2.f32 %v2421_v58  ;;  %v2887_v58 = vshll.u32 %v2886_v16, 16 }
 0x89e   :  { %3722 = vpow2.f32 %v2423_v7 }
 0x89f   :  { %3724 = vrcp.f32 %v2442_v17 }
 0x8a1   :  { %v3711_v61 = vpop.eup %3710 }
 0x8a2   :  { %v2443_v21 = vadd.f32 1.0, %v3711_v61 }
 0x8a3   :  { %v3713_v34 = vpop.eup %3712 }
 0x8a4   :  { %v3715_v41 = vpop.eup %3714  ;;  %3726 = vrcp.f32 %v2443_v21  ;;  %v2445_v47 = vadd.f32 1.0, %v3713_v34 }
 0x8a5   :  { %v3717_v23 = vpop.eup %3716  ;;  %v2444_v36 = vadd.f32 1.0, %v3715_v41  ;;  %3728 = vpow2.f32 %v2425_v48 }
 0x8a6   :  { %v3719_v59 = vpop.eup %3718  ;;  %v2446_v56 = vadd.f32 1.0, %v3717_v23  ;;  %3730 = vrcp.f32 %v2445_v47 }
 0x8a7   :  { %v3721_v31 = vpop.eup %3720  ;;  %3732 = vpow2.f32 %v2427_v37 }
 0x8a8   :  { %v3723_v15 = vpop.eup %3722  ;;  %3734 = vrcp.f32 %v2444_v36  ;;  %v2447_v22 = vadd.f32 1.0, %v3721_v31 }
 0x8a9   :  { %v3725_v1 = vpop.eup %3724  ;;  %3736 = vrcp.f32 %v2446_v56  ;;  %v2448_v57 = vadd.f32 1.0, %v3723_v15 }
 0x8aa   :  { %3738 = vrcp.f32 %v2447_v22 }
 0x8ab   :  { %3740 = vpow2.f32 %v2429_v20  ;;  %v2946_v20 = vcvt.f32.s32 %v4583_v3 }
 0x8ac   :  { %3742 = vrcp.f32 %v2448_v57 }
 0x8ad   :  { %3744 = vpow2.f32 %v2431_v26 }
 0x8ae   :  { %v3727_v21 = vpop.eup %3726 }
 0x8af   :  { %v3729_v45 = vpop.eup %3728 }
 0x8b0   :  { %v3731_v23 = vpop.eup %3730  ;;  %v2449_v37 = vadd.f32 1.0, %v3729_v45 }
 0x8f2   :  { %v2824_v32 = vpop.xlane.xlu1 %2823 }
 0x8f3   :  { %v2825_v0 = vcvt.f32.s32 %v2824_v32  ;;  %v2405_v32 = vsub.f32 0.0, %v4356_v10 }
 0x8f5   :  { %v2828_v35 = vadd.s32 %v2827_v44, %v2825_v0  ;;  %v2916_v0 = vcvt.f32.s32 %v4573_v49  ;;  %v2433_v47 = vmul.f32 1.442695, %v2405_v32  ;;  %v3733_v49 = vpop.eup %3732 }
 0x8f6   :  { %v2839_v27 = vpop.xlane.xlu0 %2838  ;;  %v2450_v16 = vadd.f32 1.0, %v3733_v49 }
 0x8f7   :  { %vm3056_vm4 = vcmp.eq.s32.totalorder %v4634_v25, %v2828_v35  ;;  %v2840_v9 = vcvt.f32.s32 %v2839_v27  ;;  %v2902_v35 = vshll.u32 %v2901_v12, 16  ;;  %v2407_v27 = vsub.f32 0.0, %v4372_v30 }
 0x8f8   :  { %vm3072_vm5 = vmand %vm3054_vm1, %vm3056_vm4  ;;  %v2917_v36 = vshll.u32 %v2916_v0, 16  ;;  %3746 = vpow2.f32 %v2433_v47  ;;  %v2961_v12 = vcvt.f32.s32 %v4588_v19 }
 0x8f9   :  { %v3362_v43 = vsel %vm3072_vm5, 1.0, %v3799_v46  ;;  %v2843_v6 = vadd.s32 %v2842_v39, %v2840_v9  ;;  %v3735_v9 = vpop.eup %3734  ;;  %3748 = vrcp.f32 %v2449_v37  ;;  %v2991_v37 = vcvt.f32.s32 %v4598_v40 }
 0x8fa   :  { %v3121_v51 = vsel %vm3120_vm3, %v3719_v59, %v3362_v43  ;;  %v2854_v8 = vpop.xlane.xlu1 %2853  ;;  %v2406_v59 = vsub.f32 0.0, %v4362_v18  ;;  %v3737_v43 = vpop.eup %3736  ;;  %3750 = vrcp.f32 %v2450_v16 }
 0x8fb   :  { %3137 = vst [vmem:[%s4807_s4] sm:$0xff] %v3121_v51  ;;  %vm3057_vm6 = vcmp.eq.s32.totalorder %v4634_v25, %v2843_v6  ;;  %v2855_v55 = vcvt.f32.s32 %v2854_v8  ;;  %v2931_v6 = vcvt.f32.s32 %v4578_v63  ;;  %v2437_v63 = vmul.f32 1.442695, %v2407_v27  ;;  %v3739_v15 = vpop.eup %3738 }
 0x8fc   :  { %vm3073_vm7 = vmand %vm3054_vm1, %vm3057_vm6  ;;  %v3741_v54 = vpop.eup %3740 }
 0x8fd   :  { %v3363_v38 = vsel %vm3073_vm7, 1.0, %v3799_v46  ;;  %v2858_v50 = vadd.s32 %v2857_v11, %v2855_v55  ;;  %v2435_v11 = vmul.f32 1.442695, %v2406_v59  ;;  %3752 = vpow2.f32 %v2437_v63 }
 0x8fe   :  { %v3122_v7 = vsel %vm3120_vm3, %v3725_v1, %v3363_v38  ;;  %v2884_v61 = vpop.xlane.xlu1 %2883  ;;  %v2869_v17 = vpop.xlane.xlu0 %2868  ;;  %v2932_v1 = vshll.u32 %v2931_v6, 16 }
 0x8ff   :  { %3138 = vst [vmem:[%s4807_s4 + $0x8] sm:$0xff] %v3122_v7  ;;  %vm3058_vm8 = vcmp.eq.s32.totalorder %v4634_v25, %v2858_v50  ;;  %v2885_v60 = vcvt.f32.s32 %v2884_v61  ;;  %v2870_v28 = vcvt.f32.s32 %v2869_v17  ;;  %v3743_v38 = vpop.eup %3742  ;;  %v2439_v50 = vmul.f32 1.442695, %v2408_v5 }
 0x900   :  { %vm3074_vm9 = vmand %vm3054_vm1, %vm3058_vm8  ;;  %v2451_v7 = vadd.f32 1.0, %v3741_v54  ;;  %3754 = vpow2.f32 %v2435_v11  ;;  %v2947_v17 = vshll.u32 %v2946_v20, 16  ;;  %v3036_v5 = vcvt.f32.s32 %v4603_v33 }
 0x901   :  { %v3364_v34 = vsel %vm3074_vm9, 1.0, %v3799_v46  ;;  %v2888_v2 = vadd.s32 %v2887_v58, %v2885_v60  ;;  %v2873_v44 = vadd.s32 %v2872_v29, %v2870_v28  ;;  %v3745_v29 = vpop.eup %3744  ;;  %3756 = vpow2.f32 %v2439_v50 }
 0x902   :  { %v3123_v48 = vsel %vm3120_vm3, %v3727_v21, %v3364_v34  ;;  %v2899_v41 = vpop.xlane.xlu0 %2898  ;;  %v3747_v26 = vpop.eup %3746  ;;  %3758 = vrcp.f32 %v2451_v7  ;;  %v2452_v32 = vadd.f32 1.0, %v3745_v29 }
 0x903   :  { %3139 = vst [vmem:[%s4807_s4 + $0x10] sm:$0xff] %v3123_v48  ;;  %vm3060_vm10 = vcmp.eq.s32.totalorder %v4634_v25, %v2888_v2  ;;  %vm3059_vm11 = vcmp.eq.s32.totalorder %v4634_v25, %v2873_v44  ;;  %v2900_v10 = vcvt.f32.s32 %v2899_v41  ;;  %v2962_v2 = vshll.u32 %v2961_v12, 16  ;;  %v3749_v0 = vpop.eup %3748 }
 0x904   :  { %vm3076_vm12 = vmand %vm3054_vm1, %vm3060_vm10  ;;  %v2976_v44 = vcvt.f32.s32 %v4593_v24  ;;  %3760 = vrcp.f32 %v2452_v32 }
 0x905   :  { %v3366_v39 = vsel %vm3076_vm12, 1.0, %v3799_v46  ;;  %vm3075_vm13 = vmand %vm3054_vm1, %vm3059_vm11  ;;  %v2903_v52 = vadd.s32 %v2902_v35, %v2900_v10  ;;  %v3751_v35 = vpop.eup %3750  ;;  %v2453_v10 = vadd.f32 1.0, %v3747_v26 }
 0x906   :  { %v3125_v31 = vsel %vm3120_vm3, %v3731_v23, %v3366_v39  ;;  %v3365_v56 = vsel %vm3075_vm13, 1.0, %v3799_v46  ;;  %v2914_v13 = vpop.xlane.xlu1 %2913  ;;  %v2977_v49 = vshll.u32 %v2976_v44, 16 }
 0x907   :  { %3141 = vst [vmem:[%s4807_s4 + $0x20] sm:$0xff] %v3125_v31  ;;  %v3124_v30 = vsel %vm3120_vm3, %v3735_v9, %v3365_v56  ;;  %vm3061_vm14 = vcmp.eq.s32.totalorder %v4634_v25, %v2903_v52  ;;  %v2915_v18 = vcvt.f32.s32 %v2914_v13  ;;  %v3753_v47 = vpop.eup %3752  ;;  %3762 = vrcp.f32 %v2453_v10 }
 0x908   :  { %3140 = vst [vmem:[%s4807_s4 + $0x18] sm:$0xff] %v3124_v30  ;;  %vm3077_vm15 = vmand %vm3054_vm1, %vm3061_vm14  ;;  %v2455_v59 = vadd.f32 1.0, %v3753_v47  ;;  %v2992_v56 = vshll.u32 %v2991_v37, 16  ;;  %v3006_v13 = vcvt.f32.s32 %v4605_v14  ;;  %v3021_v14 = vcvt.f32.s32 %v4613_v62 }
 0x909   :  { %v3367_v51 = vsel %vm3077_vm15, 1.0, %v3799_v46  ;;  %v2918_v8 = vadd.s32 %v2917_v36, %v2915_v18 }
 0x90a   :  { %v3126_v55 = vsel %vm3120_vm3, %v3737_v43, %v3367_v51  ;;  %v2929_v22 = vpop.xlane.xlu0 %2928  ;;  %v3755_v39 = vpop.eup %3754  ;;  %3764 = vrcp.f32 %v2455_v59  ;;  %v3022_v54 = vshll.u32 %v3021_v14, 16 }
 0x90b   :  { %3142 = vst [vmem:[%s4807_s4 + $0x28] sm:$0xff] %v3126_v55  ;;  %vm3062_vm0 = vcmp.eq.s32.totalorder %v4634_v25, %v2918_v8  ;;  %v2930_v42 = vcvt.f32.s32 %v2929_v22  ;;  %v3757_v31 = vpop.eup %3756  ;;  %v2454_v30 = vadd.f32 1.0, %v3755_v39  ;;  %v3037_v22 = vshll.u32 %v3036_v5, 16 }
 0x90c   :  { %vm3078_vm2 = vmand %vm3054_vm1, %vm3062_vm0  ;;  %v3759_v6 = vpop.eup %3758  ;;  %v2456_v63 = vadd.f32 1.0, %v3757_v31 }
 0x90d   :  { %v3368_v57 = vsel %vm3078_vm2, 1.0, %v3799_v46  ;;  %v2933_v58 = vadd.s32 %v2932_v1, %v2930_v42  ;;  %3766 = vrcp.f32 %v2454_v30 }
 0x90e   :  { %v3127_v3 = vsel %vm3120_vm3, %v3739_v15, %v3368_v57  ;;  %v2944_v61 = vpop.xlane.xlu1 %2943  ;;  %v3007_v15 = vshll.u32 %v3006_v13, 16  ;;  %v3761_v55 = vpop.eup %3760  ;;  %3768 = vrcp.f32 %v2456_v63 }
 0x90f   :  { %3143 = vst [vmem:[%s4807_s4 + $0x30] sm:$0xff] %v3127_v3  ;;  %vm3063_vm4 = vcmp.eq.s32.totalorder %v4634_v25, %v2933_v58  ;;  %v2945_v60 = vcvt.f32.s32 %v2944_v61 }
 0x910   :  { %vm3079_vm5 = vmand %vm3054_vm1, %vm3063_vm4 }
 0x911   :  { %v3369_v28 = vsel %vm3079_vm5, 1.0, %v3799_v46  ;;  %v2948_v21 = vadd.s32 %v2947_v17, %v2945_v60  ;;  %v3763_v58 = vpop.eup %3762 }
 0x912   :  { %v3128_v19 = vsel %vm3120_vm3, %v3743_v38, %v3369_v28  ;;  %v2959_v34 = vpop.xlane.xlu0 %2958  ;;  %v3051_v38 = vcvt.f32.s32 %v4618_v4 }
 0x913   :  { %3144 = vst [vmem:[%s4807_s4 + $0x38] sm:$0xff] %v3128_v19  ;;  %vm3064_vm6 = vcmp.eq.s32.totalorder %v4634_v25, %v2948_v21  ;;  %v2960_v45 = vcvt.f32.s32 %v2959_v34 }
 0x914   :  { %vm3080_vm7 = vmand %vm3054_vm1, %vm3064_vm6  ;;  %v3052_v17 = vshll.u32 %v3051_v38, 16  ;;  %v3765_v60 = vpop.eup %3764 }
 0x915   :  { %v3370_v48 = vsel %vm3080_vm7, 1.0, %v3799_v46  ;;  %v2963_v41 = vadd.s32 %v2962_v2, %v2960_v45 }
 0x916   :  { %v3129_v24 = vsel %vm3120_vm3, %v3749_v0, %v3370_v48  ;;  %v2974_v23 = vpop.xlane.xlu1 %2973 }
 0x917   :  { %3145 = vst [vmem:[%s4807_s4 + $0x40] sm:$0xff] %v3129_v24  ;;  %vm3065_vm8 = vcmp.eq.s32.totalorder %v4634_v25, %v2963_v41  ;;  %v2975_v27 = vcvt.f32.s32 %v2974_v23  ;;  %v3767_v26 = vpop.eup %3766 }
 0x918   :  { %vm3081_vm9 = vmand %vm3054_vm1, %vm3065_vm8  ;;  %v3769_v2 = vpop.eup %3768 }
 0x919   :  { %v3371_v52 = vsel %vm3081_vm9, 1.0, %v3799_v46  ;;  %v2978_v9 = vadd.s32 %v2977_v49, %v2975_v27 }
 0x91a   :  { %v3130_v36 = vsel %vm3120_vm3, %v3751_v35, %v3371_v52  ;;  %v2989_v40 = vpop.xlane.xlu0 %2988 }
 0x91b   :  { %3146 = vst [vmem:[%s4807_s4 + $0x48] sm:$0xff] %v3130_v36  ;;  %vm3066_vm10 = vcmp.eq.s32.totalorder %v4634_v25, %v2978_v9  ;;  %v2990_v43 = vcvt.f32.s32 %v2989_v40 }
 0x91c   :  { %vm3082_vm11 = vmand %vm3054_vm1, %vm3066_vm10 }
 0x91d   :  { %v3372_v18 = vsel %vm3082_vm11, 1.0, %v3799_v46  ;;  %v2993_v16 = vadd.s32 %v2992_v56, %v2990_v43 }
 0x91e   :  { %v3131_v51 = vsel %vm3120_vm3, %v3759_v6, %v3372_v18  ;;  %v3004_v8 = vpop.xlane.xlu1 %3003 }
 0x91f   :  { %3147 = vst [vmem:[%s4807_s4 + $0x50] sm:$0xff] %v3131_v51  ;;  %vm3067_vm12 = vcmp.eq.s32.totalorder %v4634_v25, %v2993_v16  ;;  %v3005_v11 = vcvt.f32.s32 %v3004_v8 }
 0x920   :  { %vm3083_vm13 = vmand %vm3054_vm1, %vm3067_vm12 }
 0x921   :  { %v3373_v33 = vsel %vm3083_vm13, 1.0, %v3799_v46  ;;  %v3008_v62 = vadd.s32 %v3007_v15, %v3005_v11 }
 0x922   :  { %v3132_v1 = vsel %vm3120_vm3, %v3761_v55, %v3373_v33  ;;  %v3034_v20 = vpop.xlane.xlu1 %3033  ;;  %v3019_v42 = vpop.xlane.xlu0 %3018 }
 0x923   :  { %3148 = vst [vmem:[%s4807_s4 + $0x58] sm:$0xff] %v3132_v1  ;;  %vm3068_vm14 = vcmp.eq.s32.totalorder %v4634_v25, %v3008_v62  ;;  %v3035_v50 = vcvt.f32.s32 %v3034_v20  ;;  %v3020_v57 = vcvt.f32.s32 %v3019_v42 }
 0x924   :  { %vm3084_vm15 = vmand %vm3054_vm1, %vm3068_vm14 }
 0x925   :  { %v3374_v29 = vsel %vm3084_vm15, 1.0, %v3799_v46  ;;  %v3038_v7 = vadd.s32 %v3037_v22, %v3035_v50  ;;  %v3023_v3 = vadd.s32 %v3022_v54, %v3020_v57 }
 0x926   :  { %v3133_v61 = vsel %vm3120_vm3, %v3763_v58, %v3374_v29  ;;  %v3049_v4 = vpop.xlane.xlu0 %3048 }
 0x927   :  { %3149 = vst [vmem:[%s4807_s4 + $0x60] sm:$0xff] %v3133_v61  ;;  %vm3070_vm0 = vcmp.eq.s32.totalorder %v4634_v25, %v3038_v7  ;;  %vm3069_vm2 = vcmp.eq.s32.totalorder %v4634_v25, %v3023_v3  ;;  %v3050_v12 = vcvt.f32.s32 %v3049_v4 }
 0x928   :  { %vm3086_vm4 = vmand %vm3054_vm1, %vm3070_vm0 }
 0x929   :  { %v3376_v28 = vsel %vm3086_vm4, 1.0, %v3799_v46  ;;  %vm3085_vm5 = vmand %vm3054_vm1, %vm3069_vm2  ;;  %v3053_v21 = vadd.s32 %v3052_v17, %v3050_v12 }
 0x92a   :  { %v3135_v32 = vsel %vm3120_vm3, %v3765_v60, %v3376_v28  ;;  %v3375_v19 = vsel %vm3085_vm5, 1.0, %v3799_v46 }
 0x92b   :  { %3151 = vst [vmem:[%s4807_s4 + $0x70] sm:$0xff] %v3135_v32  ;;  %v3134_v34 = vsel %vm3120_vm3, %v3767_v26, %v3375_v19  ;;  %vm3071_vm6 = vcmp.eq.s32.totalorder %v4634_v25, %v3053_v21 }
 0x92c   :  { %3150 = vst [vmem:[%s4807_s4 + $0x68] sm:$0xff] %v3134_v34  ;;  %vm3087_vm7 = vmand %vm3054_vm1, %vm3071_vm6 }
 0x92d   :  { %v3377_v44 = vsel %vm3087_vm7, 1.0, %v3799_v46 }
 0x92e   :  { %v3136_v45 = vsel %vm3120_vm3, %v3769_v2, %v3377_v44 }
 0x92f   :  { %3152 = vst [vmem:[%s4807_s4 + $0x78] sm:$0xff] %v3136_v45 }
 0x930   :  { %3157 = vsyncpa [#allocation3], 1 }

</bundles_post_ra>
